<compile_context>
chip_gen: v5e
topology: v5e:2x2
jax: 0.10.0
libtpu: 0.0.40
codegen_flags: <defaults>
</compile_context>

<pallas_src>
import functools

import jax
import jax.numpy as jnp
from jax.experimental import pallas as pl
from jax.experimental.pallas import tpu as pltpu

EPS = 1e-5
TILE_M = 512               # measured sweet spot for pipelined mem-bound tiles
VMEM_LIMIT = 32 * 1024 * 1024


def _round_up(x, m):
    return ((x + m - 1) // m) * m


# ----------------------------- Pallas kernels --------------------------------
def _matmul_stats_kernel(a_ref, w_ref, y_ref, stats_ref):
    """Conv-as-matmul tile + per-tile partial BN statistics.

    a_ref:     (tm, K)   bf16 im2col patch tile
    w_ref:     (K, C)    bf16 reshaped conv weight (same block every grid step)
    y_ref:     (tm, C)   f32 raw conv output tile
    stats_ref: (1, 2, C) f32 partial [sum, sum_of_squares] over this tile's rows
    """
    y = jnp.dot(a_ref[...], w_ref[...], preferred_element_type=jnp.float32)
    y_ref[...] = y
    s1 = jnp.sum(y, axis=0, keepdims=True)          # (1, C)
    s2 = jnp.sum(y * y, axis=0, keepdims=True)      # (1, C)
    stats_ref[...] = jnp.concatenate([s1, s2], axis=0)[None]   # (1, 2, C)


def _bn_relu_kernel(y_ref, scale_ref, bias_ref, o_ref):
    """Fused per-channel affine (folded BN) + ReLU on one (tm, C) tile."""
    o_ref[...] = jnp.maximum(y_ref[...] * scale_ref[...] + bias_ref[...], 0.0)


# ------------------------------ JAX glue -------------------------------------
def _im2col(x_nhwc, k=3, stride=2):
    """Valid (padding=0) im2col. x_nhwc: (N, H, W, C) -> (N*OH*OW, k*k*C)."""
    # TODO(synk): im2col is still materialized in HBM (9x activation blowup); an in-kernel
    #             strided-tap gather (9 accumulating matmuls with halo'd input windows) would
    #             remove that bandwidth cost but is deferred.
    n, h, w, c = x_nhwc.shape
    oh = (h - k) // stride + 1
    ow = (w - k) // stride + 1
    cols = []
    for kh in range(k):
        for kw in range(k):
            sl = x_nhwc[:,
                        kh:kh + stride * (oh - 1) + 1:stride,
                        kw:kw + stride * (ow - 1) + 1:stride,
                        :]                                       # (N, OH, OW, C)
            cols.append(sl)
    patches = jnp.stack(cols, axis=3)                            # (N, OH, OW, 9, C)
    return patches.reshape(n * oh * ow, k * k * c), (n, oh, ow)


def _block_forward(x_nhwc, w_mat_bf16, gamma, beta):
    """One Block: conv3x3 stride2 pad0 (no bias) -> BN (batch stats) -> ReLU."""
    a, (n, oh, ow) = _im2col(x_nhwc)
    m, k = a.shape
    c = w_mat_bf16.shape[1]

    # --- M tiling (padded with zero rows; padding does not perturb the statistics) ---
    tm = min(TILE_M, _round_up(m, 8))
    m_pad = _round_up(m, tm)
    n_tiles = m_pad // tm
    if m_pad != m:
        a = jnp.pad(a, ((0, m_pad - m), (0, 0)))
    a_bf16 = a.astype(jnp.bfloat16)   # bf16 operands for the MXU; accumulate in f32

    cparams = pltpu.CompilerParams(
        dimension_semantics=("parallel",),
        vmem_limit_bytes=VMEM_LIMIT,
    )

    # ---------------- pass 1: tiled matmul + partial BN statistics ----------------
    cost1 = pl.CostEstimate(
        flops=int(2 * m_pad * k * c),
        transcendentals=0,
        bytes_accessed=int(m_pad * k * 2 + k * c * 2 + m_pad * c * 4 + n_tiles * 2 * c * 4),
    )
    y, stats = pl.pallas_call(
        _matmul_stats_kernel,
        out_shape=(
            jax.ShapeDtypeStruct((m_pad, c), jnp.float32),
            jax.ShapeDtypeStruct((n_tiles, 2, c), jnp.float32),
        ),
        grid=(n_tiles,),
        in_specs=[
            pl.BlockSpec((tm, k), lambda i: (i, 0)),
            pl.BlockSpec((k, c), lambda i: (0, 0)),
        ],
        out_specs=(
            pl.BlockSpec((tm, c), lambda i: (i, 0)),
            pl.BlockSpec((1, 2, c), lambda i: (i, 0, 0)),
        ),
        compiler_params=cparams,
        cost_estimate=cost1,
    )(a_bf16, w_mat_bf16)

    # --- tiny per-channel reduction + BN parameter folding (f32, numerically safe) ---
    sums = jnp.sum(stats, axis=0)                               # (2, C)
    mean = sums[0] / m                                          # divide by TRUE row count
    var = jnp.maximum(sums[1] / m - mean * mean, 0.0)           # clamp: avoid rsqrt(<0) NaNs
    inv_std = jax.lax.rsqrt(var + EPS)
    scale = (gamma[0] * inv_std)[None, :]                       # (1, C)
    bias = (beta[0] - mean * gamma[0] * inv_std)[None, :]       # (1, C)

    # ---------------- pass 2: tiled fused affine + ReLU ----------------
    cost2 = pl.CostEstimate(
        flops=int(3 * m_pad * c),
        transcendentals=0,
        bytes_accessed=int(2 * m_pad * c * 4 + 2 * c * 4),
    )
    out = pl.pallas_call(
        _bn_relu_kernel,
        out_shape=jax.ShapeDtypeStruct((m_pad, c), jnp.float32),
        grid=(n_tiles,),
        in_specs=[
            pl.BlockSpec((tm, c), lambda i: (i, 0)),
            pl.BlockSpec((1, c), lambda i: (0, 0)),
            pl.BlockSpec((1, c), lambda i: (0, 0)),
        ],
        out_specs=pl.BlockSpec((tm, c), lambda i: (i, 0)),
        compiler_params=cparams,
        cost_estimate=cost2,
    )(y, scale, bias)

    out = out[:m]
    return out.reshape(n, oh, ow, c)


def _xavier_uniform(key, cout, cin, k=3):
    """torch.nn.init.xavier_uniform_ for a (Cout, Cin, k, k) conv weight."""
    fan_in = cin * k * k
    fan_out = cout * k * k
    a = (6.0 / (fan_in + fan_out)) ** 0.5
    return jax.random.uniform(key, (cout, cin, k, k), jnp.float32, minval=-a, maxval=a)


def init_params(key):
    ks = jax.random.split(key, 3)
    dims = [(3, 64), (64, 128), (128, 256)]
    params = []
    for kk, (cin, cout) in zip(ks, dims):
        w = _xavier_uniform(kk, cout, cin)                       # (Cout, Cin, 3, 3) PyTorch layout
        # -> (K, Cout) with row ordering (kh, kw, cin) matching the im2col patch layout.
        # Stored in bf16: MXU operands are bf16, accumulation stays f32 in-kernel.
        w_mat = jnp.transpose(w, (2, 3, 1, 0)).reshape(9 * cin, cout).astype(jnp.bfloat16)
        gamma = jnp.ones((1, cout), jnp.float32)                 # BN default init
        beta = jnp.zeros((1, cout), jnp.float32)
        params.append((w_mat, gamma, beta))
    return params


@jax.jit
def context_net_forward(x_nchw, params):
    """ContextNet forward. x_nchw: (N, 3, H, W) float32 -> (N, 256*OH3*OW3)."""
    x = jnp.transpose(x_nchw, (0, 2, 3, 1))                      # NCHW -> NHWC
    for (w_mat, gamma, beta) in params:
        x = _block_forward(x, w_mat, gamma, beta)
    # PyTorch flattens in NCHW order: x.view(N, -1)
    x = jnp.transpose(x, (0, 3, 1, 2))
    return x.reshape(x.shape[0], -1)


# TODO(synk): BatchNorm running_mean/running_var updates (training-mode side effect) are not
#             modeled; only the forward output (batch statistics) is reproduced.
# TODO(synk): layer 1 (K=27, C=64) underutilizes the MXU contraction/output width and produces
#             lane-sparse (C=64) stores; not special-cased since it is a tiny fraction of FLOPs.


if __name__ == "__main__":
    key = jax.random.PRNGKey(0)
    k_param, k_x = jax.random.split(key)

    params = init_params(k_param)
    # CIFAR-like input: 32x32 is the smallest natural size for three stride-2 valid 3x3 convs.
    x = jax.random.normal(k_x, (2, 3, 32, 32), jnp.float32)

    out = context_net_forward(x, params)
    out = jax.block_until_ready(out)

    assert out.shape == (2, 256 * 3 * 3), out.shape
    assert jnp.all(jnp.isfinite(out))
    print("KERNEL_OK")
</pallas_src>

<mosaic_0001>
module attributes {stable_mosaic.version = 11 : i64} {
  func.func @_matmul_stats_kernel(%arg0: i32, %arg1: memref<456x27xbf16, #tpu.memory_space<vmem>>, %arg2: memref<27x64xbf16, #tpu.memory_space<vmem>>, %arg3: memref<456x64xf32, #tpu.memory_space<vmem>>, %arg4: memref<1x2x64xf32, #tpu.memory_space<vmem>>) attributes {dimension_semantics = [#tpu.dimension_semantics<parallel>], iteration_bounds = array<i64: 1>, scalar_prefetch = 0 : i64, scratch_operands = 0 : i64, tpu.core_type = #tpu.core_type<tc>, window_params = [{transform_indices = @transform_0, window_bounds = array<i64: 456, 27>}, {pipeline_mode = #tpu.pipeline_mode<synchronous>, transform_indices = @transform_1, window_bounds = array<i64: 27, 64>}, {transform_indices = @transform_2, window_bounds = array<i64: 456, 64>}, {transform_indices = @transform_3, window_bounds = array<i64: 1, 2, 64>}]} {
    %c0 = arith.constant 0 : index
    %c0_0 = arith.constant 0 : index
    %0 = vector.load %arg1[%c0, %c0_0] : memref<456x27xbf16, #tpu.memory_space<vmem>>, vector<456x27xbf16>
    %c0_1 = arith.constant 0 : index
    %c0_2 = arith.constant 0 : index
    %1 = vector.load %arg2[%c0_1, %c0_2] : memref<27x64xbf16, #tpu.memory_space<vmem>>, vector<27x64xbf16>
    %cst = arith.constant dense<0.000000e+00> : vector<456x64xf32>
    %2 = tpu.matmul %0, %1, %cst {dimension_numbers = #tpu.dot_dimension_numbers<[1], [0], [0], [1], [0, 0, 1, 1], [], []>} : vector<456x27xbf16>, vector<27x64xbf16>, vector<456x64xf32> -> vector<456x64xf32>
    %c0_3 = arith.constant 0 : index
    %c0_4 = arith.constant 0 : index
    %3 = vector.load %arg3[%c0_3, %c0_4] : memref<456x64xf32, #tpu.memory_space<vmem>>, vector<456x64xf32>
    tpu.vector_store %arg3[%c0_3, %c0_4], %2 {strides = array<i32>} : memref<456x64xf32, #tpu.memory_space<vmem>>, vector<456x64xf32>,
    %cst_5 = arith.constant dense<0.000000e+00> : vector<64xf32>
    %4 = vector.multi_reduction <add>, %2, %cst_5 [0] : vector<456x64xf32> to vector<64xf32>
    %5 = vector.shape_cast %4 : vector<64xf32> to vector<1x64xf32>
    %6 = arith.mulf %2, %2 : vector<456x64xf32>
    %cst_6 = arith.constant dense<0.000000e+00> : vector<64xf32>
    %7 = vector.multi_reduction <add>, %6, %cst_6 [0] : vector<456x64xf32> to vector<64xf32>
    %8 = vector.shape_cast %7 : vector<64xf32> to vector<1x64xf32>
    %9 = tpu.concatenate %5, %8 in 0 : vector<1x64xf32>, vector<1x64xf32> -> vector<2x64xf32>
    %10 = vector.shape_cast %9 : vector<2x64xf32> to vector<1x2x64xf32>
    %c0_7 = arith.constant 0 : index
    %c0_8 = arith.constant 0 : index
    %c0_9 = arith.constant 0 : index
    %11 = vector.load %arg4[%c0_7, %c0_8, %c0_9] : memref<1x2x64xf32, #tpu.memory_space<vmem>>, vector<1x2x64xf32>
    tpu.vector_store %arg4[%c0_7, %c0_8, %c0_9], %10 {strides = array<i32>} : memref<1x2x64xf32, #tpu.memory_space<vmem>>, vector<1x2x64xf32>,
    return
  }
  func.func @transform_0(%arg0: i32) -> (i32, i32) {
    %c0_i32 = arith.constant 0 : i32
    %c0_i32_0 = arith.constant 0 : i32
    return %arg0, %c0_i32 : i32, i32
  }
  func.func @transform_1(%arg0: i32) -> (i32, i32) {
    %c0_i32 = arith.constant 0 : i32
    %c0_i32_0 = arith.constant 0 : i32
    %c0_i32_1 = arith.constant 0 : i32
    return %c0_i32, %c0_i32_0 : i32, i32
  }
  func.func @transform_2(%arg0: i32) -> (i32, i32) {
    %c0_i32 = arith.constant 0 : i32
    %c0_i32_0 = arith.constant 0 : i32
    return %arg0, %c0_i32 : i32, i32
  }
  func.func @transform_3(%arg0: i32) -> (i32, i32, i32) {
    %c0_i32 = arith.constant 0 : i32
    %c0_i32_0 = arith.constant 0 : i32
    %c0_i32_1 = arith.constant 0 : i32
    return %arg0, %c0_i32, %c0_i32_0 : i32, i32, i32
  }
}

module attributes {stable_mosaic.version = 11 : i64} {
  func.func @_bn_relu_kernel(%arg0: i32, %arg1: memref<456x64xf32, #tpu.memory_space<vmem>>, %arg2: memref<1x64xf32, #tpu.memory_space<vmem>>, %arg3: memref<1x64xf32, #tpu.memory_space<vmem>>, %arg4: memref<456x64xf32, #tpu.memory_space<vmem>>) attributes {dimension_semantics = [#tpu.dimension_semantics<parallel>], iteration_bounds = array<i64: 1>, scalar_prefetch = 0 : i64, scratch_operands = 0 : i64, tpu.core_type = #tpu.core_type<tc>, window_params = [{transform_indices = @transform_0, window_bounds = array<i64: 456, 64>}, {pipeline_mode = #tpu.pipeline_mode<synchronous>, transform_indices = @transform_1, window_bounds = array<i64: 1, 64>}, {pipeline_mode = #tpu.pipeline_mode<synchronous>, transform_indices = @transform_2, window_bounds = array<i64: 1, 64>}, {transform_indices = @transform_3, window_bounds = array<i64: 456, 64>}]} {
    %c0 = arith.constant 0 : index
    %c0_0 = arith.constant 0 : index
    %0 = vector.load %arg1[%c0, %c0_0] : memref<456x64xf32, #tpu.memory_space<vmem>>, vector<456x64xf32>
    %c0_1 = arith.constant 0 : index
    %c0_2 = arith.constant 0 : index
    %1 = vector.load %arg2[%c0_1, %c0_2] : memref<1x64xf32, #tpu.memory_space<vmem>>, vector<1x64xf32>
    %2 = vector.broadcast %1 : vector<1x64xf32> to vector<456x64xf32>
    %3 = arith.mulf %0, %2 : vector<456x64xf32>
    %c0_3 = arith.constant 0 : index
    %c0_4 = arith.constant 0 : index
    %4 = vector.load %arg3[%c0_3, %c0_4] : memref<1x64xf32, #tpu.memory_space<vmem>>, vector<1x64xf32>
    %5 = vector.broadcast %4 : vector<1x64xf32> to vector<456x64xf32>
    %6 = arith.addf %3, %5 : vector<456x64xf32>
    %cst = arith.constant 0.000000e+00 : f32
    %7 = vector.broadcast %cst : f32 to vector<456x64xf32>
    %8 = arith.maximumf %6, %7 : vector<456x64xf32>
    %c0_5 = arith.constant 0 : index
    %c0_6 = arith.constant 0 : index
    %9 = vector.load %arg4[%c0_5, %c0_6] : memref<456x64xf32, #tpu.memory_space<vmem>>, vector<456x64xf32>
    tpu.vector_store %arg4[%c0_5, %c0_6], %8 {strides = array<i32>} : memref<456x64xf32, #tpu.memory_space<vmem>>, vector<456x64xf32>,
    return
  }
  func.func @transform_0(%arg0: i32) -> (i32, i32) {
    %c0_i32 = arith.constant 0 : i32
    %c0_i32_0 = arith.constant 0 : i32
    return %arg0, %c0_i32 : i32, i32
  }
  func.func @transform_1(%arg0: i32) -> (i32, i32) {
    %c0_i32 = arith.constant 0 : i32
    %c0_i32_0 = arith.constant 0 : i32
    %c0_i32_1 = arith.constant 0 : i32
    return %c0_i32, %c0_i32_0 : i32, i32
  }
  func.func @transform_2(%arg0: i32) -> (i32, i32) {
    %c0_i32 = arith.constant 0 : i32
    %c0_i32_0 = arith.constant 0 : i32
    %c0_i32_1 = arith.constant 0 : i32
    return %c0_i32, %c0_i32_0 : i32, i32
  }
  func.func @transform_3(%arg0: i32) -> (i32, i32) {
    %c0_i32 = arith.constant 0 : i32
    %c0_i32_0 = arith.constant 0 : i32
    return %arg0, %c0_i32 : i32, i32
  }
}

module attributes {stable_mosaic.version = 11 : i64} {
  func.func @_bn_relu_kernel(%arg0: i32, %arg1: memref<104x128xf32, #tpu.memory_space<vmem>>, %arg2: memref<1x128xf32, #tpu.memory_space<vmem>>, %arg3: memref<1x128xf32, #tpu.memory_space<vmem>>, %arg4: memref<104x128xf32, #tpu.memory_space<vmem>>) attributes {dimension_semantics = [#tpu.dimension_semantics<parallel>], iteration_bounds = array<i64: 1>, scalar_prefetch = 0 : i64, scratch_operands = 0 : i64, tpu.core_type = #tpu.core_type<tc>, window_params = [{transform_indices = @transform_0, window_bounds = array<i64: 104, 128>}, {pipeline_mode = #tpu.pipeline_mode<synchronous>, transform_indices = @transform_1, window_bounds = array<i64: 1, 128>}, {pipeline_mode = #tpu.pipeline_mode<synchronous>, transform_indices = @transform_2, window_bounds = array<i64: 1, 128>}, {transform_indices = @transform_3, window_bounds = array<i64: 104, 128>}]} {
    %c0 = arith.constant 0 : index
    %c0_0 = arith.constant 0 : index
    %0 = vector.load %arg1[%c0, %c0_0] : memref<104x128xf32, #tpu.memory_space<vmem>>, vector<104x128xf32>
    %c0_1 = arith.constant 0 : index
    %c0_2 = arith.constant 0 : index
    %1 = vector.load %arg2[%c0_1, %c0_2] : memref<1x128xf32, #tpu.memory_space<vmem>>, vector<1x128xf32>
    %2 = vector.broadcast %1 : vector<1x128xf32> to vector<104x128xf32>
    %3 = arith.mulf %0, %2 : vector<104x128xf32>
    %c0_3 = arith.constant 0 : index
    %c0_4 = arith.constant 0 : index
    %4 = vector.load %arg3[%c0_3, %c0_4] : memref<1x128xf32, #tpu.memory_space<vmem>>, vector<1x128xf32>
    %5 = vector.broadcast %4 : vector<1x128xf32> to vector<104x128xf32>
    %6 = arith.addf %3, %5 : vector<104x128xf32>
    %cst = arith.constant 0.000000e+00 : f32
    %7 = vector.broadcast %cst : f32 to vector<104x128xf32>
    %8 = arith.maximumf %6, %7 : vector<104x128xf32>
    %c0_5 = arith.constant 0 : index
    %c0_6 = arith.constant 0 : index
    %9 = vector.load %arg4[%c0_5, %c0_6] : memref<104x128xf32, #tpu.memory_space<vmem>>, vector<104x128xf32>
    tpu.vector_store %arg4[%c0_5, %c0_6], %8 {strides = array<i32>} : memref<104x128xf32, #tpu.memory_space<vmem>>, vector<104x128xf32>,
    return
  }
  func.func @transform_0(%arg0: i32) -> (i32, i32) {
    %c0_i32 = arith.constant 0 : i32
    %c0_i32_0 = arith.constant 0 : i32
    return %arg0, %c0_i32 : i32, i32
  }
  func.func @transform_1(%arg0: i32) -> (i32, i32) {
    %c0_i32 = arith.constant 0 : i32
    %c0_i32_0 = arith.constant 0 : i32
    %c0_i32_1 = arith.constant 0 : i32
    return %c0_i32, %c0_i32_0 : i32, i32
  }
  func.func @transform_2(%arg0: i32) -> (i32, i32) {
    %c0_i32 = arith.constant 0 : i32
    %c0_i32_0 = arith.constant 0 : i32
    %c0_i32_1 = arith.constant 0 : i32
    return %c0_i32, %c0_i32_0 : i32, i32
  }
  func.func @transform_3(%arg0: i32) -> (i32, i32) {
    %c0_i32 = arith.constant 0 : i32
    %c0_i32_0 = arith.constant 0 : i32
    return %arg0, %c0_i32 : i32, i32
  }
}

module attributes {stable_mosaic.version = 11 : i64} {
  func.func @_matmul_stats_kernel(%arg0: i32, %arg1: memref<104x576xbf16, #tpu.memory_space<vmem>>, %arg2: memref<576x128xbf16, #tpu.memory_space<vmem>>, %arg3: memref<104x128xf32, #tpu.memory_space<vmem>>, %arg4: memref<1x2x128xf32, #tpu.memory_space<vmem>>) attributes {dimension_semantics = [#tpu.dimension_semantics<parallel>], iteration_bounds = array<i64: 1>, scalar_prefetch = 0 : i64, scratch_operands = 0 : i64, tpu.core_type = #tpu.core_type<tc>, window_params = [{transform_indices = @transform_0, window_bounds = array<i64: 104, 576>}, {pipeline_mode = #tpu.pipeline_mode<synchronous>, transform_indices = @transform_1, window_bounds = array<i64: 576, 128>}, {transform_indices = @transform_2, window_bounds = array<i64: 104, 128>}, {transform_indices = @transform_3, window_bounds = array<i64: 1, 2, 128>}]} {
    %c0 = arith.constant 0 : index
    %c0_0 = arith.constant 0 : index
    %0 = vector.load %arg1[%c0, %c0_0] : memref<104x576xbf16, #tpu.memory_space<vmem>>, vector<104x576xbf16>
    %c0_1 = arith.constant 0 : index
    %c0_2 = arith.constant 0 : index
    %1 = vector.load %arg2[%c0_1, %c0_2] : memref<576x128xbf16, #tpu.memory_space<vmem>>, vector<576x128xbf16>
    %cst = arith.constant dense<0.000000e+00> : vector<104x128xf32>
    %2 = tpu.matmul %0, %1, %cst {dimension_numbers = #tpu.dot_dimension_numbers<[1], [0], [0], [1], [0, 0, 1, 1], [], []>} : vector<104x576xbf16>, vector<576x128xbf16>, vector<104x128xf32> -> vector<104x128xf32>
    %c0_3 = arith.constant 0 : index
    %c0_4 = arith.constant 0 : index
    %3 = vector.load %arg3[%c0_3, %c0_4] : memref<104x128xf32, #tpu.memory_space<vmem>>, vector<104x128xf32>
    tpu.vector_store %arg3[%c0_3, %c0_4], %2 {strides = array<i32>} : memref<104x128xf32, #tpu.memory_space<vmem>>, vector<104x128xf32>,
    %cst_5 = arith.constant dense<0.000000e+00> : vector<128xf32>
    %4 = vector.multi_reduction <add>, %2, %cst_5 [0] : vector<104x128xf32> to vector<128xf32>
    %5 = vector.shape_cast %4 : vector<128xf32> to vector<1x128xf32>
    %6 = arith.mulf %2, %2 : vector<104x128xf32>
    %cst_6 = arith.constant dense<0.000000e+00> : vector<128xf32>
    %7 = vector.multi_reduction <add>, %6, %cst_6 [0] : vector<104x128xf32> to vector<128xf32>
    %8 = vector.shape_cast %7 : vector<128xf32> to vector<1x128xf32>
    %9 = tpu.concatenate %5, %8 in 0 : vector<1x128xf32>, vector<1x128xf32> -> vector<2x128xf32>
    %10 = vector.shape_cast %9 : vector<2x128xf32> to vector<1x2x128xf32>
    %c0_7 = arith.constant 0 : index
    %c0_8 = arith.constant 0 : index
    %c0_9 = arith.constant 0 : index
    %11 = vector.load %arg4[%c0_7, %c0_8, %c0_9] : memref<1x2x128xf32, #tpu.memory_space<vmem>>, vector<1x2x128xf32>
    tpu.vector_store %arg4[%c0_7, %c0_8, %c0_9], %10 {strides = array<i32>} : memref<1x2x128xf32, #tpu.memory_space<vmem>>, vector<1x2x128xf32>,
    return
  }
  func.func @transform_0(%arg0: i32) -> (i32, i32) {
    %c0_i32 = arith.constant 0 : i32
    %c0_i32_0 = arith.constant 0 : i32
    return %arg0, %c0_i32 : i32, i32
  }
  func.func @transform_1(%arg0: i32) -> (i32, i32) {
    %c0_i32 = arith.constant 0 : i32
    %c0_i32_0 = arith.constant 0 : i32
    %c0_i32_1 = arith.constant 0 : i32
    return %c0_i32, %c0_i32_0 : i32, i32
  }
  func.func @transform_2(%arg0: i32) -> (i32, i32) {
    %c0_i32 = arith.constant 0 : i32
    %c0_i32_0 = arith.constant 0 : i32
    return %arg0, %c0_i32 : i32, i32
  }
  func.func @transform_3(%arg0: i32) -> (i32, i32, i32) {
    %c0_i32 = arith.constant 0 : i32
    %c0_i32_0 = arith.constant 0 : i32
    %c0_i32_1 = arith.constant 0 : i32
    return %arg0, %c0_i32, %c0_i32_0 : i32, i32, i32
  }
}

module attributes {stable_mosaic.version = 11 : i64} {
  func.func @_bn_relu_kernel(%arg0: i32, %arg1: memref<24x256xf32, #tpu.memory_space<vmem>>, %arg2: memref<1x256xf32, #tpu.memory_space<vmem>>, %arg3: memref<1x256xf32, #tpu.memory_space<vmem>>, %arg4: memref<24x256xf32, #tpu.memory_space<vmem>>) attributes {dimension_semantics = [#tpu.dimension_semantics<parallel>], iteration_bounds = array<i64: 1>, scalar_prefetch = 0 : i64, scratch_operands = 0 : i64, tpu.core_type = #tpu.core_type<tc>, window_params = [{transform_indices = @transform_0, window_bounds = array<i64: 24, 256>}, {pipeline_mode = #tpu.pipeline_mode<synchronous>, transform_indices = @transform_1, window_bounds = array<i64: 1, 256>}, {pipeline_mode = #tpu.pipeline_mode<synchronous>, transform_indices = @transform_2, window_bounds = array<i64: 1, 256>}, {transform_indices = @transform_3, window_bounds = array<i64: 24, 256>}]} {
    %c0 = arith.constant 0 : index
    %c0_0 = arith.constant 0 : index
    %0 = vector.load %arg1[%c0, %c0_0] : memref<24x256xf32, #tpu.memory_space<vmem>>, vector<24x256xf32>
    %c0_1 = arith.constant 0 : index
    %c0_2 = arith.constant 0 : index
    %1 = vector.load %arg2[%c0_1, %c0_2] : memref<1x256xf32, #tpu.memory_space<vmem>>, vector<1x256xf32>
    %2 = vector.broadcast %1 : vector<1x256xf32> to vector<24x256xf32>
    %3 = arith.mulf %0, %2 : vector<24x256xf32>
    %c0_3 = arith.constant 0 : index
    %c0_4 = arith.constant 0 : index
    %4 = vector.load %arg3[%c0_3, %c0_4] : memref<1x256xf32, #tpu.memory_space<vmem>>, vector<1x256xf32>
    %5 = vector.broadcast %4 : vector<1x256xf32> to vector<24x256xf32>
    %6 = arith.addf %3, %5 : vector<24x256xf32>
    %cst = arith.constant 0.000000e+00 : f32
    %7 = vector.broadcast %cst : f32 to vector<24x256xf32>
    %8 = arith.maximumf %6, %7 : vector<24x256xf32>
    %c0_5 = arith.constant 0 : index
    %c0_6 = arith.constant 0 : index
    %9 = vector.load %arg4[%c0_5, %c0_6] : memref<24x256xf32, #tpu.memory_space<vmem>>, vector<24x256xf32>
    tpu.vector_store %arg4[%c0_5, %c0_6], %8 {strides = array<i32>} : memref<24x256xf32, #tpu.memory_space<vmem>>, vector<24x256xf32>,
    return
  }
  func.func @transform_0(%arg0: i32) -> (i32, i32) {
    %c0_i32 = arith.constant 0 : i32
    %c0_i32_0 = arith.constant 0 : i32
    return %arg0, %c0_i32 : i32, i32
  }
  func.func @transform_1(%arg0: i32) -> (i32, i32) {
    %c0_i32 = arith.constant 0 : i32
    %c0_i32_0 = arith.constant 0 : i32
    %c0_i32_1 = arith.constant 0 : i32
    return %c0_i32, %c0_i32_0 : i32, i32
  }
  func.func @transform_2(%arg0: i32) -> (i32, i32) {
    %c0_i32 = arith.constant 0 : i32
    %c0_i32_0 = arith.constant 0 : i32
    %c0_i32_1 = arith.constant 0 : i32
    return %c0_i32, %c0_i32_0 : i32, i32
  }
  func.func @transform_3(%arg0: i32) -> (i32, i32) {
    %c0_i32 = arith.constant 0 : i32
    %c0_i32_0 = arith.constant 0 : i32
    return %arg0, %c0_i32 : i32, i32
  }
}

module attributes {stable_mosaic.version = 11 : i64} {
  func.func @_matmul_stats_kernel(%arg0: i32, %arg1: memref<24x1152xbf16, #tpu.memory_space<vmem>>, %arg2: memref<1152x256xbf16, #tpu.memory_space<vmem>>, %arg3: memref<24x256xf32, #tpu.memory_space<vmem>>, %arg4: memref<1x2x256xf32, #tpu.memory_space<vmem>>) attributes {dimension_semantics = [#tpu.dimension_semantics<parallel>], iteration_bounds = array<i64: 1>, scalar_prefetch = 0 : i64, scratch_operands = 0 : i64, tpu.core_type = #tpu.core_type<tc>, window_params = [{transform_indices = @transform_0, window_bounds = array<i64: 24, 1152>}, {pipeline_mode = #tpu.pipeline_mode<synchronous>, transform_indices = @transform_1, window_bounds = array<i64: 1152, 256>}, {transform_indices = @transform_2, window_bounds = array<i64: 24, 256>}, {transform_indices = @transform_3, window_bounds = array<i64: 1, 2, 256>}]} {
    %c0 = arith.constant 0 : index
    %c0_0 = arith.constant 0 : index
    %0 = vector.load %arg1[%c0, %c0_0] : memref<24x1152xbf16, #tpu.memory_space<vmem>>, vector<24x1152xbf16>
    %c0_1 = arith.constant 0 : index
    %c0_2 = arith.constant 0 : index
    %1 = vector.load %arg2[%c0_1, %c0_2] : memref<1152x256xbf16, #tpu.memory_space<vmem>>, vector<1152x256xbf16>
    %cst = arith.constant dense<0.000000e+00> : vector<24x256xf32>
    %2 = tpu.matmul %0, %1, %cst {dimension_numbers = #tpu.dot_dimension_numbers<[1], [0], [0], [1], [0, 0, 1, 1], [], []>} : vector<24x1152xbf16>, vector<1152x256xbf16>, vector<24x256xf32> -> vector<24x256xf32>
    %c0_3 = arith.constant 0 : index
    %c0_4 = arith.constant 0 : index
    %3 = vector.load %arg3[%c0_3, %c0_4] : memref<24x256xf32, #tpu.memory_space<vmem>>, vector<24x256xf32>
    tpu.vector_store %arg3[%c0_3, %c0_4], %2 {strides = array<i32>} : memref<24x256xf32, #tpu.memory_space<vmem>>, vector<24x256xf32>,
    %cst_5 = arith.constant dense<0.000000e+00> : vector<256xf32>
    %4 = vector.multi_reduction <add>, %2, %cst_5 [0] : vector<24x256xf32> to vector<256xf32>
    %5 = vector.shape_cast %4 : vector<256xf32> to vector<1x256xf32>
    %6 = arith.mulf %2, %2 : vector<24x256xf32>
    %cst_6 = arith.constant dense<0.000000e+00> : vector<256xf32>
    %7 = vector.multi_reduction <add>, %6, %cst_6 [0] : vector<24x256xf32> to vector<256xf32>
    %8 = vector.shape_cast %7 : vector<256xf32> to vector<1x256xf32>
    %9 = tpu.concatenate %5, %8 in 0 : vector<1x256xf32>, vector<1x256xf32> -> vector<2x256xf32>
    %10 = vector.shape_cast %9 : vector<2x256xf32> to vector<1x2x256xf32>
    %c0_7 = arith.constant 0 : index
    %c0_8 = arith.constant 0 : index
    %c0_9 = arith.constant 0 : index
    %11 = vector.load %arg4[%c0_7, %c0_8, %c0_9] : memref<1x2x256xf32, #tpu.memory_space<vmem>>, vector<1x2x256xf32>
    tpu.vector_store %arg4[%c0_7, %c0_8, %c0_9], %10 {strides = array<i32>} : memref<1x2x256xf32, #tpu.memory_space<vmem>>, vector<1x2x256xf32>,
    return
  }
  func.func @transform_0(%arg0: i32) -> (i32, i32) {
    %c0_i32 = arith.constant 0 : i32
    %c0_i32_0 = arith.constant 0 : i32
    return %arg0, %c0_i32 : i32, i32
  }
  func.func @transform_1(%arg0: i32) -> (i32, i32) {
    %c0_i32 = arith.constant 0 : i32
    %c0_i32_0 = arith.constant 0 : i32
    %c0_i32_1 = arith.constant 0 : i32
    return %c0_i32, %c0_i32_0 : i32, i32
  }
  func.func @transform_2(%arg0: i32) -> (i32, i32) {
    %c0_i32 = arith.constant 0 : i32
    %c0_i32_0 = arith.constant 0 : i32
    return %arg0, %c0_i32 : i32, i32
  }
  func.func @transform_3(%arg0: i32) -> (i32, i32, i32) {
    %c0_i32 = arith.constant 0 : i32
    %c0_i32_0 = arith.constant 0 : i32
    %c0_i32_1 = arith.constant 0 : i32
    return %arg0, %c0_i32, %c0_i32_0 : i32, i32, i32
  }
}

</mosaic_0001>

<bundles_post_ra>
// kernel: context_net_forward.6
= control target key start
LH: loop header
LB: loop body
LE: loop exit
PB: predicated region body
PF: predicated region fallthrough
CT: control target
= control target key end

     0   :  { %vm317_vm0 = vcmask 1044480   ;;  %vm318_vm1 = vcmask 1045504   ;;  %v1028_v2 = vmov 65535   ;;  %vm229_vm2 = vcmask 220160   ;;  %s1777_s1 = inlined_call_operand.vmem [shape: bf16[27,64], index: 1, kind: input, shape index: {}]   ;;  %s1778_s0 = inlined_call_operand.vmem [shape: bf16[456,27], index: 0, kind: input, shape index: {}]   ;;  %s1779_s2 = inlined_call_operand.vmem [shape: f32[456,64], index: 2, kind: output, shape index: {0}]   ;;  %s1780_s3 = inlined_call_operand.vmem [shape: f32[1,2,64], index: 3, kind: output, shape index: {1}]  }
   0x1   :  { %v960_v0 = vld [vmem:[%s1777_s1 + $0x8] sm:$0xf]  ;;  %v1020_v1 = vld [vmem:[%s1777_s1 + $0x8] sm:$0x30]  ;;  %v319_v3 = vsel %vm317_vm0, 4294967295, %v1028_v2  ;;  %v1019_v7 = vld [vmem:[%s1777_s1] sm:$0xff] }
   0x2   :  { %v961_v4 = vor.u32 %v1020_v1, %v960_v0  ;;  %v320_v5 = vsel %vm318_vm1, %v319_v3, 0  ;;  %v991_v8 = vld [vmem:[%s1778_s0] sm:$0xff]  ;;  %v998_v9 = vld [vmem:[%s1778_s0 + $0x38] sm:$0xff]  ;;  %v992_v11 = vld [vmem:[%s1778_s0 + $0x8] sm:$0xff]  ;;  %vm477_vm3 = vcmask 523264   ;;  %vm830_vm4 = vcmask 1040384  }
   0x3   :  { %v1006_v10 = vld [vmem:[%s1778_s0 + $0x78] sm:$0xff]  ;;  %v999_v12 = vld [vmem:[%s1778_s0 + $0x40] sm:$0xff]  ;;  %v993_v14 = vld [vmem:[%s1778_s0 + $0x10] sm:$0xff]  ;;  %vm832_vm5 = vcmask 517120  }
   0x4   :  { %v322_v6 = vand.u32 %v961_v4, %v320_v5  ;;  %v1007_v13 = vld [vmem:[%s1778_s0 + $0x80] sm:$0xff]  ;;  %v1000_v15 = vld [vmem:[%s1778_s0 + $0x48] sm:$0xff]  ;;  %v994_v17 = vld [vmem:[%s1778_s0 + $0x18] sm:$0xff] }
   0x5   :  { %v1008_v16 = vld [vmem:[%s1778_s0 + $0x88] sm:$0xff]  ;;  %v1001_v18 = vld [vmem:[%s1778_s0 + $0x50] sm:$0xff]  ;;  %v995_v20 = vld [vmem:[%s1778_s0 + $0x20] sm:$0xff] }
   0x6   :  { %330 = vmatpush.bf16.msra.mxu0 %v322_v6  ;;  %1021 = vmatpush.bf16.msra.mxu1 %v322_v6  ;;  %v1009_v19 = vld [vmem:[%s1778_s0 + $0x90] sm:$0xff]  ;;  %v1002_v21 = vld [vmem:[%s1778_s0 + $0x58] sm:$0xff]  ;;  %v996_v24 = vld [vmem:[%s1778_s0 + $0x28] sm:$0xff] }
   0x7   :  { %1022 = vmatpush.bf16.msra.mxu2 %v322_v6  ;;  %1023 = vmatpush.bf16.msra.mxu3 %v322_v6  ;;  %v1014_v22 = vld [vmem:[%s1778_s0 + $0xb8] sm:$0xff]  ;;  %v1003_v25 = vld [vmem:[%s1778_s0 + $0x60] sm:$0xff]  ;;  %v997_v28 = vld [vmem:[%s1778_s0 + $0x30] sm:$0xff] }
   0x8   :  { %v1010_v23 = vld [vmem:[%s1778_s0 + $0x98] sm:$0xff]  ;;  %v1015_v26 = vld [vmem:[%s1778_s0 + $0xc0] sm:$0xff]  ;;  %v1004_v29 = vld [vmem:[%s1778_s0 + $0x68] sm:$0xff] }
   0x9   :  { %v1011_v27 = vld [vmem:[%s1778_s0 + $0xa0] sm:$0xff]  ;;  %v1016_v30 = vld [vmem:[%s1778_s0 + $0xc8] sm:$0xff]  ;;  %v1005_v32 = vld [vmem:[%s1778_s0 + $0x70] sm:$0xff] }
   0xa   :  { %331 = vmatpush.bf16.msra.mxu0 %v1019_v7  ;;  %1024 = vmatpush.bf16.msra.mxu1 %v1019_v7  ;;  %v1012_v31 = vld [vmem:[%s1778_s0 + $0xa8] sm:$0xff]  ;;  %v1017_v33 = vld [vmem:[%s1778_s0 + $0xd0] sm:$0xff]  ;;  %v1018_v37 = vld [vmem:[%s1778_s0 + $0xd8] sm:$0xff] }
   0xb   :  { %1025 = vmatpush.bf16.msra.mxu2 %v1019_v7  ;;  %1026 = vmatpush.bf16.msra.mxu3 %v1019_v7  ;;  %v1013_v34 = vld [vmem:[%s1778_s0 + $0xb0] sm:$0xff]  ;;  %v70_v49 = vld [vmem:[%s1778_s0 + $0xe0] sm:$0xf] }
   0xc   :  { %v188_v50 = vunpack.c.l.b16 %v70_v49 }
   0xd   :  { %962 = vmatmul.msk.bf16.vlgmr.msra.gmra.mxu0 %vm229_vm2, %v991_v8  ;;  %969 = vmatmul.msk.bf16.vlgmr.msra.gmra.mxu1 %vm229_vm2, %v998_v9 }
   0xe   :  { %977 = vmatmul.msk.bf16.vlgmr.msra.gmra.mxu2 %vm229_vm2, %v1006_v10  ;;  %985 = vmatmul.msk.bf16.vlgmr.msra.gmra.mxu3 %vm229_vm2, %v1014_v22  ;;  %v217_v57 = vpack.c.b16 %v188_v50, %v188_v50 }
  0x1d   :  { %963 = vmatmul.msk.bf16.gmra.mxu0 %vm229_vm2, %v992_v11  ;;  %970 = vmatmul.msk.bf16.gmra.mxu1 %vm229_vm2, %v999_v12 }
  0x1e   :  { %978 = vmatmul.msk.bf16.gmra.mxu2 %vm229_vm2, %v1007_v13  ;;  %986 = vmatmul.msk.bf16.gmra.mxu3 %vm229_vm2, %v1015_v26 }
  0x2d   :  { %964 = vmatmul.msk.bf16.gmra.mxu0 %vm229_vm2, %v993_v14  ;;  %971 = vmatmul.msk.bf16.gmra.mxu1 %vm229_vm2, %v1000_v15 }
  0x2e   :  { %979 = vmatmul.msk.bf16.gmra.mxu2 %vm229_vm2, %v1008_v16  ;;  %987 = vmatmul.msk.bf16.gmra.mxu3 %vm229_vm2, %v1016_v30 }
  0x3d   :  { %965 = vmatmul.msk.bf16.gmra.mxu0 %vm229_vm2, %v994_v17  ;;  %972 = vmatmul.msk.bf16.gmra.mxu1 %vm229_vm2, %v1001_v18 }
  0x3e   :  { %980 = vmatmul.msk.bf16.gmra.mxu2 %vm229_vm2, %v1009_v19  ;;  %988 = vmatmul.msk.bf16.gmra.mxu3 %vm229_vm2, %v1017_v33 }
  0x4d   :  { %966 = vmatmul.msk.bf16.gmra.mxu0 %vm229_vm2, %v995_v20  ;;  %973 = vmatmul.msk.bf16.gmra.mxu1 %vm229_vm2, %v1002_v21 }
  0x4e   :  { %981 = vmatmul.msk.bf16.gmra.mxu2 %vm229_vm2, %v1010_v23  ;;  %989 = vmatmul.msk.bf16.gmra.mxu3 %vm229_vm2, %v1018_v37 }
  0x5d   :  { %967 = vmatmul.msk.bf16.gmra.mxu0 %vm229_vm2, %v996_v24  ;;  %974 = vmatmul.msk.bf16.gmra.mxu1 %vm229_vm2, %v1003_v25 }
  0x5e   :  { %982 = vmatmul.msk.bf16.gmra.mxu2 %vm229_vm2, %v1011_v27  ;;  %990 = vmatmul.msk.bf16.gmra.mxu3 %vm229_vm2, %v217_v57 }
  0x6d   :  { %968 = vmatmul.msk.bf16.gmra.mxu0 %vm229_vm2, %v997_v28  ;;  %975 = vmatmul.msk.bf16.gmra.mxu1 %vm229_vm2, %v1004_v29 }
  0x6e   :  { %983 = vmatmul.msk.bf16.gmra.mxu2 %vm229_vm2, %v1012_v31 }
  0x7d   :  { %976 = vmatmul.msk.bf16.gmra.mxu1 %vm229_vm2, %v1005_v32 }
  0x7e   :  { %984 = vmatmul.msk.bf16.gmra.mxu2 %vm229_vm2, %v1013_v34 }
  0x8a   :  { %v333_v35 = vpop.f32.mrf.mxu0  ;;  %v1166_v36 = vpop.f32.mrf.mxu1 }
  0x8b   :  { %478 = vst.msk [vmem:[%s1779_s2] sm:$0xff] %vm477_vm3, %v333_v35  ;;  %v654_v38 = vmul.f32 %v333_v35, %v333_v35  ;;  %v535_v41 = vsel %vm477_vm3, %v333_v35, 0.0 }
  0x8c   :  { %492 = vst.msk [vmem:[%s1779_s2 + $0x70] sm:$0xff] %vm477_vm3, %v1166_v36 }
  0x8d   :  { %v711_v46 = vsel %vm477_vm3, %v654_v38, 0.0 }
  0x91   :  { %v1189_v44 = vpop.f32.mrf.mxu2  ;;  %v1339_v14 = vpop.f32.mrf.mxu3 }
  0x92   :  { %v335_v39 = vpop.f32.mrf.mxu0  ;;  %v1181_v40 = vpop.f32.mrf.mxu1  ;;  %508 = vst.msk [vmem:[%s1779_s2 + $0xf0] sm:$0xff] %vm477_vm3, %v1189_v44 }
  0x93   :  { %479 = vst.msk [vmem:[%s1779_s2 + $0x8] sm:$0xff] %vm477_vm3, %v335_v39  ;;  %v536_v42 = vsel %vm477_vm3, %v335_v39, 0.0  ;;  %v655_v43 = vmul.f32 %v335_v39, %v335_v39 }
  0x94   :  { %v537_v45 = vadd.f32 %v536_v42, %v535_v41  ;;  %493 = vst.msk [vmem:[%s1779_s2 + $0x78] sm:$0xff] %vm477_vm3, %v1181_v40 }
  0x95   :  { %v712_v47 = vsel %vm477_vm3, %v655_v43, 0.0  ;;  %524 = vst.msk [vmem:[%s1779_s2 + $0x170] sm:$0xff] %vm477_vm3, %v1339_v14 }
  0x96   :  { %v713_v48 = vadd.f32 %v712_v47, %v711_v46 }
  0x99   :  { %v1213_v55 = vpop.f32.mrf.mxu2  ;;  %v1364_v18 = vpop.f32.mrf.mxu3 }
  0x9a   :  { %v338_v51 = vpop.f32.mrf.mxu0  ;;  %v1206_v52 = vpop.f32.mrf.mxu1  ;;  %509 = vst.msk [vmem:[%s1779_s2 + $0xf8] sm:$0xff] %vm477_vm3, %v1213_v55 }
  0x9b   :  { %480 = vst.msk [vmem:[%s1779_s2 + $0x10] sm:$0xff] %vm477_vm3, %v338_v51  ;;  %v538_v53 = vsel %vm477_vm3, %v338_v51, 0.0  ;;  %v656_v54 = vmul.f32 %v338_v51, %v338_v51 }
  0x9c   :  { %v1215_v56 = vadd.f32 %v538_v53, %v537_v45  ;;  %494 = vst.msk [vmem:[%s1779_s2 + $0x80] sm:$0xff] %vm477_vm3, %v1206_v52 }
  0x9d   :  { %v714_v58 = vsel %vm477_vm3, %v656_v54, 0.0  ;;  %525 = vst.msk [vmem:[%s1779_s2 + $0x178] sm:$0xff] %vm477_vm3, %v1364_v18 }
  0x9e   :  { %v1228_v59 = vadd.f32 %v714_v58, %v713_v48 }
  0xa1   :  { %v1237_v62 = vpop.f32.mrf.mxu2  ;;  %v1395_v32 = vpop.f32.mrf.mxu3 }
  0xa2   :  { %v340_v60 = vpop.f32.mrf.mxu0  ;;  %v1231_v61 = vpop.f32.mrf.mxu1  ;;  %510 = vst.msk [vmem:[%s1779_s2 + $0x100] sm:$0xff] %vm477_vm3, %v1237_v62 }
  0xa3   :  { %481 = vst.msk [vmem:[%s1779_s2 + $0x18] sm:$0xff] %vm477_vm3, %v340_v60  ;;  %v657_v21 = vmul.f32 %v340_v60, %v340_v60  ;;  %v540_v23 = vsel %vm477_vm3, %v340_v60, 0.0 }
  0xa4   :  { %495 = vst.msk [vmem:[%s1779_s2 + $0x88] sm:$0xff] %vm477_vm3, %v1231_v61  ;;  %v541_v28 = vadd.f32 %v540_v23, %v1215_v56 }
  0xa5   :  { %v716_v25 = vsel %vm477_vm3, %v657_v21, 0.0  ;;  %526 = vst.msk [vmem:[%s1779_s2 + $0x180] sm:$0xff] %vm477_vm3, %v1395_v32 }
  0xa6   :  { %v717_v33 = vadd.f32 %v716_v25, %v1228_v59 }
  0xa9   :  { %v1255_v1 = vpop.f32.mrf.mxu2 }
  0xaa   :  { %v343_v63 = vpop.f32.mrf.mxu0  ;;  %v1249_v0 = vpop.f32.mrf.mxu1  ;;  %511 = vst.msk [vmem:[%s1779_s2 + $0x108] sm:$0xff] %vm477_vm3, %v1255_v1 }
  0xab   :  { %482 = vst.msk [vmem:[%s1779_s2 + $0x20] sm:$0xff] %vm477_vm3, %v343_v63  ;;  %v658_v24 = vmul.f32 %v343_v63, %v343_v63  ;;  %v542_v26 = vsel %vm477_vm3, %v343_v63, 0.0  ;;  %v1429_v63 = vpop.f32.mrf.mxu3 }
  0xac   :  { %496 = vst.msk [vmem:[%s1779_s2 + $0x90] sm:$0xff] %vm477_vm3, %v1249_v0  ;;  %v543_v34 = vadd.f32 %v542_v26, %v541_v28 }
  0xad   :  { %v718_v29 = vsel %vm477_vm3, %v658_v24, 0.0  ;;  %527 = vst.msk [vmem:[%s1779_s2 + $0x188] sm:$0xff] %vm477_vm3, %v1429_v63 }
  0xae   :  { %v719_v43 = vadd.f32 %v718_v29, %v717_v33 }
  0xb1   :  { %v1273_v4 = vpop.f32.mrf.mxu2 }
  0xb2   :  { %v345_v2 = vpop.f32.mrf.mxu0  ;;  %v1267_v3 = vpop.f32.mrf.mxu1  ;;  %512 = vst.msk [vmem:[%s1779_s2 + $0x110] sm:$0xff] %vm477_vm3, %v1273_v4 }
  0xb3   :  { %483 = vst.msk [vmem:[%s1779_s2 + $0x28] sm:$0xff] %vm477_vm3, %v345_v2  ;;  %v659_v27 = vmul.f32 %v345_v2, %v345_v2  ;;  %v544_v30 = vsel %vm477_vm3, %v345_v2, 0.0 }
  0xb4   :  { %497 = vst.msk [vmem:[%s1779_s2 + $0x98] sm:$0xff] %vm477_vm3, %v1267_v3  ;;  %v545_v45 = vadd.f32 %v544_v30, %v543_v34 }
  0xb5   :  { %v720_v38 = vsel %vm477_vm3, %v659_v27, 0.0 }
  0xb6   :  { %v721_v49 = vadd.f32 %v720_v38, %v719_v43 }
  0xb9   :  { %v1291_v7 = vpop.f32.mrf.mxu2 }
  0xba   :  { %v348_v5 = vpop.f32.mrf.mxu0  ;;  %v1285_v6 = vpop.f32.mrf.mxu1  ;;  %513 = vst.msk [vmem:[%s1779_s2 + $0x118] sm:$0xff] %vm477_vm3, %v1291_v7 }
  0xbb   :  { %484 = vst.msk [vmem:[%s1779_s2 + $0x30] sm:$0xff] %vm477_vm3, %v348_v5  ;;  %v660_v31 = vmul.f32 %v348_v5, %v348_v5  ;;  %v546_v39 = vsel %vm477_vm3, %v348_v5, 0.0 }
  0xbc   :  { %498 = vst.msk [vmem:[%s1779_s2 + $0xa0] sm:$0xff] %vm477_vm3, %v1285_v6  ;;  %v547_v50 = vadd.f32 %v546_v39, %v545_v45 }
  0xbd   :  { %v722_v46 = vsel %vm477_vm3, %v660_v31, 0.0 }
  0xbe   :  { %v723_v56 = vadd.f32 %v722_v46, %v721_v49 }
  0xc1   :  { %v1309_v10 = vpop.f32.mrf.mxu2 }
  0xc2   :  { %v350_v8 = vpop.f32.mrf.mxu0  ;;  %v1303_v9 = vpop.f32.mrf.mxu1  ;;  %514 = vst.msk [vmem:[%s1779_s2 + $0x120] sm:$0xff] %vm477_vm3, %v1309_v10 }
  0xc3   :  { %485 = vst.msk [vmem:[%s1779_s2 + $0x38] sm:$0xff] %vm477_vm3, %v350_v8  ;;  %v661_v41 = vmul.f32 %v350_v8, %v350_v8  ;;  %v548_v47 = vsel %vm477_vm3, %v350_v8, 0.0 }
  0xc4   :  { %499 = vst.msk [vmem:[%s1779_s2 + $0xa8] sm:$0xff] %vm477_vm3, %v1303_v9  ;;  %v549_v57 = vadd.f32 %v548_v47, %v547_v50  ;;  %v668_v47 = vmul.f32 %v1166_v36, %v1166_v36 }
  0xc5   :  { %v724_v51 = vsel %vm477_vm3, %v661_v41, 0.0  ;;  %v1461_v41 = vpop.f32.mrf.mxu3 }
  0xc6   :  { %v725_v2 = vadd.f32 %v724_v51, %v723_v56  ;;  %528 = vst.msk [vmem:[%s1779_s2 + $0x190] sm:$0xff] %vm477_vm3, %v1461_v41  ;;  %v669_v56 = vmul.f32 %v1181_v40, %v1181_v40 }
  0xc9   :  { %v1327_v13 = vpop.f32.mrf.mxu2 }
  0xca   :  { %v353_v11 = vpop.f32.mrf.mxu0  ;;  %v1321_v12 = vpop.f32.mrf.mxu1  ;;  %515 = vst.msk [vmem:[%s1779_s2 + $0x128] sm:$0xff] %vm477_vm3, %v1327_v13 }
  0xcb   :  { %486 = vst.msk [vmem:[%s1779_s2 + $0x40] sm:$0xff] %vm477_vm3, %v353_v11  ;;  %v662_v48 = vmul.f32 %v353_v11, %v353_v11  ;;  %v550_v53 = vsel %vm477_vm3, %v353_v11, 0.0 }
  0xcc   :  { %500 = vst.msk [vmem:[%s1779_s2 + $0xb0] sm:$0xff] %vm477_vm3, %v1321_v12  ;;  %v551_v5 = vadd.f32 %v550_v53, %v549_v57 }
  0xcd   :  { %v726_v58 = vsel %vm477_vm3, %v662_v48, 0.0 }
  0xce   :  { %v727_v25 = vadd.f32 %v726_v58, %v725_v2  ;;  %v564_v2 = vsel %vm477_vm3, %v1181_v40, 0.0 }
  0xd1   :  { %v1352_v17 = vpop.f32.mrf.mxu2 }
  0xd2   :  { %v355_v15 = vpop.f32.mrf.mxu0  ;;  %v1341_v16 = vpop.f32.mrf.mxu1  ;;  %516 = vst.msk [vmem:[%s1779_s2 + $0x130] sm:$0xff] %vm477_vm3, %v1352_v17 }
  0xd3   :  { %487 = vst.msk [vmem:[%s1779_s2 + $0x48] sm:$0xff] %vm477_vm3, %v355_v15  ;;  %v663_v54 = vmul.f32 %v355_v15, %v355_v15  ;;  %v552_v59 = vsel %vm477_vm3, %v355_v15, 0.0 }
  0xd4   :  { %501 = vst.msk [vmem:[%s1779_s2 + $0xb8] sm:$0xff] %vm477_vm3, %v1341_v16  ;;  %v553_v26 = vadd.f32 %v552_v59, %v551_v5 }
  0xd5   :  { %v728_v11 = vsel %vm477_vm3, %v663_v54, 0.0  ;;  %v562_v54 = vsel %vm477_vm3, %v1166_v36, 0.0  ;;  %v670_v36 = vmul.f32 %v1206_v52, %v1206_v52 }
  0xd6   :  { %v729_v29 = vadd.f32 %v728_v11, %v727_v25  ;;  %v740_v11 = vsel %vm477_vm3, %v669_v56, 0.0  ;;  %v1504_v25 = vpop.f32.mrf.mxu3 }
  0xd7   :  { %529 = vst.msk [vmem:[%s1779_s2 + $0x198] sm:$0xff] %vm477_vm3, %v1504_v25  ;;  %v742_v40 = vsel %vm477_vm3, %v670_v36, 0.0  ;;  %v578_v36 = vsel %vm477_vm3, %v1321_v12, 0.0 }
  0xd9   :  { %v1377_v22 = vpop.f32.mrf.mxu2 }
  0xda   :  { %v358_v19 = vpop.f32.mrf.mxu0  ;;  %v1366_v20 = vpop.f32.mrf.mxu1  ;;  %517 = vst.msk [vmem:[%s1779_s2 + $0x138] sm:$0xff] %vm477_vm3, %v1377_v22 }
  0xdb   :  { %488 = vst.msk [vmem:[%s1779_s2 + $0x50] sm:$0xff] %vm477_vm3, %v358_v19  ;;  %v664_v60 = vmul.f32 %v358_v19, %v358_v19  ;;  %v554_v23 = vsel %vm477_vm3, %v358_v19, 0.0 }
  0xdc   :  { %502 = vst.msk [vmem:[%s1779_s2 + $0xc0] sm:$0xff] %vm477_vm3, %v1366_v20  ;;  %v555_v30 = vadd.f32 %v554_v23, %v553_v26  ;;  %v566_v23 = vsel %vm477_vm3, %v1206_v52, 0.0  ;;  %v568_v52 = vsel %vm477_vm3, %v1231_v61, 0.0 }
  0xdd   :  { %v730_v27 = vsel %vm477_vm3, %v664_v60, 0.0  ;;  %v738_v60 = vsel %vm477_vm3, %v668_v47, 0.0 }
  0xde   :  { %v731_v34 = vadd.f32 %v730_v27, %v729_v29 }
  0xe1   :  { %v1411_v42 = vpop.f32.mrf.mxu2 }
  0xe2   :  { %v360_v35 = vpop.f32.mrf.mxu0  ;;  %v1398_v37 = vpop.f32.mrf.mxu1  ;;  %518 = vst.msk [vmem:[%s1779_s2 + $0x140] sm:$0xff] %vm477_vm3, %v1411_v42 }
  0xe3   :  { %489 = vst.msk [vmem:[%s1779_s2 + $0x58] sm:$0xff] %vm477_vm3, %v360_v35  ;;  %v665_v24 = vmul.f32 %v360_v35, %v360_v35  ;;  %v556_v19 = vsel %vm477_vm3, %v360_v35, 0.0 }
  0xe4   :  { %503 = vst.msk [vmem:[%s1779_s2 + $0xc8] sm:$0xff] %vm477_vm3, %v1398_v37  ;;  %v557_v38 = vadd.f32 %v556_v19, %v555_v30 }
  0xe5   :  { %v732_v31 = vsel %vm477_vm3, %v665_v24, 0.0  ;;  %v671_v24 = vmul.f32 %v1231_v61, %v1231_v61 }
  0xe6   :  { %v733_v35 = vadd.f32 %v732_v31, %v731_v34  ;;  %v673_v34 = vmul.f32 %v1267_v3, %v1267_v3 }
  0xe7   :  { %v744_v61 = vsel %vm477_vm3, %v671_v24, 0.0  ;;  %v580_v24 = vsel %vm477_vm3, %v1341_v16, 0.0 }
  0xe9   :  { %v1444_v15 = vpop.f32.mrf.mxu2 }
  0xea   :  { %v363_v8 = vpop.f32.mrf.mxu0  ;;  %v1431_v21 = vpop.f32.mrf.mxu1  ;;  %519 = vst.msk [vmem:[%s1779_s2 + $0x148] sm:$0xff] %vm477_vm3, %v1444_v15 }
  0xeb   :  { %490 = vst.msk [vmem:[%s1779_s2 + $0x60] sm:$0xff] %vm477_vm3, %v363_v8  ;;  %v666_v28 = vmul.f32 %v363_v8, %v363_v8  ;;  %v558_v33 = vsel %vm477_vm3, %v363_v8, 0.0 }
  0xec   :  { %504 = vst.msk [vmem:[%s1779_s2 + $0xd0] sm:$0xff] %vm477_vm3, %v1431_v21  ;;  %v559_v43 = vadd.f32 %v558_v33, %v557_v38  ;;  %v570_v33 = vsel %vm477_vm3, %v1249_v0, 0.0 }
  0xed   :  { %v734_v39 = vsel %vm477_vm3, %v666_v28, 0.0  ;;  %v672_v28 = vmul.f32 %v1249_v0, %v1249_v0  ;;  %v574_v0 = vsel %vm477_vm3, %v1285_v6, 0.0 }
  0xee   :  { %v735_v51 = vadd.f32 %v734_v39, %v733_v35 }
  0xef   :  { %v746_v35 = vsel %vm477_vm3, %v672_v28, 0.0  ;;  %v679_v28 = vmul.f32 %v1398_v37, %v1398_v37 }
  0xf1   :  { %v1477_v50 = vpop.f32.mrf.mxu2 }
  0xf2   :  { %v365_v45 = vpop.f32.mrf.mxu0  ;;  %v1463_v46 = vpop.f32.mrf.mxu1  ;;  %520 = vst.msk [vmem:[%s1779_s2 + $0x150] sm:$0xff] %vm477_vm3, %v1477_v50 }
  0xf3   :  { %491 = vst.msk [vmem:[%s1779_s2 + $0x68] sm:$0xff] %vm477_vm3, %v365_v45  ;;  %v560_v48 = vsel %vm477_vm3, %v365_v45, 0.0  ;;  %v667_v49 = vmul.f32 %v365_v45, %v365_v45  ;;  %v674_v45 = vmul.f32 %v1285_v6, %v1285_v6  ;;  %v676_v6 = vmul.f32 %v1321_v12, %v1321_v12 }
  0xf4   :  { %v561_v53 = vadd.f32 %v560_v48, %v559_v43  ;;  %505 = vst.msk [vmem:[%s1779_s2 + $0xd8] sm:$0xff] %vm477_vm3, %v1463_v46  ;;  %v572_v43 = vsel %vm477_vm3, %v1267_v3, 0.0  ;;  %v582_v12 = vsel %vm477_vm3, %v1366_v20, 0.0 }
  0xf5   :  { %v736_v57 = vsel %vm477_vm3, %v667_v49, 0.0  ;;  %v748_v49 = vsel %vm477_vm3, %v673_v34, 0.0  ;;  %v750_v3 = vsel %vm477_vm3, %v674_v45, 0.0 }
  0xf6   :  { %v563_v58 = vadd.f32 %v562_v54, %v561_v53  ;;  %v737_v59 = vadd.f32 %v736_v57, %v735_v51  ;;  %v675_v51 = vmul.f32 %v1303_v9, %v1303_v9  ;;  %v1545_v53 = vpop.f32.mrf.mxu3 }
  0xf7   :  { %530 = vst.msk [vmem:[%s1779_s2 + $0x1a0] sm:$0xff] %vm477_vm3, %v1545_v53 }
  0xf8   :  { %v565_v5 = vadd.f32 %v564_v2, %v563_v58  ;;  %v739_v8 = vadd.f32 %v738_v60, %v737_v59  ;;  %v576_v58 = vsel %vm477_vm3, %v1303_v9, 0.0  ;;  %v752_v9 = vsel %vm477_vm3, %v675_v51, 0.0 }
  0xf9   :  { %v1523_v29 = vpop.f32.mrf.mxu2 }
  0xfa   :  { %v567_v26 = vadd.f32 %v566_v23, %v565_v5  ;;  %v741_v27 = vadd.f32 %v740_v11, %v739_v8  ;;  %v1506_v19 = vpop.f32.mrf.mxu1  ;;  %521 = vst.msk [vmem:[%s1779_s2 + $0x158] sm:$0xff] %vm477_vm3, %v1523_v29  ;;  %v677_v5 = vmul.f32 %v1341_v16, %v1341_v16  ;;  %v754_v23 = vsel %vm477_vm3, %v676_v6, 0.0 }
  0xfb   :  { %506 = vst.msk [vmem:[%s1779_s2 + $0xe0] sm:$0xff] %vm477_vm3, %v1506_v19 }
  0xfc   :  { %v569_v30 = vadd.f32 %v568_v52, %v567_v26  ;;  %v743_v31 = vadd.f32 %v742_v40, %v741_v27  ;;  %v678_v26 = vmul.f32 %v1366_v20, %v1366_v20  ;;  %v756_v52 = vsel %vm477_vm3, %v677_v5, 0.0 }
  0xfd   :  { %v680_v20 = vmul.f32 %v1431_v21, %v1431_v21  ;;  %v594_v5 = vsel %vm477_vm3, %v1189_v44, 0.0 }
  0xfe   :  { %v571_v38 = vadd.f32 %v570_v33, %v569_v30  ;;  %v745_v39 = vadd.f32 %v744_v61, %v743_v31  ;;  %v1583_v30 = vpop.f32.mrf.mxu3  ;;  %v758_v16 = vsel %vm477_vm3, %v678_v26, 0.0  ;;  %v584_v33 = vsel %vm477_vm3, %v1398_v37, 0.0 }
  0xff   :  { %531 = vst.msk [vmem:[%s1779_s2 + $0x1a8] sm:$0xff] %vm477_vm3, %v1583_v30  ;;  %v681_v37 = vmul.f32 %v1463_v46, %v1463_v46 }
 0x100   :  { %v573_v47 = vadd.f32 %v572_v43, %v571_v38  ;;  %v747_v48 = vadd.f32 %v746_v35, %v745_v39  ;;  %v760_v35 = vsel %vm477_vm3, %v679_v28, 0.0  ;;  %v586_v43 = vsel %vm477_vm3, %v1431_v21, 0.0 }
 0x101   :  { %v1561_v59 = vpop.f32.mrf.mxu2  ;;  %v590_v21 = vsel %vm477_vm3, %v1506_v19, 0.0  ;;  %v687_v28 = vmul.f32 %v1255_v1, %v1255_v1 }
 0x102   :  { %v749_v54 = vadd.f32 %v748_v49, %v747_v48  ;;  %v575_v56 = vadd.f32 %v574_v0, %v573_v47  ;;  %v405_v57 = vpop.f32.mrf.mxu1  ;;  %522 = vst.msk [vmem:[%s1779_s2 + $0x160] sm:$0xff] %vm477_vm3, %v1561_v59  ;;  %v762_v48 = vsel %vm477_vm3, %v680_v20, 0.0  ;;  %v588_v49 = vsel %vm477_vm3, %v1463_v46, 0.0 }
 0x103   :  { %507 = vst.msk [vmem:[%s1779_s2 + $0xe8] sm:$0xff] %vm477_vm3, %v405_v57  ;;  %v682_v0 = vmul.f32 %v1506_v19, %v1506_v19  ;;  %v684_v46 = vmul.f32 %v1189_v44, %v1189_v44  ;;  %v598_v44 = vsel %vm477_vm3, %v1237_v62, 0.0 }
 0x104   :  { %v577_v60 = vadd.f32 %v576_v58, %v575_v56  ;;  %v751_v2 = vadd.f32 %v750_v3, %v749_v54  ;;  %v764_v56 = vsel %vm477_vm3, %v681_v37, 0.0  ;;  %v683_v3 = vmul.f32 %v405_v57, %v405_v57 }
 0x105   :  { %v770_v26 = vsel %vm477_vm3, %v684_v46, 0.0 }
 0x106   :  { %v579_v8 = vadd.f32 %v578_v36, %v577_v60  ;;  %v753_v11 = vadd.f32 %v752_v9, %v751_v2  ;;  %v1615_v58 = vpop.f32.mrf.mxu3  ;;  %v766_v2 = vsel %vm477_vm3, %v682_v0, 0.0  ;;  %v592_v9 = vsel %vm477_vm3, %v405_v57, 0.0 }
 0x107   :  { %532 = vst.msk [vmem:[%s1779_s2 + $0x1b0] sm:$0xff] %vm477_vm3, %v1615_v58  ;;  %v686_v57 = vmul.f32 %v1237_v62, %v1237_v62  ;;  %v688_v62 = vmul.f32 %v1273_v4, %v1273_v4 }
 0x108   :  { %v581_v27 = vadd.f32 %v580_v24, %v579_v8  ;;  %v755_v40 = vadd.f32 %v754_v23, %v753_v11  ;;  %v685_v8 = vmul.f32 %v1213_v55, %v1213_v55  ;;  %v768_v11 = vsel %vm477_vm3, %v683_v3, 0.0 }
 0x109   :  { %v1595_v34 = vpop.f32.mrf.mxu2 }
 0x10a   :  { %v583_v31 = vadd.f32 %v582_v12, %v581_v27  ;;  %v757_v61 = vadd.f32 %v756_v52, %v755_v40  ;;  %523 = vst.msk [vmem:[%s1779_s2 + $0x168] sm:$0xff] %vm477_vm3, %v1595_v34  ;;  %v596_v27 = vsel %vm477_vm3, %v1213_v55, 0.0  ;;  %v772_v12 = vsel %vm477_vm3, %v685_v8, 0.0 }
 0x10b   :  { %v774_v55 = vsel %vm477_vm3, %v686_v57, 0.0 }
 0x10c   :  { %v585_v38 = vadd.f32 %v584_v33, %v583_v31  ;;  %v759_v39 = vadd.f32 %v758_v16, %v757_v61  ;;  %v600_v33 = vsel %vm477_vm3, %v1255_v1, 0.0  ;;  %v604_v1 = vsel %vm477_vm3, %v1291_v7, 0.0 }
 0x10e   :  { %v587_v45 = vadd.f32 %v586_v43, %v585_v38  ;;  %v761_v47 = vadd.f32 %v760_v35, %v759_v39  ;;  %v1641_v31 = vpop.f32.mrf.mxu3  ;;  %v776_v39 = vsel %vm477_vm3, %v687_v28, 0.0  ;;  %v602_v35 = vsel %vm477_vm3, %v1273_v4, 0.0 }
 0x10f   :  { %533 = vst.msk [vmem:[%s1779_s2 + $0x1b8] sm:$0xff] %vm477_vm3, %v1641_v31  ;;  %v689_v43 = vmul.f32 %v1291_v7, %v1291_v7  ;;  %v606_v4 = vsel %vm477_vm3, %v1309_v10, 0.0 }
 0x110   :  { %v763_v51 = vadd.f32 %v762_v48, %v761_v47  ;;  %v589_v54 = vadd.f32 %v588_v49, %v587_v45  ;;  %v778_v47 = vsel %vm477_vm3, %v688_v62, 0.0  ;;  %v690_v48 = vmul.f32 %v1309_v10, %v1309_v10 }
 0x111   :  { %v692_v10 = vmul.f32 %v1352_v17, %v1352_v17 }
 0x112   :  { %v765_v6 = vadd.f32 %v764_v56, %v763_v51  ;;  %v591_v60 = vadd.f32 %v590_v21, %v589_v54  ;;  %v780_v51 = vsel %vm477_vm3, %v689_v43, 0.0  ;;  %v691_v54 = vmul.f32 %v1327_v13, %v1327_v13 }
 0x113   :  { %v782_v7 = vsel %vm477_vm3, %v690_v48, 0.0  ;;  %v786_v8 = vsel %vm477_vm3, %v692_v10, 0.0  ;;  %v624_v48 = vsel %vm477_vm3, %v1595_v34, 0.0 }
 0x114   :  { %v767_v36 = vadd.f32 %v766_v2, %v765_v6  ;;  %v593_v19 = vadd.f32 %v592_v9, %v591_v60  ;;  %v608_v6 = vsel %vm477_vm3, %v1327_v13, 0.0  ;;  %v784_v2 = vsel %vm477_vm3, %v691_v54, 0.0 }
 0x115   :  { %v610_v9 = vsel %vm477_vm3, %v1352_v17, 0.0  ;;  %v612_v13 = vsel %vm477_vm3, %v1377_v22, 0.0  ;;  %v614_v17 = vsel %vm477_vm3, %v1411_v42, 0.0 }
 0x116   :  { %v595_v23 = vadd.f32 %v594_v5, %v593_v19  ;;  %v769_v24 = vadd.f32 %v768_v11, %v767_v36  ;;  %v1668_v56 = vpop.f32.mrf.mxu3  ;;  %v693_v36 = vmul.f32 %v1377_v22, %v1377_v22  ;;  %v694_v11 = vmul.f32 %v1411_v42, %v1411_v42 }
 0x117   :  { %534 = vst.msk [vmem:[%s1779_s2 + $0x1c0] sm:$0xff] %vm477_vm3, %v1668_v56  ;;  %v616_v22 = vsel %vm477_vm3, %v1444_v15, 0.0  ;;  %v618_v42 = vsel %vm477_vm3, %v1477_v50, 0.0 }
 0x118   :  { %v597_v40 = vadd.f32 %v596_v27, %v595_v23  ;;  %v771_v52 = vadd.f32 %v770_v26, %v769_v24  ;;  %v788_v26 = vsel %vm477_vm3, %v693_v36, 0.0  ;;  %v695_v27 = vmul.f32 %v1444_v15, %v1444_v15 }
 0x119   :  { %v620_v15 = vsel %vm477_vm3, %v1523_v29, 0.0 }
 0x11a   :  { %v599_v61 = vadd.f32 %v598_v44, %v597_v40  ;;  %v773_v16 = vadd.f32 %v772_v12, %v771_v52  ;;  %v790_v12 = vsel %vm477_vm3, %v694_v11, 0.0  ;;  %v696_v44 = vmul.f32 %v1477_v50, %v1477_v50 }
 0x11b   :  { %v622_v50 = vsel %vm477_vm3, %v1561_v59, 0.0  ;;  %v705_v11 = vmul.f32 %v1504_v25, %v1504_v25 }
 0x11c   :  { %v601_v20 = vadd.f32 %v600_v33, %v599_v61  ;;  %v775_v38 = vadd.f32 %v774_v55, %v773_v16  ;;  %v792_v16 = vsel %vm477_vm3, %v695_v27, 0.0  ;;  %v697_v55 = vmul.f32 %v1523_v29, %v1523_v29 }
 0x11e   :  { %v603_v37 = vadd.f32 %v602_v35, %v601_v20  ;;  %v777_v45 = vadd.f32 %v776_v39, %v775_v38  ;;  %v475_v57 = vpop.f32.mrf.mxu3  ;;  %v794_v20 = vsel %vm477_vm3, %v696_v44, 0.0  ;;  %v698_v38 = vmul.f32 %v1561_v59, %v1561_v59 }
 0x11f   :  { %v796_v43 = vsel %vm477_vm3, %v697_v55, 0.0  ;;  %v701_v59 = vmul.f32 %v1364_v18, %v1364_v18  ;;  %v709_v55 = vmul.f32 %v1641_v31, %v1641_v31 }
 0x120   :  { %v605_v49 = vadd.f32 %v604_v1, %v603_v37  ;;  %v779_v0 = vadd.f32 %v778_v47, %v777_v45  ;;  %v699_v37 = vmul.f32 %v1595_v34, %v1595_v34  ;;  %v700_v1 = vmul.f32 %v1339_v14, %v1339_v14 }
 0x121   :  { %v798_v29 = vsel %vm477_vm3, %v698_v38, 0.0  ;;  %v702_v34 = vmul.f32 %v1395_v32, %v1395_v32  ;;  %v646_v38 = vsel %vm477_vm3, %v1668_v56, 0.0 }
 0x122   :  { %v781_v21 = vadd.f32 %v780_v51, %v779_v0  ;;  %v607_v3 = vadd.f32 %v606_v4, %v605_v49  ;;  %v626_v51 = vsel %vm477_vm3, %v1339_v14, 0.0  ;;  %v800_v4 = vsel %vm477_vm3, %v699_v37, 0.0 }
 0x123   :  { %v630_v14 = vsel %vm477_vm3, %v1395_v32, 0.0  ;;  %v806_v36 = vsel %vm477_vm3, %v702_v34, 0.0  ;;  %v634_v32 = vsel %vm477_vm3, %v1461_v41, 0.0 }
 0x124   :  { %v609_v60 = vadd.f32 %v608_v6, %v607_v3  ;;  %v783_v46 = vadd.f32 %v782_v7, %v781_v21  ;;  %v802_v3 = vsel %vm477_vm3, %v700_v1, 0.0  ;;  %v628_v7 = vsel %vm477_vm3, %v1364_v18, 0.0 }
 0x125   :  { %v632_v18 = vsel %vm477_vm3, %v1429_v63, 0.0 }
 0x126   :  { %v611_v19 = vadd.f32 %v610_v9, %v609_v60  ;;  %v785_v5 = vadd.f32 %v784_v2, %v783_v46  ;;  %v804_v60 = vsel %vm477_vm3, %v701_v59, 0.0  ;;  %v703_v46 = vmul.f32 %v1429_v63, %v1429_v63 }
 0x127   :  { %v636_v63 = vsel %vm477_vm3, %v1504_v25, 0.0  ;;  %v640_v25 = vsel %vm477_vm3, %v1583_v30, 0.0 }
 0x128   :  { %v613_v23 = vadd.f32 %v612_v13, %v611_v19  ;;  %v787_v24 = vadd.f32 %v786_v8, %v785_v5  ;;  %v704_v19 = vmul.f32 %v1461_v41, %v1461_v41  ;;  %v808_v13 = vsel %vm477_vm3, %v703_v46, 0.0 }
 0x129   :  { %v638_v41 = vsel %vm477_vm3, %v1545_v53, 0.0 }
 0x12a   :  { %v615_v40 = vadd.f32 %v614_v17, %v613_v23  ;;  %v789_v52 = vadd.f32 %v788_v26, %v787_v24  ;;  %v810_v26 = vsel %vm477_vm3, %v704_v19, 0.0  ;;  %v706_v17 = vmul.f32 %v1545_v53, %v1545_v53 }
 0x12b   :  { %v642_v53 = vsel %vm477_vm3, %v1615_v58, 0.0 }
 0x12c   :  { %v617_v28 = vadd.f32 %v616_v22, %v615_v40  ;;  %v791_v61 = vadd.f32 %v790_v12, %v789_v52  ;;  %v812_v40 = vsel %vm477_vm3, %v705_v11, 0.0  ;;  %v707_v52 = vmul.f32 %v1583_v30, %v1583_v30 }
 0x12d   :  { %v814_v44 = vsel %vm477_vm3, %v706_v17, 0.0 }
 0x12e   :  { %v793_v33 = vadd.f32 %v792_v16, %v791_v61  ;;  %v619_v62 = vadd.f32 %v618_v42, %v617_v28  ;;  %v708_v28 = vmul.f32 %v1615_v58, %v1615_v58  ;;  %v816_v42 = vsel %vm477_vm3, %v707_v52, 0.0 }
 0x12f   :  { %v820_v58 = vsel %vm477_vm3, %v709_v55, 0.0 }
 0x130   :  { %v795_v39 = vadd.f32 %v794_v20, %v793_v33  ;;  %v621_v35 = vadd.f32 %v620_v15, %v619_v62  ;;  %v710_v33 = vmul.f32 %v1668_v56, %v1668_v56  ;;  %v818_v30 = vsel %vm477_vm3, %v708_v28, 0.0 }
 0x131   :  { %v644_v15 = vsel %vm477_vm3, %v1641_v31, 0.0 }
 0x132   :  { %v797_v45 = vadd.f32 %v796_v43, %v795_v39  ;;  %v623_v47 = vadd.f32 %v622_v50, %v621_v35  ;;  %v822_v43 = vsel %vm477_vm3, %v710_v33, 0.0 }
 0x134   :  { %v799_v49 = vadd.f32 %v798_v29, %v797_v45  ;;  %v625_v0 = vadd.f32 %v624_v48, %v623_v47 }
 0x136   :  { %v627_v54 = vadd.f32 %v626_v51, %v625_v0  ;;  %v801_v21 = vadd.f32 %v800_v4, %v799_v49 }
 0x138   :  { %v629_v6 = vadd.f32 %v628_v7, %v627_v54  ;;  %v803_v10 = vadd.f32 %v802_v3, %v801_v21 }
 0x13a   :  { %v631_v2 = vadd.f32 %v630_v14, %v629_v6  ;;  %v805_v9 = vadd.f32 %v804_v60, %v803_v10 }
 0x13c   :  { %v633_v5 = vadd.f32 %v632_v18, %v631_v2  ;;  %v807_v8 = vadd.f32 %v806_v36, %v805_v9 }
 0x13e   :  { %v809_v23 = vadd.f32 %v808_v13, %v807_v8  ;;  %v635_v24 = vadd.f32 %v634_v32, %v633_v5 }
 0x140   :  { %v637_v27 = vadd.f32 %v636_v63, %v635_v24  ;;  %v811_v57 = vadd.f32 %v810_v26, %v809_v23 }
 0x142   :  { %v639_v12 = vadd.f32 %v638_v41, %v637_v27  ;;  %v813_v22 = vadd.f32 %v812_v40, %v811_v57 }
 0x144   :  { %v641_v61 = vadd.f32 %v640_v25, %v639_v12  ;;  %v815_v16 = vadd.f32 %v814_v44, %v813_v22 }
 0x146   :  { %v643_v62 = vadd.f32 %v642_v53, %v641_v61  ;;  %v817_v20 = vadd.f32 %v816_v42, %v815_v16 }
 0x148   :  { %v819_v39 = vadd.f32 %v818_v30, %v817_v20  ;;  %v645_v35 = vadd.f32 %v644_v15, %v643_v62 }
 0x14a   :  { %v821_v50 = vadd.f32 %v820_v58, %v819_v39  ;;  %v647_v37 = vadd.f32 %v646_v38, %v645_v35 }
 0x14c   :  { %v648_v45 = vrot.slane %v647_v37, 4  ;;  %v823_v47 = vadd.f32 %v822_v43, %v821_v50 }
 0x14e   :  { %v649_v1 = vadd.f32 %v648_v45, %v647_v37  ;;  %v824_v29 = vrot.slane %v823_v47, 4 }
 0x150   :  { %v650_v48 = vrot.slane %v649_v1, 2  ;;  %v825_v49 = vadd.f32 %v824_v29, %v823_v47 }
 0x152   :  { %v651_v0 = vadd.f32 %v650_v48, %v649_v1  ;;  %v826_v51 = vrot.slane %v825_v49, 2 }
 0x154   :  { %v652_v31 = vrot.slane %v651_v0, 1  ;;  %v827_v59 = vadd.f32 %v826_v51, %v825_v49 }
 0x156   :  { %v828_v4 = vrot.slane %v827_v59, 1  ;;  %v653_v56 = vadd.f32 %v652_v31, %v651_v0 }
 0x158   :  { %v829_v54 = vadd.f32 %v828_v4, %v827_v59 }
 0x15a   :  { %v831_v21 = vsel %vm830_vm4, %v653_v56, %v829_v54 }
 0x15b   :  { %833 = vst.msk [vmem:[%s1780_s3] sm:$0x3] %vm832_vm5, %v831_v21 }

// kernel: context_net_forward.7
= control target key start
LH: loop header
LB: loop body
LE: loop exit
PB: predicated region body
PF: predicated region fallthrough
CT: control target
= control target key end

     0   :  { %vm250_vm0 = vcmask 523264   ;;  %s857_s0 = inlined_call_operand.vmem [shape: f32[456,64], index: 0, kind: input, shape index: {}]   ;;  %s858_s1 = inlined_call_operand.vmem [shape: f32[1,64], index: 1, kind: input, shape index: {}]   ;;  %s859_s2 = inlined_call_operand.vmem [shape: f32[1,64], index: 2, kind: input, shape index: {}]   ;;  %s860_s3 = inlined_call_operand.vmem [shape: f32[456,64], index: 3, kind: output, shape index: {}]  }
   0x1   :  { %v14_v0 = vld [vmem:[%s857_s0] sm:$0xff]  ;;  %v15_v3 = vld [vmem:[%s857_s0 + $0x8] sm:$0xff]  ;;  %v16_v6 = vld [vmem:[%s857_s0 + $0x10] sm:$0xff] }
   0x2   :  { %v340_v1 = vld [vmem:[%s858_s1] ss:$0 sm:$0xff]  ;;  %v17_v7 = vld [vmem:[%s857_s0 + $0x18] sm:$0xff]  ;;  %v19_v12 = vld [vmem:[%s857_s0 + $0x28] sm:$0xff] }
   0x3   :  { %v345_v2 = vld [vmem:[%s859_s2] ss:$0 sm:$0xff]  ;;  %v75_v4 = vmul.f32 %v340_v1, %v14_v0  ;;  %v76_v5 = vmul.f32 %v340_v1, %v15_v3  ;;  %v77_v9 = vmul.f32 %v340_v1, %v16_v6  ;;  %v78_v10 = vmul.f32 %v340_v1, %v17_v7  ;;  %v20_v13 = vld [vmem:[%s857_s0 + $0x30] sm:$0xff]  ;;  %v21_v14 = vld [vmem:[%s857_s0 + $0x38] sm:$0xff] }
   0x4   :  { %v18_v8 = vld [vmem:[%s857_s0 + $0x20] sm:$0xff]  ;;  %v80_v17 = vmul.f32 %v340_v1, %v19_v12  ;;  %v81_v18 = vmul.f32 %v340_v1, %v20_v13  ;;  %v82_v22 = vmul.f32 %v340_v1, %v21_v14  ;;  %v23_v24 = vld [vmem:[%s857_s0 + $0x48] sm:$0xff]  ;;  %v24_v29 = vld [vmem:[%s857_s0 + $0x50] sm:$0xff] }
   0x5   :  { %v79_v11 = vmul.f32 %v340_v1, %v18_v8  ;;  %v136_v15 = vadd.f32 %v345_v2, %v75_v4  ;;  %v137_v16 = vadd.f32 %v345_v2, %v76_v5  ;;  %v138_v19 = vadd.f32 %v345_v2, %v77_v9  ;;  %v22_v23 = vld [vmem:[%s857_s0 + $0x40] sm:$0xff]  ;;  %v25_v30 = vld [vmem:[%s857_s0 + $0x58] sm:$0xff]  ;;  %v27_v35 = vld [vmem:[%s857_s0 + $0x68] sm:$0xff] }
   0x6   :  { %v139_v20 = vadd.f32 %v345_v2, %v78_v10  ;;  %v141_v27 = vadd.f32 %v345_v2, %v80_v17  ;;  %v142_v28 = vadd.f32 %v345_v2, %v81_v18  ;;  %v26_v31 = vld [vmem:[%s857_s0 + $0x60] sm:$0xff]  ;;  %v143_v34 = vadd.f32 %v345_v2, %v82_v22  ;;  %v28_v36 = vld [vmem:[%s857_s0 + $0x70] sm:$0xff]  ;;  %v29_v41 = vld [vmem:[%s857_s0 + $0x78] sm:$0xff] }
   0x7   :  { %v140_v21 = vadd.f32 %v345_v2, %v79_v11  ;;  %v193_v25 = vmax.f32 %v136_v15, 0.0  ;;  %v194_v26 = vmax.f32 %v137_v16, 0.0  ;;  %v195_v32 = vmax.f32 %v138_v19, 0.0  ;;  %v30_v54 = vld [vmem:[%s857_s0 + $0x80] sm:$0xff]  ;;  %v31_v55 = vld [vmem:[%s857_s0 + $0x88] sm:$0xff]  ;;  %v32_v58 = vld [vmem:[%s857_s0 + $0x90] sm:$0xff] }
   0x8   :  { %v196_v33 = vmax.f32 %v139_v20, 0.0  ;;  %v198_v38 = vmax.f32 %v141_v27, 0.0  ;;  %v83_v39 = vmul.f32 %v340_v1, %v22_v23  ;;  %v84_v40 = vmul.f32 %v340_v1, %v23_v24  ;;  %v33_v59 = vld [vmem:[%s857_s0 + $0x98] sm:$0xff]  ;;  %v34_v62 = vld [vmem:[%s857_s0 + $0xa0] sm:$0xff]  ;;  %v35_v5 = vld [vmem:[%s857_s0 + $0xa8] sm:$0xff] }
   0x9   :  { %251 = vst.msk [vmem:[%s860_s3] sm:$0xff] %vm250_vm0, %v193_v25  ;;  %v197_v37 = vmax.f32 %v140_v21, 0.0  ;;  %v199_v42 = vmax.f32 %v142_v28, 0.0  ;;  %v85_v43 = vmul.f32 %v340_v1, %v24_v29  ;;  %v86_v44 = vmul.f32 %v340_v1, %v25_v30  ;;  %v36_v10 = vld [vmem:[%s857_s0 + $0xb0] sm:$0xff]  ;;  %v37_v14 = vld [vmem:[%s857_s0 + $0xb8] sm:$0xff]  ;;  %v38_v18 = vld [vmem:[%s857_s0 + $0xc0] sm:$0xff] }
   0xa   :  { %252 = vst.msk [vmem:[%s860_s3 + $0x8] sm:$0xff] %vm250_vm0, %v194_v26  ;;  %v87_v45 = vmul.f32 %v340_v1, %v26_v31  ;;  %v144_v46 = vadd.f32 %v345_v2, %v83_v39  ;;  %v145_v47 = vadd.f32 %v345_v2, %v84_v40  ;;  %v88_v48 = vmul.f32 %v340_v1, %v27_v35  ;;  %v39_v22 = vld [vmem:[%s857_s0 + $0xc8] sm:$0xff]  ;;  %v40_v26 = vld [vmem:[%s857_s0 + $0xd0] sm:$0xff]  ;;  %v41_v30 = vld [vmem:[%s857_s0 + $0xd8] sm:$0xff] }
   0xb   :  { %253 = vst.msk [vmem:[%s860_s3 + $0x10] sm:$0xff] %vm250_vm0, %v195_v32  ;;  %v89_v49 = vmul.f32 %v340_v1, %v28_v36  ;;  %v200_v50 = vmax.f32 %v143_v34, 0.0  ;;  %v146_v51 = vadd.f32 %v345_v2, %v85_v43  ;;  %v147_v52 = vadd.f32 %v345_v2, %v86_v44  ;;  %v42_v34 = vld [vmem:[%s857_s0 + $0xe0] sm:$0xff] }
   0xc   :  { %254 = vst.msk [vmem:[%s860_s3 + $0x18] sm:$0xff] %vm250_vm0, %v196_v33  ;;  %v90_v53 = vmul.f32 %v340_v1, %v29_v41  ;;  %v201_v56 = vmax.f32 %v144_v46, 0.0  ;;  %v148_v57 = vadd.f32 %v345_v2, %v87_v45  ;;  %v202_v60 = vmax.f32 %v145_v47, 0.0  ;;  %v45_v46 = vld [vmem:[%s857_s0 + $0xf8] sm:$0xff] }
   0xd   :  { %255 = vst.msk [vmem:[%s860_s3 + $0x20] sm:$0xff] %vm250_vm0, %v197_v37  ;;  %v149_v61 = vadd.f32 %v345_v2, %v88_v48  ;;  %v203_v63 = vmax.f32 %v146_v51, 0.0  ;;  %v150_v0 = vadd.f32 %v345_v2, %v89_v49  ;;  %v91_v3 = vmul.f32 %v340_v1, %v30_v54  ;;  %v47_v54 = vld [vmem:[%s857_s0 + $0x108] sm:$0xff] }
   0xe   :  { %256 = vst.msk [vmem:[%s860_s3 + $0x28] sm:$0xff] %vm250_vm0, %v198_v38  ;;  %v92_v4 = vmul.f32 %v340_v1, %v31_v55  ;;  %v204_v6 = vmax.f32 %v147_v52, 0.0  ;;  %v151_v7 = vadd.f32 %v345_v2, %v90_v53  ;;  %v93_v8 = vmul.f32 %v340_v1, %v32_v58  ;;  %v43_v38 = vld [vmem:[%s857_s0 + $0xe8] sm:$0xff]  ;;  %v48_v58 = vld [vmem:[%s857_s0 + $0x110] sm:$0xff] }
   0xf   :  { %257 = vst.msk [vmem:[%s860_s3 + $0x30] sm:$0xff] %vm250_vm0, %v199_v42  ;;  %v94_v9 = vmul.f32 %v340_v1, %v33_v59  ;;  %v205_v11 = vmax.f32 %v148_v57, 0.0  ;;  %v152_v12 = vadd.f32 %v345_v2, %v91_v3  ;;  %v95_v13 = vmul.f32 %v340_v1, %v34_v62  ;;  %v44_v42 = vld [vmem:[%s857_s0 + $0xf0] sm:$0xff]  ;;  %v49_v62 = vld [vmem:[%s857_s0 + $0x118] sm:$0xff] }
  0x10   :  { %258 = vst.msk [vmem:[%s860_s3 + $0x38] sm:$0xff] %vm250_vm0, %v200_v50  ;;  %v206_v15 = vmax.f32 %v149_v61, 0.0  ;;  %v153_v16 = vadd.f32 %v345_v2, %v92_v4  ;;  %v96_v17 = vmul.f32 %v340_v1, %v35_v5  ;;  %v207_v19 = vmax.f32 %v150_v0, 0.0  ;;  %v46_v50 = vld [vmem:[%s857_s0 + $0x100] sm:$0xff] }
  0x11   :  { %259 = vst.msk [vmem:[%s860_s3 + $0x40] sm:$0xff] %vm250_vm0, %v201_v56  ;;  %v154_v20 = vadd.f32 %v345_v2, %v93_v8  ;;  %v97_v21 = vmul.f32 %v340_v1, %v36_v10  ;;  %v208_v23 = vmax.f32 %v151_v7, 0.0  ;;  %v155_v24 = vadd.f32 %v345_v2, %v94_v9  ;;  %v50_v4 = vld [vmem:[%s857_s0 + $0x120] sm:$0xff]  ;;  %v51_v8 = vld [vmem:[%s857_s0 + $0x128] sm:$0xff] }
  0x12   :  { %260 = vst.msk [vmem:[%s860_s3 + $0x48] sm:$0xff] %vm250_vm0, %v202_v60  ;;  %v98_v25 = vmul.f32 %v340_v1, %v37_v14  ;;  %v209_v27 = vmax.f32 %v152_v12, 0.0  ;;  %v156_v28 = vadd.f32 %v345_v2, %v95_v13  ;;  %v99_v29 = vmul.f32 %v340_v1, %v38_v18  ;;  %v52_v12 = vld [vmem:[%s857_s0 + $0x130] sm:$0xff] }
  0x13   :  { %261 = vst.msk [vmem:[%s860_s3 + $0x50] sm:$0xff] %vm250_vm0, %v203_v63  ;;  %v210_v31 = vmax.f32 %v153_v16, 0.0  ;;  %v157_v32 = vadd.f32 %v345_v2, %v96_v17  ;;  %v100_v33 = vmul.f32 %v340_v1, %v39_v22  ;;  %v211_v35 = vmax.f32 %v154_v20, 0.0  ;;  %v53_v16 = vld [vmem:[%s857_s0 + $0x138] sm:$0xff]  ;;  %v54_v20 = vld [vmem:[%s857_s0 + $0x140] sm:$0xff] }
  0x14   :  { %262 = vst.msk [vmem:[%s860_s3 + $0x58] sm:$0xff] %vm250_vm0, %v204_v6  ;;  %v158_v36 = vadd.f32 %v345_v2, %v97_v21  ;;  %v101_v37 = vmul.f32 %v340_v1, %v40_v26  ;;  %v212_v39 = vmax.f32 %v155_v24, 0.0  ;;  %v159_v40 = vadd.f32 %v345_v2, %v98_v25  ;;  %v55_v24 = vld [vmem:[%s857_s0 + $0x148] sm:$0xff] }
  0x15   :  { %263 = vst.msk [vmem:[%s860_s3 + $0x60] sm:$0xff] %vm250_vm0, %v205_v11  ;;  %v102_v41 = vmul.f32 %v340_v1, %v41_v30  ;;  %v213_v43 = vmax.f32 %v156_v28, 0.0  ;;  %v160_v44 = vadd.f32 %v345_v2, %v99_v29  ;;  %v103_v45 = vmul.f32 %v340_v1, %v42_v34  ;;  %v56_v28 = vld [vmem:[%s857_s0 + $0x150] sm:$0xff] }
  0x16   :  { %264 = vst.msk [vmem:[%s860_s3 + $0x68] sm:$0xff] %vm250_vm0, %v206_v15  ;;  %v214_v47 = vmax.f32 %v157_v32, 0.0  ;;  %v161_v48 = vadd.f32 %v345_v2, %v100_v33  ;;  %v104_v49 = vmul.f32 %v340_v1, %v43_v38  ;;  %v215_v51 = vmax.f32 %v158_v36, 0.0  ;;  %v57_v32 = vld [vmem:[%s857_s0 + $0x158] sm:$0xff]  ;;  %v58_v36 = vld [vmem:[%s857_s0 + $0x160] sm:$0xff] }
  0x17   :  { %265 = vst.msk [vmem:[%s860_s3 + $0x70] sm:$0xff] %vm250_vm0, %v207_v19  ;;  %v162_v52 = vadd.f32 %v345_v2, %v101_v37  ;;  %v105_v53 = vmul.f32 %v340_v1, %v44_v42  ;;  %v216_v55 = vmax.f32 %v159_v40, 0.0  ;;  %v163_v56 = vadd.f32 %v345_v2, %v102_v41  ;;  %v59_v40 = vld [vmem:[%s857_s0 + $0x168] sm:$0xff] }
  0x18   :  { %266 = vst.msk [vmem:[%s860_s3 + $0x78] sm:$0xff] %vm250_vm0, %v208_v23  ;;  %v106_v57 = vmul.f32 %v340_v1, %v45_v46  ;;  %v217_v59 = vmax.f32 %v160_v44, 0.0  ;;  %v164_v60 = vadd.f32 %v345_v2, %v103_v45  ;;  %v107_v61 = vmul.f32 %v340_v1, %v46_v50  ;;  %v60_v44 = vld [vmem:[%s857_s0 + $0x170] sm:$0xff] }
  0x19   :  { %267 = vst.msk [vmem:[%s860_s3 + $0x80] sm:$0xff] %vm250_vm0, %v209_v27  ;;  %v218_v63 = vmax.f32 %v161_v48, 0.0  ;;  %v165_v0 = vadd.f32 %v345_v2, %v104_v49  ;;  %v108_v3 = vmul.f32 %v340_v1, %v47_v54  ;;  %v219_v5 = vmax.f32 %v162_v52, 0.0  ;;  %v61_v48 = vld [vmem:[%s857_s0 + $0x178] sm:$0xff]  ;;  %v62_v52 = vld [vmem:[%s857_s0 + $0x180] sm:$0xff] }
  0x1a   :  { %268 = vst.msk [vmem:[%s860_s3 + $0x88] sm:$0xff] %vm250_vm0, %v210_v31  ;;  %v166_v6 = vadd.f32 %v345_v2, %v105_v53  ;;  %v109_v7 = vmul.f32 %v340_v1, %v48_v58  ;;  %v220_v9 = vmax.f32 %v163_v56, 0.0  ;;  %v167_v10 = vadd.f32 %v345_v2, %v106_v57  ;;  %v63_v56 = vld [vmem:[%s857_s0 + $0x188] sm:$0xff] }
  0x1b   :  { %269 = vst.msk [vmem:[%s860_s3 + $0x90] sm:$0xff] %vm250_vm0, %v211_v35  ;;  %v110_v11 = vmul.f32 %v340_v1, %v49_v62  ;;  %v221_v13 = vmax.f32 %v164_v60, 0.0  ;;  %v168_v14 = vadd.f32 %v345_v2, %v107_v61  ;;  %v111_v15 = vmul.f32 %v340_v1, %v50_v4  ;;  %v64_v60 = vld [vmem:[%s857_s0 + $0x190] sm:$0xff] }
  0x1c   :  { %270 = vst.msk [vmem:[%s860_s3 + $0x98] sm:$0xff] %vm250_vm0, %v212_v39  ;;  %v222_v17 = vmax.f32 %v165_v0, 0.0  ;;  %v169_v18 = vadd.f32 %v345_v2, %v108_v3  ;;  %v112_v19 = vmul.f32 %v340_v1, %v51_v8  ;;  %v223_v21 = vmax.f32 %v166_v6, 0.0  ;;  %v65_v0 = vld [vmem:[%s857_s0 + $0x198] sm:$0xff]  ;;  %v66_v6 = vld [vmem:[%s857_s0 + $0x1a0] sm:$0xff] }
  0x1d   :  { %271 = vst.msk [vmem:[%s860_s3 + $0xa0] sm:$0xff] %vm250_vm0, %v213_v43  ;;  %v170_v22 = vadd.f32 %v345_v2, %v109_v7  ;;  %v113_v23 = vmul.f32 %v340_v1, %v52_v12  ;;  %v224_v25 = vmax.f32 %v167_v10, 0.0  ;;  %v171_v26 = vadd.f32 %v345_v2, %v110_v11  ;;  %v67_v10 = vld [vmem:[%s857_s0 + $0x1a8] sm:$0xff] }
  0x1e   :  { %272 = vst.msk [vmem:[%s860_s3 + $0xa8] sm:$0xff] %vm250_vm0, %v214_v47  ;;  %v114_v27 = vmul.f32 %v340_v1, %v53_v16  ;;  %v225_v29 = vmax.f32 %v168_v14, 0.0  ;;  %v172_v30 = vadd.f32 %v345_v2, %v111_v15  ;;  %v115_v31 = vmul.f32 %v340_v1, %v54_v20  ;;  %v68_v14 = vld [vmem:[%s857_s0 + $0x1b0] sm:$0xff] }
  0x1f   :  { %273 = vst.msk [vmem:[%s860_s3 + $0xb0] sm:$0xff] %vm250_vm0, %v215_v51  ;;  %v226_v33 = vmax.f32 %v169_v18, 0.0  ;;  %v173_v34 = vadd.f32 %v345_v2, %v112_v19  ;;  %v116_v35 = vmul.f32 %v340_v1, %v55_v24  ;;  %v227_v37 = vmax.f32 %v170_v22, 0.0  ;;  %v69_v18 = vld [vmem:[%s857_s0 + $0x1b8] sm:$0xff]  ;;  %v70_v22 = vld [vmem:[%s857_s0 + $0x1c0] sm:$0xff] }
  0x20   :  { %274 = vst.msk [vmem:[%s860_s3 + $0xb8] sm:$0xff] %vm250_vm0, %v216_v55  ;;  %v174_v38 = vadd.f32 %v345_v2, %v113_v23  ;;  %v117_v39 = vmul.f32 %v340_v1, %v56_v28  ;;  %v228_v41 = vmax.f32 %v171_v26, 0.0  ;;  %v175_v42 = vadd.f32 %v345_v2, %v114_v27 }
  0x21   :  { %275 = vst.msk [vmem:[%s860_s3 + $0xc0] sm:$0xff] %vm250_vm0, %v217_v59  ;;  %v118_v43 = vmul.f32 %v340_v1, %v57_v32  ;;  %v229_v45 = vmax.f32 %v172_v30, 0.0  ;;  %v176_v46 = vadd.f32 %v345_v2, %v115_v31  ;;  %v119_v47 = vmul.f32 %v340_v1, %v58_v36 }
  0x22   :  { %276 = vst.msk [vmem:[%s860_s3 + $0xc8] sm:$0xff] %vm250_vm0, %v218_v63  ;;  %v230_v49 = vmax.f32 %v173_v34, 0.0  ;;  %v177_v50 = vadd.f32 %v345_v2, %v116_v35  ;;  %v120_v51 = vmul.f32 %v340_v1, %v59_v40  ;;  %v231_v53 = vmax.f32 %v174_v38, 0.0 }
  0x23   :  { %277 = vst.msk [vmem:[%s860_s3 + $0xd0] sm:$0xff] %vm250_vm0, %v219_v5  ;;  %v178_v54 = vadd.f32 %v345_v2, %v117_v39  ;;  %v121_v55 = vmul.f32 %v340_v1, %v60_v44  ;;  %v232_v57 = vmax.f32 %v175_v42, 0.0  ;;  %v179_v58 = vadd.f32 %v345_v2, %v118_v43 }
  0x24   :  { %278 = vst.msk [vmem:[%s860_s3 + $0xd8] sm:$0xff] %vm250_vm0, %v220_v9  ;;  %v122_v59 = vmul.f32 %v340_v1, %v61_v48  ;;  %v233_v61 = vmax.f32 %v176_v46, 0.0  ;;  %v180_v62 = vadd.f32 %v345_v2, %v119_v47  ;;  %v123_v63 = vmul.f32 %v340_v1, %v62_v52 }
  0x25   :  { %279 = vst.msk [vmem:[%s860_s3 + $0xe0] sm:$0xff] %vm250_vm0, %v221_v13  ;;  %v234_v3 = vmax.f32 %v177_v50, 0.0  ;;  %v181_v4 = vadd.f32 %v345_v2, %v120_v51  ;;  %v124_v5 = vmul.f32 %v340_v1, %v63_v56  ;;  %v235_v7 = vmax.f32 %v178_v54, 0.0 }
  0x26   :  { %280 = vst.msk [vmem:[%s860_s3 + $0xe8] sm:$0xff] %vm250_vm0, %v222_v17  ;;  %v182_v8 = vadd.f32 %v345_v2, %v121_v55  ;;  %v125_v9 = vmul.f32 %v340_v1, %v64_v60  ;;  %v236_v11 = vmax.f32 %v179_v58, 0.0  ;;  %v183_v12 = vadd.f32 %v345_v2, %v122_v59 }
  0x27   :  { %281 = vst.msk [vmem:[%s860_s3 + $0xf0] sm:$0xff] %vm250_vm0, %v223_v21  ;;  %v126_v13 = vmul.f32 %v340_v1, %v65_v0  ;;  %v237_v15 = vmax.f32 %v180_v62, 0.0  ;;  %v184_v16 = vadd.f32 %v345_v2, %v123_v63  ;;  %v127_v17 = vmul.f32 %v340_v1, %v66_v6 }
  0x28   :  { %282 = vst.msk [vmem:[%s860_s3 + $0xf8] sm:$0xff] %vm250_vm0, %v224_v25  ;;  %v238_v19 = vmax.f32 %v181_v4, 0.0  ;;  %v185_v20 = vadd.f32 %v345_v2, %v124_v5  ;;  %v128_v21 = vmul.f32 %v340_v1, %v67_v10  ;;  %v239_v23 = vmax.f32 %v182_v8, 0.0 }
  0x29   :  { %283 = vst.msk [vmem:[%s860_s3 + $0x100] sm:$0xff] %vm250_vm0, %v225_v29  ;;  %v186_v24 = vadd.f32 %v345_v2, %v125_v9  ;;  %v129_v25 = vmul.f32 %v340_v1, %v68_v14  ;;  %v240_v26 = vmax.f32 %v183_v12, 0.0  ;;  %v187_v27 = vadd.f32 %v345_v2, %v126_v13 }
  0x2a   :  { %284 = vst.msk [vmem:[%s860_s3 + $0x108] sm:$0xff] %vm250_vm0, %v226_v33  ;;  %v130_v28 = vmul.f32 %v340_v1, %v69_v18  ;;  %v241_v29 = vmax.f32 %v184_v16, 0.0  ;;  %v188_v30 = vadd.f32 %v345_v2, %v127_v17  ;;  %v131_v31 = vmul.f32 %v340_v1, %v70_v22 }
  0x2b   :  { %285 = vst.msk [vmem:[%s860_s3 + $0x110] sm:$0xff] %vm250_vm0, %v227_v37  ;;  %v242_v32 = vmax.f32 %v185_v20, 0.0  ;;  %v189_v33 = vadd.f32 %v345_v2, %v128_v21  ;;  %v243_v34 = vmax.f32 %v186_v24, 0.0  ;;  %v190_v35 = vadd.f32 %v345_v2, %v129_v25 }
  0x2c   :  { %286 = vst.msk [vmem:[%s860_s3 + $0x118] sm:$0xff] %vm250_vm0, %v228_v41  ;;  %v244_v1 = vmax.f32 %v187_v27, 0.0  ;;  %v191_v36 = vadd.f32 %v345_v2, %v130_v28  ;;  %v245_v37 = vmax.f32 %v188_v30, 0.0  ;;  %v192_v38 = vadd.f32 %v345_v2, %v131_v31 }
  0x2d   :  { %287 = vst.msk [vmem:[%s860_s3 + $0x120] sm:$0xff] %vm250_vm0, %v229_v45  ;;  %v246_v39 = vmax.f32 %v189_v33, 0.0  ;;  %v247_v40 = vmax.f32 %v190_v35, 0.0 }
  0x2e   :  { %288 = vst.msk [vmem:[%s860_s3 + $0x128] sm:$0xff] %vm250_vm0, %v230_v49  ;;  %v248_v41 = vmax.f32 %v191_v36, 0.0  ;;  %v249_v2 = vmax.f32 %v192_v38, 0.0 }
  0x2f   :  { %289 = vst.msk [vmem:[%s860_s3 + $0x130] sm:$0xff] %vm250_vm0, %v231_v53 }
  0x30   :  { %290 = vst.msk [vmem:[%s860_s3 + $0x138] sm:$0xff] %vm250_vm0, %v232_v57 }
  0x31   :  { %291 = vst.msk [vmem:[%s860_s3 + $0x140] sm:$0xff] %vm250_vm0, %v233_v61 }
  0x32   :  { %292 = vst.msk [vmem:[%s860_s3 + $0x148] sm:$0xff] %vm250_vm0, %v234_v3 }
  0x33   :  { %293 = vst.msk [vmem:[%s860_s3 + $0x150] sm:$0xff] %vm250_vm0, %v235_v7 }
  0x34   :  { %294 = vst.msk [vmem:[%s860_s3 + $0x158] sm:$0xff] %vm250_vm0, %v236_v11 }
  0x35   :  { %295 = vst.msk [vmem:[%s860_s3 + $0x160] sm:$0xff] %vm250_vm0, %v237_v15 }
  0x36   :  { %296 = vst.msk [vmem:[%s860_s3 + $0x168] sm:$0xff] %vm250_vm0, %v238_v19 }
  0x37   :  { %297 = vst.msk [vmem:[%s860_s3 + $0x170] sm:$0xff] %vm250_vm0, %v239_v23 }
  0x38   :  { %298 = vst.msk [vmem:[%s860_s3 + $0x178] sm:$0xff] %vm250_vm0, %v240_v26 }
  0x39   :  { %299 = vst.msk [vmem:[%s860_s3 + $0x180] sm:$0xff] %vm250_vm0, %v241_v29 }
  0x3a   :  { %300 = vst.msk [vmem:[%s860_s3 + $0x188] sm:$0xff] %vm250_vm0, %v242_v32 }
  0x3b   :  { %301 = vst.msk [vmem:[%s860_s3 + $0x190] sm:$0xff] %vm250_vm0, %v243_v34 }
  0x3c   :  { %302 = vst.msk [vmem:[%s860_s3 + $0x198] sm:$0xff] %vm250_vm0, %v244_v1 }
  0x3d   :  { %303 = vst.msk [vmem:[%s860_s3 + $0x1a0] sm:$0xff] %vm250_vm0, %v245_v37 }
  0x3e   :  { %304 = vst.msk [vmem:[%s860_s3 + $0x1a8] sm:$0xff] %vm250_vm0, %v246_v39 }
  0x3f   :  { %305 = vst.msk [vmem:[%s860_s3 + $0x1b0] sm:$0xff] %vm250_vm0, %v247_v40 }
  0x40   :  { %306 = vst.msk [vmem:[%s860_s3 + $0x1b8] sm:$0xff] %vm250_vm0, %v248_v41 }
  0x41   :  { %307 = vst.msk [vmem:[%s860_s3 + $0x1c0] sm:$0xff] %vm250_vm0, %v249_v2 }

// kernel: context_net_forward.9
= control target key start
LH: loop header
LB: loop body
LE: loop exit
PB: predicated region body
PF: predicated region fallthrough
CT: control target
= control target key end

     0   :  { %s197_s0 = inlined_call_operand.vmem [shape: f32[104,128], index: 0, kind: input, shape index: {}]   ;;  %s198_s1 = inlined_call_operand.vmem [shape: f32[1,128], index: 1, kind: input, shape index: {}]   ;;  %s199_s2 = inlined_call_operand.vmem [shape: f32[1,128], index: 2, kind: input, shape index: {}]   ;;  %s200_s3 = inlined_call_operand.vmem [shape: f32[104,128], index: 3, kind: output, shape index: {}]  }
   0x1   :  { %v14_v0 = vld [vmem:[%s197_s0] sm:$0xff]  ;;  %v15_v3 = vld [vmem:[%s197_s0 + $0x8] sm:$0xff]  ;;  %v16_v6 = vld [vmem:[%s197_s0 + $0x10] sm:$0xff] }
   0x2   :  { %v91_v1 = vld [vmem:[%s198_s1] ss:$0 sm:$0xff]  ;;  %v17_v7 = vld [vmem:[%s197_s0 + $0x18] sm:$0xff]  ;;  %v19_v12 = vld [vmem:[%s197_s0 + $0x28] sm:$0xff] }
   0x3   :  { %v92_v2 = vld [vmem:[%s199_s2] ss:$0 sm:$0xff]  ;;  %v31_v4 = vmul.f32 %v91_v1, %v14_v0  ;;  %v32_v5 = vmul.f32 %v91_v1, %v15_v3  ;;  %v33_v9 = vmul.f32 %v91_v1, %v16_v6  ;;  %v34_v10 = vmul.f32 %v91_v1, %v17_v7  ;;  %v20_v13 = vld [vmem:[%s197_s0 + $0x30] sm:$0xff]  ;;  %v21_v14 = vld [vmem:[%s197_s0 + $0x38] sm:$0xff] }
   0x4   :  { %v18_v8 = vld [vmem:[%s197_s0 + $0x20] sm:$0xff]  ;;  %v36_v17 = vmul.f32 %v91_v1, %v19_v12  ;;  %v37_v18 = vmul.f32 %v91_v1, %v20_v13  ;;  %v38_v22 = vmul.f32 %v91_v1, %v21_v14  ;;  %v23_v24 = vld [vmem:[%s197_s0 + $0x48] sm:$0xff]  ;;  %v24_v29 = vld [vmem:[%s197_s0 + $0x50] sm:$0xff] }
   0x5   :  { %v35_v11 = vmul.f32 %v91_v1, %v18_v8  ;;  %v48_v15 = vadd.f32 %v92_v2, %v31_v4  ;;  %v49_v16 = vadd.f32 %v92_v2, %v32_v5  ;;  %v50_v19 = vadd.f32 %v92_v2, %v33_v9  ;;  %v22_v23 = vld [vmem:[%s197_s0 + $0x40] sm:$0xff]  ;;  %v25_v30 = vld [vmem:[%s197_s0 + $0x58] sm:$0xff] }
   0x6   :  { %v51_v20 = vadd.f32 %v92_v2, %v34_v10  ;;  %v53_v27 = vadd.f32 %v92_v2, %v36_v17  ;;  %v54_v28 = vadd.f32 %v92_v2, %v37_v18  ;;  %v26_v31 = vld [vmem:[%s197_s0 + $0x60] sm:$0xff]  ;;  %v55_v34 = vadd.f32 %v92_v2, %v38_v22 }
   0x7   :  { %v52_v21 = vadd.f32 %v92_v2, %v35_v11  ;;  %v61_v25 = vmax.f32 %v48_v15, 0.0  ;;  %v62_v26 = vmax.f32 %v49_v16, 0.0  ;;  %v63_v32 = vmax.f32 %v50_v19, 0.0 }
   0x8   :  { %v64_v33 = vmax.f32 %v51_v20, 0.0  ;;  %v39_v36 = vmul.f32 %v91_v1, %v22_v23  ;;  %v40_v37 = vmul.f32 %v91_v1, %v23_v24  ;;  %v66_v38 = vmax.f32 %v53_v27, 0.0 }
   0x9   :  { %74 = vst [vmem:[%s200_s3] sm:$0xff] %v61_v25  ;;  %v65_v35 = vmax.f32 %v52_v21, 0.0  ;;  %v41_v39 = vmul.f32 %v91_v1, %v24_v29  ;;  %v42_v40 = vmul.f32 %v91_v1, %v25_v30  ;;  %v43_v41 = vmul.f32 %v91_v1, %v26_v31 }
   0xa   :  { %75 = vst [vmem:[%s200_s3 + $0x8] sm:$0xff] %v62_v26  ;;  %v67_v42 = vmax.f32 %v54_v28, 0.0  ;;  %v56_v43 = vadd.f32 %v92_v2, %v39_v36  ;;  %v57_v44 = vadd.f32 %v92_v2, %v40_v37  ;;  %v68_v45 = vmax.f32 %v55_v34, 0.0 }
   0xb   :  { %76 = vst [vmem:[%s200_s3 + $0x10] sm:$0xff] %v63_v32  ;;  %v58_v46 = vadd.f32 %v92_v2, %v41_v39  ;;  %v59_v47 = vadd.f32 %v92_v2, %v42_v40  ;;  %v60_v49 = vadd.f32 %v92_v2, %v43_v41 }
   0xc   :  { %77 = vst [vmem:[%s200_s3 + $0x18] sm:$0xff] %v64_v33  ;;  %v69_v48 = vmax.f32 %v56_v43, 0.0  ;;  %v70_v50 = vmax.f32 %v57_v44, 0.0 }
   0xd   :  { %78 = vst [vmem:[%s200_s3 + $0x20] sm:$0xff] %v65_v35  ;;  %v71_v51 = vmax.f32 %v58_v46, 0.0  ;;  %v72_v52 = vmax.f32 %v59_v47, 0.0  ;;  %v73_v53 = vmax.f32 %v60_v49, 0.0 }
   0xe   :  { %79 = vst [vmem:[%s200_s3 + $0x28] sm:$0xff] %v66_v38 }
   0xf   :  { %80 = vst [vmem:[%s200_s3 + $0x30] sm:$0xff] %v67_v42 }
  0x10   :  { %81 = vst [vmem:[%s200_s3 + $0x38] sm:$0xff] %v68_v45 }
  0x11   :  { %82 = vst [vmem:[%s200_s3 + $0x40] sm:$0xff] %v69_v48 }
  0x12   :  { %83 = vst [vmem:[%s200_s3 + $0x48] sm:$0xff] %v70_v50 }
  0x13   :  { %84 = vst [vmem:[%s200_s3 + $0x50] sm:$0xff] %v71_v51 }
  0x14   :  { %85 = vst [vmem:[%s200_s3 + $0x58] sm:$0xff] %v72_v52 }
  0x15   :  { %86 = vst [vmem:[%s200_s3 + $0x60] sm:$0xff] %v73_v53 }

// kernel: context_net_forward.8
= control target key start
LH: loop header
LB: loop body
LE: loop exit
PB: predicated region body
PF: predicated region fallthrough
CT: control target
= control target key end

     0   :  { %vm508_vm0 = vcmask 523264   ;;  %vm807_vm1 = vcmask 1040384   ;;  %s1576_s1 = inlined_call_operand.vmem [shape: bf16[576,128], index: 1, kind: input, shape index: {}]   ;;  %s1577_s0 = inlined_call_operand.vmem [shape: bf16[104,576], index: 0, kind: input, shape index: {}]   ;;  %s1578_s2 = inlined_call_operand.vmem [shape: f32[104,128], index: 2, kind: output, shape index: {0}]   ;;  %s1579_s3 = inlined_call_operand.vmem [shape: f32[1,2,128], index: 3, kind: output, shape index: {1}]  }
   0x1   :  { %v1126_v0 = vld [vmem:[%s1576_s1 + $0x38] sm:$0xff]  ;;  %v1125_v1 = vld [vmem:[%s1576_s1 + $0x30] sm:$0xff]  ;;  %v1124_v2 = vld [vmem:[%s1576_s1 + $0x28] sm:$0xff] }
   0x2   :  { %1155 = vmatpush.bf16.msra.mxu1 %v1126_v0  ;;  %1156 = vmatpush.bf16.msra.mxu2 %v1126_v0  ;;  %v1123_v3 = vld [vmem:[%s1576_s1 + $0x20] sm:$0xff]  ;;  %v1122_v4 = vld [vmem:[%s1576_s1 + $0x18] sm:$0xff]  ;;  %v1121_v5 = vld [vmem:[%s1576_s1 + $0x10] sm:$0xff] }
   0x3   :  { %1157 = vmatpush.bf16.msra.mxu3 %v1126_v0  ;;  %530 = vmatpush.bf16.msra.mxu0 %v1126_v0  ;;  %v1120_v6 = vld [vmem:[%s1576_s1 + $0x8] sm:$0xff]  ;;  %v1223_v7 = vld [vmem:[%s1577_s0 + $0xf0] sm:$0xff]  ;;  %v1119_v8 = vld [vmem:[%s1576_s1] sm:$0xff] }
   0x4   :  { %v860_v9 = vld [vmem:[%s1577_s0 + $0x50] sm:$0xf]  ;;  %v1101_v10 = vld [vmem:[%s1577_s0 + $0x60] sm:$0xf0]  ;;  %v900_v11 = vld [vmem:[%s1577_s0 + $0xa0] sm:$0xf]  ;;  %v224_v15 = vunpack.c.l.b16 %v1223_v7 }
   0x5   :  { %v1111_v12 = vld [vmem:[%s1577_s0 + $0xb0] sm:$0xf0]  ;;  %v820_v13 = vld [vmem:[%s1577_s0] sm:$0xf]  ;;  %v1150_v16 = vld [vmem:[%s1576_s1 + $0xf8] sm:$0xff]  ;;  %v861_v18 = vor.u32 %v1101_v10, %v860_v9 }
   0x6   :  { %1158 = vmatpush.bf16.msra.mxu1 %v1125_v1  ;;  %1159 = vmatpush.bf16.msra.mxu2 %v1125_v1  ;;  %v1091_v14 = vld [vmem:[%s1577_s0 + $0x10] sm:$0xf0]  ;;  %v1142_v17 = vld [vmem:[%s1576_s1 + $0xb8] sm:$0xff]  ;;  %v901_v19 = vor.u32 %v1111_v12, %v900_v11  ;;  %v259_v22 = vpack.c.b16 %v224_v15, %v224_v15  ;;  %v1148_v28 = vld [vmem:[%s1576_s1 + $0xe8] sm:$0xff] }
   0x7   :  { %1160 = vmatpush.bf16.msra.mxu3 %v1125_v1  ;;  %531 = vmatpush.bf16.msra.mxu0 %v1125_v1  ;;  %v1134_v20 = vld [vmem:[%s1576_s1 + $0x78] sm:$0xff]  ;;  %v821_v21 = vor.u32 %v1091_v14, %v820_v13  ;;  %v1149_v24 = vld [vmem:[%s1576_s1 + $0xf0] sm:$0xff]  ;;  %v1140_v29 = vld [vmem:[%s1576_s1 + $0xa8] sm:$0xff] }
   0x8   :  { %v1154_v23 = vld [vmem:[%s1576_s1 + $0x118] sm:$0xff]  ;;  %v1141_v25 = vld [vmem:[%s1576_s1 + $0xb0] sm:$0xff]  ;;  %v1132_v30 = vld [vmem:[%s1576_s1 + $0x68] sm:$0xff] }
   0x9   :  { %v1133_v26 = vld [vmem:[%s1576_s1 + $0x70] sm:$0xff]  ;;  %v1152_v31 = vld [vmem:[%s1576_s1 + $0x108] sm:$0xff]  ;;  %v1147_v32 = vld [vmem:[%s1576_s1 + $0xe0] sm:$0xff] }
   0xa   :  { %1161 = vmatpush.bf16.msra.mxu1 %v1124_v2  ;;  %1162 = vmatpush.bf16.msra.mxu2 %v1124_v2  ;;  %v1153_v27 = vld [vmem:[%s1576_s1 + $0x110] sm:$0xff]  ;;  %v1139_v33 = vld [vmem:[%s1576_s1 + $0xa0] sm:$0xff]  ;;  %v880_v35 = vld [vmem:[%s1577_s0 + $0x78] sm:$0xf] }
   0xb   :  { %1163 = vmatpush.bf16.msra.mxu3 %v1124_v2  ;;  %532 = vmatpush.bf16.msra.mxu0 %v1124_v2  ;;  %v1131_v34 = vld [vmem:[%s1576_s1 + $0x60] sm:$0xff]  ;;  %v1106_v36 = vld [vmem:[%s1577_s0 + $0x88] sm:$0xf0]  ;;  %v920_v37 = vld [vmem:[%s1577_s0 + $0xc8] sm:$0xf] }
   0xc   :  { %v1116_v38 = vld [vmem:[%s1577_s0 + $0xd8] sm:$0xf0]  ;;  %v840_v39 = vld [vmem:[%s1577_s0 + $0x28] sm:$0xf]  ;;  %v1151_v41 = vld [vmem:[%s1576_s1 + $0x100] sm:$0xff]  ;;  %v881_v44 = vor.u32 %v1106_v36, %v880_v35 }
   0xd   :  { %v1096_v40 = vld [vmem:[%s1577_s0 + $0x38] sm:$0xf0]  ;;  %v921_v45 = vor.u32 %v1116_v38, %v920_v37  ;;  %v1145_v48 = vld [vmem:[%s1576_s1 + $0xd0] sm:$0xff]  ;;  %v1144_v51 = vld [vmem:[%s1576_s1 + $0xc8] sm:$0xff] }
   0xe   :  { %1164 = vmatpush.bf16.msra.mxu1 %v1123_v3  ;;  %1165 = vmatpush.bf16.msra.mxu2 %v1123_v3  ;;  %v1146_v42 = vld [vmem:[%s1576_s1 + $0xd8] sm:$0xff]  ;;  %v841_v47 = vor.u32 %v1096_v40, %v840_v39  ;;  %v1137_v49 = vld [vmem:[%s1576_s1 + $0x90] sm:$0xff]  ;;  %v1136_v52 = vld [vmem:[%s1576_s1 + $0x88] sm:$0xff] }
   0xf   :  { %1166 = vmatpush.bf16.msra.mxu3 %v1123_v3  ;;  %533 = vmatpush.bf16.msra.mxu0 %v1123_v3  ;;  %v1138_v43 = vld [vmem:[%s1576_s1 + $0x98] sm:$0xff]  ;;  %v1129_v50 = vld [vmem:[%s1576_s1 + $0x50] sm:$0xff]  ;;  %v1128_v53 = vld [vmem:[%s1576_s1 + $0x48] sm:$0xff] }
  0x10   :  { %v1130_v46 = vld [vmem:[%s1576_s1 + $0x58] sm:$0xff]  ;;  %v1143_v54 = vld [vmem:[%s1576_s1 + $0xc0] sm:$0xff]  ;;  %v1090_v56 = vld [vmem:[%s1577_s0 + $0xc] sm:$0xf] }
  0x11   :  { %v1135_v55 = vld [vmem:[%s1576_s1 + $0x80] sm:$0xff]  ;;  %v822_v60 = vld [vmem:[%s1577_s0 + $0x14] sm:$0xf0]  ;;  %v828_v61 = vld [vmem:[%s1577_s0 + $0x8] sm:$0xf] }
  0x12   :  { %1167 = vmatpush.bf16.msra.mxu1 %v1122_v4  ;;  %1168 = vmatpush.bf16.msra.mxu2 %v1122_v4  ;;  %v830_v57 = vld [vmem:[%s1577_s0 + $0x1c] sm:$0xf0]  ;;  %v1089_v59 = vld [vmem:[%s1577_s0 + $0x4] sm:$0xf]  ;;  %v1092_v62 = vld [vmem:[%s1577_s0 + $0x18] sm:$0xf0] }
  0x13   :  { %1169 = vmatpush.bf16.msra.mxu3 %v1122_v4  ;;  %534 = vmatpush.bf16.msra.mxu0 %v1122_v4  ;;  %v1127_v58 = vld [vmem:[%s1576_s1 + $0x40] sm:$0xff]  ;;  %v833_v63 = vor.u32 %v1090_v56, %v830_v57  ;;  %v836_v0 = vld [vmem:[%s1577_s0 + $0x10] sm:$0xf]  ;;  %v825_v2 = vor.u32 %v1089_v59, %v822_v60  ;;  %v829_v3 = vor.u32 %v1092_v62, %v828_v61  ;;  %v856_v13 = vld [vmem:[%s1577_s0 + $0x38] sm:$0xf] }
  0x14   :  { %v1093_v1 = vld [vmem:[%s1577_s0 + $0x20] sm:$0xf0]  ;;  %v842_v9 = vld [vmem:[%s1577_s0 + $0x3c] sm:$0xf0]  ;;  %v848_v10 = vld [vmem:[%s1577_s0 + $0x30] sm:$0xf] }
  0x15   :  { %v837_v4 = vor.u32 %v1093_v1, %v836_v0  ;;  %v1097_v11 = vld [vmem:[%s1577_s0 + $0x40] sm:$0xf0]  ;;  %v1098_v14 = vld [vmem:[%s1577_s0 + $0x48] sm:$0xf0]  ;;  %v1107_v35 = vld [vmem:[%s1577_s0 + $0x90] sm:$0xf0] }
  0x16   :  { %1170 = vmatpush.bf16.msra.mxu1 %v1121_v5  ;;  %1171 = vmatpush.bf16.msra.mxu2 %v1121_v5  ;;  %v896_v37 = vld [vmem:[%s1577_s0 + $0x88] sm:$0xf]  ;;  %v1108_v38 = vld [vmem:[%s1577_s0 + $0x98] sm:$0xf0]  ;;  %v1114_v56 = vld [vmem:[%s1577_s0 + $0xcc] sm:$0xf] }
  0x17   :  { %1172 = vmatpush.bf16.msra.mxu3 %v1121_v5  ;;  %535 = vmatpush.bf16.msra.mxu0 %v1121_v5  ;;  %v1095_v5 = vld [vmem:[%s1577_s0 + $0x34] sm:$0xf]  ;;  %v922_v57 = vld [vmem:[%s1577_s0 + $0xdc] sm:$0xf0]  ;;  %v1117_v59 = vld [vmem:[%s1577_s0 + $0xe0] sm:$0xf0] }
  0x18   :  { %v936_v61 = vld [vmem:[%s1577_s0 + $0xd8] sm:$0xf]  ;;  %v1118_v62 = vld [vmem:[%s1577_s0 + $0xe8] sm:$0xf0] }
  0x19   :  { %v937_v1 = vor.u32 %v1118_v62, %v936_v61 }
  0x1a   :  { %1173 = vmatpush.bf16.msra.mxu1 %v1120_v6  ;;  %1174 = vmatpush.bf16.msra.mxu2 %v1120_v6 }
  0x1b   :  { %1175 = vmatpush.bf16.msra.mxu3 %v1120_v6  ;;  %536 = vmatpush.bf16.msra.mxu0 %v1120_v6  ;;  %v850_v6 = vld [vmem:[%s1577_s0 + $0x44] sm:$0xf0] }
  0x1c   :  { %v853_v12 = vor.u32 %v1095_v5, %v850_v6  ;;  %v225_v5 = vunpack.c.h.b16 %v1223_v7 }
  0x1e   :  { %1176 = vmatpush.bf16.msra.mxu1 %v1119_v8  ;;  %1177 = vmatpush.bf16.msra.mxu2 %v1119_v8 }
  0x1f   :  { %1178 = vmatpush.bf16.msra.mxu3 %v1119_v8  ;;  %537 = vmatpush.bf16.msra.mxu0 %v1119_v8  ;;  %v1094_v8 = vld [vmem:[%s1577_s0 + $0x2c] sm:$0xf] }
  0x20   :  { %v845_v15 = vor.u32 %v1094_v8, %v842_v9 }
  0x21   :  { %548 = vmatmul.bf16.vlgmr.msra.gmra.mxu1 %v861_v18  ;;  %558 = vmatmul.bf16.vlgmr.msra.gmra.mxu2 %v901_v19  ;;  %v1100_v18 = vld [vmem:[%s1577_s0 + $0x5c] sm:$0xf]  ;;  %v870_v19 = vld [vmem:[%s1577_s0 + $0x6c] sm:$0xf0] }
  0x22   :  { %616 = vmatpush.bf16.msrb.mxu2 %v1142_v17  ;;  %573 = vmatpush.bf16.msrb.mxu1 %v1134_v20  ;;  %v857_v17 = vor.u32 %v1098_v14, %v856_v13  ;;  %v1099_v20 = vld [vmem:[%s1577_s0 + $0x54] sm:$0xf] }
  0x23   :  { %659 = vmatpush.bf16.msrb.mxu3 %v1150_v16  ;;  %538 = vmatmul.bf16.vlgmr.msra.gmra.mxu0 %v821_v21  ;;  %v849_v16 = vor.u32 %v1097_v11, %v848_v10  ;;  %v862_v21 = vld [vmem:[%s1577_s0 + $0x64] sm:$0xf0]  ;;  %v260_v10 = vpack.c.b16 %v225_v5, %v225_v5 }
  0x24   :  { %568 = vmatmul.bf16.vlgmr.msra.gmra.mxu3 %v259_v22  ;;  %706 = vmatpush.bf16.msrb.mxu0 %v1154_v23  ;;  %v868_v22 = vld [vmem:[%s1577_s0 + $0x58] sm:$0xf]  ;;  %v1102_v23 = vld [vmem:[%s1577_s0 + $0x68] sm:$0xf0] }
  0x26   :  { %617 = vmatpush.bf16.msrb.mxu2 %v1141_v25  ;;  %574 = vmatpush.bf16.msrb.mxu1 %v1133_v26  ;;  %v876_v25 = vld [vmem:[%s1577_s0 + $0x60] sm:$0xf]  ;;  %v1103_v26 = vld [vmem:[%s1577_s0 + $0x70] sm:$0xf0] }
  0x27   :  { %660 = vmatpush.bf16.msrb.mxu3 %v1149_v24  ;;  %v873_v24 = vor.u32 %v1100_v18, %v870_v19 }
  0x28   :  { %707 = vmatpush.bf16.msrb.mxu0 %v1153_v27  ;;  %v865_v27 = vor.u32 %v1099_v20, %v862_v21 }
  0x2a   :  { %618 = vmatpush.bf16.msrb.mxu2 %v1140_v29  ;;  %575 = vmatpush.bf16.msrb.mxu1 %v1132_v30  ;;  %v877_v29 = vor.u32 %v1103_v26, %v876_v25  ;;  %v1105_v30 = vld [vmem:[%s1577_s0 + $0x84] sm:$0xf] }
  0x2b   :  { %661 = vmatpush.bf16.msrb.mxu3 %v1148_v28  ;;  %v869_v28 = vor.u32 %v1102_v23, %v868_v22 }
  0x2c   :  { %708 = vmatpush.bf16.msrb.mxu0 %v1152_v31  ;;  %v890_v31 = vld [vmem:[%s1577_s0 + $0x94] sm:$0xf0] }
  0x2d   :  { %v893_v36 = vor.u32 %v1105_v30, %v890_v31 }
  0x2e   :  { %619 = vmatpush.bf16.msrb.mxu2 %v1139_v33  ;;  %576 = vmatpush.bf16.msrb.mxu1 %v1131_v34  ;;  %v882_v33 = vld [vmem:[%s1577_s0 + $0x8c] sm:$0xf0]  ;;  %v888_v34 = vld [vmem:[%s1577_s0 + $0x80] sm:$0xf] }
  0x2f   :  { %662 = vmatpush.bf16.msrb.mxu3 %v1147_v32  ;;  %v1104_v32 = vld [vmem:[%s1577_s0 + $0x7c] sm:$0xf]  ;;  %v889_v40 = vor.u32 %v1107_v35, %v888_v34 }
  0x30   :  { %709 = vmatpush.bf16.msrb.mxu0 %v1151_v41  ;;  %v885_v39 = vor.u32 %v1104_v32, %v882_v33  ;;  %v897_v41 = vor.u32 %v1108_v38, %v896_v37 }
  0x31   :  { %553 = vmatmul.bf16.gmra.mxu1 %v881_v44  ;;  %563 = vmatmul.bf16.gmra.mxu2 %v921_v45  ;;  %v1109_v44 = vld [vmem:[%s1577_s0 + $0xa4] sm:$0xf]  ;;  %v902_v45 = vld [vmem:[%s1577_s0 + $0xb4] sm:$0xf0] }
  0x32   :  { %620 = vmatpush.bf16.msrb.mxu2 %v1138_v43  ;;  %577 = vmatpush.bf16.msrb.mxu1 %v1130_v46  ;;  %v910_v43 = vld [vmem:[%s1577_s0 + $0xbc] sm:$0xf0]  ;;  %v908_v46 = vld [vmem:[%s1577_s0 + $0xa8] sm:$0xf] }
  0x33   :  { %663 = vmatpush.bf16.msrb.mxu3 %v1146_v42  ;;  %543 = vmatmul.bf16.gmra.mxu0 %v841_v47  ;;  %v1110_v42 = vld [vmem:[%s1577_s0 + $0xac] sm:$0xf]  ;;  %v1112_v47 = vld [vmem:[%s1577_s0 + $0xb8] sm:$0xf0] }
  0x36   :  { %621 = vmatpush.bf16.msrb.mxu2 %v1137_v49  ;;  %578 = vmatpush.bf16.msrb.mxu1 %v1129_v50  ;;  %v916_v49 = vld [vmem:[%s1577_s0 + $0xb0] sm:$0xf]  ;;  %v1113_v50 = vld [vmem:[%s1577_s0 + $0xc0] sm:$0xf0] }
  0x37   :  { %664 = vmatpush.bf16.msrb.mxu3 %v1145_v48  ;;  %v913_v48 = vor.u32 %v1110_v42, %v910_v43 }
  0x3a   :  { %622 = vmatpush.bf16.msrb.mxu2 %v1136_v52  ;;  %579 = vmatpush.bf16.msrb.mxu1 %v1128_v53  ;;  %v909_v52 = vor.u32 %v1112_v47, %v908_v46  ;;  %v917_v53 = vor.u32 %v1113_v50, %v916_v49 }
  0x3b   :  { %665 = vmatpush.bf16.msrb.mxu3 %v1144_v51  ;;  %v905_v51 = vor.u32 %v1109_v44, %v902_v45 }
  0x3e   :  { %623 = vmatpush.bf16.msrb.mxu2 %v1135_v55  ;;  %580 = vmatpush.bf16.msrb.mxu1 %v1127_v58  ;;  %v930_v55 = vld [vmem:[%s1577_s0 + $0xe4] sm:$0xf0]  ;;  %v928_v58 = vld [vmem:[%s1577_s0 + $0xd0] sm:$0xf] }
  0x3f   :  { %666 = vmatpush.bf16.msrb.mxu3 %v1143_v54  ;;  %v1115_v54 = vld [vmem:[%s1577_s0 + $0xd4] sm:$0xf]  ;;  %v929_v0 = vor.u32 %v1117_v59, %v928_v58 }
  0x40   :  { %v933_v60 = vor.u32 %v1115_v54, %v930_v55 }
  0x41   :  { %581 = vmatmul.bf16.vlgmr.msrb.gmra.mxu1 %v825_v2  ;;  %624 = vmatmul.bf16.vlgmr.msrb.gmra.mxu2 %v829_v3  ;;  %v51_v2 = vld [vmem:[%s1577_s0 + $0xf8] sm:$0xff] }
  0x42   :  { %667 = vmatmul.bf16.vlgmr.msrb.gmra.mxu3 %v833_v63  ;;  %v925_v63 = vor.u32 %v1114_v56, %v922_v57  ;;  %v227_v3 = vunpack.c.h.b16 %v51_v2  ;;  %v226_v6 = vunpack.c.l.b16 %v51_v2 }
  0x43   :  { %1082 = vmatmul.msk.bf16.vlgmr.msrb.gmra.mxu0 %vm508_vm0, %v837_v4  ;;  %v52_v4 = vld [vmem:[%s1577_s0 + $0x100] sm:$0xf] }
  0x44   :  { %v228_v8 = vunpack.c.l.b16 %v52_v4  ;;  %v262_v9 = vpack.c.b16 %v227_v3, %v227_v3  ;;  %v261_v11 = vpack.c.b16 %v226_v6, %v226_v6 }
  0x46   :  { %v263_v13 = vpack.c.b16 %v228_v8, %v228_v8 }
  0x51   :  { %586 = vmatmul.bf16.gmra.mxu1 %v845_v15  ;;  %629 = vmatmul.bf16.gmra.mxu2 %v849_v16 }
  0x52   :  { %672 = vmatmul.bf16.gmra.mxu3 %v853_v12 }
  0x53   :  { %1083 = vmatmul.msk.bf16.gmra.mxu0 %vm508_vm0, %v857_v17 }
  0x61   :  { %591 = vmatmul.bf16.gmra.mxu1 %v865_v27  ;;  %634 = vmatmul.bf16.gmra.mxu2 %v869_v28 }
  0x62   :  { %677 = vmatmul.bf16.gmra.mxu3 %v873_v24 }
  0x63   :  { %1084 = vmatmul.msk.bf16.gmra.mxu0 %vm508_vm0, %v877_v29 }
  0x71   :  { %596 = vmatmul.bf16.gmra.mxu1 %v885_v39  ;;  %639 = vmatmul.bf16.gmra.mxu2 %v889_v40 }
  0x72   :  { %682 = vmatmul.bf16.gmra.mxu3 %v893_v36 }
  0x73   :  { %1085 = vmatmul.msk.bf16.gmra.mxu0 %vm508_vm0, %v897_v41 }
  0x81   :  { %601 = vmatmul.bf16.gmra.mxu1 %v905_v51  ;;  %644 = vmatmul.bf16.gmra.mxu2 %v909_v52 }
  0x82   :  { %687 = vmatmul.bf16.gmra.mxu3 %v913_v48 }
  0x83   :  { %1086 = vmatmul.msk.bf16.gmra.mxu0 %vm508_vm0, %v917_v53 }
  0x91   :  { %606 = vmatmul.bf16.gmra.mxu1 %v925_v63  ;;  %649 = vmatmul.bf16.gmra.mxu2 %v929_v0 }
  0x92   :  { %692 = vmatmul.bf16.gmra.mxu3 %v933_v60 }
  0x93   :  { %1087 = vmatmul.msk.bf16.gmra.mxu0 %vm508_vm0, %v937_v1 }
  0x9e   :  { %v1506_v12 = vpop.f32.mrf.mxu1 }
  0xa0   :  { %v539_v14 = vpop.f32.mrf.mxu0 }
  0xa1   :  { %611 = vmatmul.bf16.gmra.mxu1 %v260_v10  ;;  %654 = vmatmul.bf16.gmra.mxu2 %v261_v11 }
  0xa2   :  { %697 = vmatmul.bf16.gmra.mxu3 %v262_v9 }
  0xa3   :  { %1088 = vmatmul.msk.bf16.gmra.mxu0 %vm508_vm0, %v263_v13 }
  0xa4   :  { %v1509_v15 = vpop.f32.mrf.mxu2 }
  0xa6   :  { %v1511_v16 = vpop.f32.mrf.mxu1 }
  0xa7   :  { %v1513_v17 = vpop.f32.mrf.mxu3 }
  0xa8   :  { %v541_v7 = vpop.f32.mrf.mxu0 }
  0xac   :  { %v1515_v18 = vpop.f32.mrf.mxu2 }
  0xae   :  { %v1517_v19 = vpop.f32.mrf.mxu1 }
  0xaf   :  { %v571_v20 = vpop.f32.mrf.mxu3 }
  0xb0   :  { %v544_v21 = vpop.f32.mrf.mxu0 }
  0xb4   :  { %v1519_v22 = vpop.f32.mrf.mxu2 }
  0xb6   :  { %v1521_v23 = vpop.f32.mrf.mxu1 }
  0xb8   :  { %v546_v24 = vpop.f32.mrf.mxu0 }
  0xbc   :  { %v1523_v25 = vpop.f32.mrf.mxu2 }
  0xbe   :  { %v582_v26 = vpop.f32.mrf.mxu1 }
  0xbf   :  { %v583_v29 = vadd.f32 %v582_v26, %v539_v14 }
  0xc0   :  { %v711_v27 = vpop.f32.mrf.mxu0 }
  0xc4   :  { %v625_v30 = vpop.f32.mrf.mxu2 }
  0xc5   :  { %v668_v28 = vpop.f32.mrf.mxu3  ;;  %v626_v31 = vadd.f32 %v625_v30, %v583_v29 }
  0xc6   :  { %v584_v32 = vpop.f32.mrf.mxu1 }
  0xc7   :  { %v669_v33 = vadd.f32 %v668_v28, %v626_v31  ;;  %v585_v37 = vadd.f32 %v584_v32, %v541_v7 }
  0xc8   :  { %v713_v34 = vpop.f32.mrf.mxu0 }
  0xc9   :  { %v712_v35 = vadd.f32 %v711_v27, %v669_v33 }
  0xcb   :  { %745 = vst [vmem:[%s1578_s2] sm:$0xff] %v712_v35  ;;  %v776_v45 = vmul.f32 %v712_v35, %v712_v35 }
  0xcc   :  { %v627_v38 = vpop.f32.mrf.mxu2 }
  0xcd   :  { %v670_v36 = vpop.f32.mrf.mxu3  ;;  %v628_v39 = vadd.f32 %v627_v38, %v585_v37 }
  0xce   :  { %v587_v40 = vpop.f32.mrf.mxu1 }
  0xcf   :  { %v671_v41 = vadd.f32 %v670_v36, %v628_v39  ;;  %v588_v48 = vadd.f32 %v587_v40, %v544_v21 }
  0xd0   :  { %v716_v42 = vpop.f32.mrf.mxu0 }
  0xd1   :  { %v714_v43 = vadd.f32 %v713_v34, %v671_v41 }
  0xd3   :  { %746 = vst [vmem:[%s1578_s2 + $0x8] sm:$0xff] %v714_v43  ;;  %v758_v46 = vadd.f32 %v714_v43, %v712_v35  ;;  %v777_v47 = vmul.f32 %v714_v43, %v714_v43 }
  0xd4   :  { %v630_v49 = vpop.f32.mrf.mxu2 }
  0xd5   :  { %v673_v44 = vpop.f32.mrf.mxu3  ;;  %v789_v50 = vadd.f32 %v777_v47, %v776_v45  ;;  %v631_v51 = vadd.f32 %v630_v49, %v588_v48 }
  0xd6   :  { %v589_v52 = vpop.f32.mrf.mxu1 }
  0xd7   :  { %v674_v53 = vadd.f32 %v673_v44, %v631_v51  ;;  %v590_v57 = vadd.f32 %v589_v52, %v546_v24 }
  0xd8   :  { %v718_v54 = vpop.f32.mrf.mxu0 }
  0xd9   :  { %v717_v55 = vadd.f32 %v716_v42, %v674_v53 }
  0xdb   :  { %747 = vst [vmem:[%s1578_s2 + $0x10] sm:$0xff] %v717_v55  ;;  %v778_v3 = vmul.f32 %v717_v55, %v717_v55  ;;  %v759_v6 = vadd.f32 %v758_v46, %v717_v55 }
  0xdc   :  { %v632_v58 = vpop.f32.mrf.mxu2 }
  0xdd   :  { %v675_v56 = vpop.f32.mrf.mxu3  ;;  %v633_v59 = vadd.f32 %v632_v58, %v590_v57  ;;  %v790_v11 = vadd.f32 %v789_v50, %v778_v3 }
  0xde   :  { %v592_v60 = vpop.f32.mrf.mxu1 }
  0xdf   :  { %v676_v61 = vadd.f32 %v675_v56, %v633_v59  ;;  %v593_v1 = vadd.f32 %v592_v60, %v1506_v12 }
  0xe0   :  { %v721_v62 = vpop.f32.mrf.mxu0 }
  0xe1   :  { %v719_v63 = vadd.f32 %v718_v54, %v676_v61 }
  0xe3   :  { %748 = vst [vmem:[%s1578_s2 + $0x18] sm:$0xff] %v719_v63  ;;  %v779_v8 = vmul.f32 %v719_v63, %v719_v63  ;;  %v760_v13 = vadd.f32 %v759_v6, %v719_v63 }
  0xe4   :  { %v635_v2 = vpop.f32.mrf.mxu2 }
  0xe5   :  { %v678_v0 = vpop.f32.mrf.mxu3  ;;  %v636_v4 = vadd.f32 %v635_v2, %v593_v1  ;;  %v791_v20 = vadd.f32 %v790_v11, %v779_v8 }
  0xe6   :  { %v594_v5 = vpop.f32.mrf.mxu1 }
  0xe7   :  { %v679_v9 = vadd.f32 %v678_v0, %v636_v4  ;;  %v595_v12 = vadd.f32 %v594_v5, %v1511_v16 }
  0xe8   :  { %v723_v10 = vpop.f32.mrf.mxu0 }
  0xe9   :  { %v722_v14 = vadd.f32 %v721_v62, %v679_v9 }
  0xeb   :  { %749 = vst [vmem:[%s1578_s2 + $0x20] sm:$0xff] %v722_v14  ;;  %v761_v21 = vadd.f32 %v760_v13, %v722_v14  ;;  %v780_v24 = vmul.f32 %v722_v14, %v722_v14 }
  0xec   :  { %v637_v26 = vpop.f32.mrf.mxu2 }
  0xed   :  { %v680_v7 = vpop.f32.mrf.mxu3  ;;  %v792_v27 = vadd.f32 %v791_v20, %v780_v24  ;;  %v638_v28 = vadd.f32 %v637_v26, %v595_v12 }
  0xee   :  { %v597_v29 = vpop.f32.mrf.mxu1 }
  0xef   :  { %v681_v30 = vadd.f32 %v680_v7, %v638_v28  ;;  %v598_v36 = vadd.f32 %v597_v29, %v1517_v19 }
  0xf0   :  { %v726_v31 = vpop.f32.mrf.mxu0 }
  0xf1   :  { %v724_v32 = vadd.f32 %v723_v10, %v681_v30 }
  0xf3   :  { %750 = vst [vmem:[%s1578_s2 + $0x28] sm:$0xff] %v724_v32  ;;  %v762_v34 = vadd.f32 %v761_v21, %v724_v32  ;;  %v781_v35 = vmul.f32 %v724_v32, %v724_v32 }
  0xf4   :  { %v640_v37 = vpop.f32.mrf.mxu2 }
  0xf5   :  { %v683_v33 = vpop.f32.mrf.mxu3  ;;  %v793_v38 = vadd.f32 %v792_v27, %v781_v35  ;;  %v641_v39 = vadd.f32 %v640_v37, %v598_v36 }
  0xf6   :  { %v599_v16 = vpop.f32.mrf.mxu1 }
  0xf7   :  { %v684_v40 = vadd.f32 %v683_v33, %v641_v39  ;;  %v600_v46 = vadd.f32 %v599_v16, %v1521_v23 }
  0xf8   :  { %v728_v41 = vpop.f32.mrf.mxu0 }
  0xf9   :  { %v727_v42 = vadd.f32 %v726_v31, %v684_v40 }
  0xfb   :  { %751 = vst [vmem:[%s1578_s2 + $0x30] sm:$0xff] %v727_v42  ;;  %v763_v44 = vadd.f32 %v762_v34, %v727_v42  ;;  %v782_v45 = vmul.f32 %v727_v42, %v727_v42 }
  0xfc   :  { %v642_v47 = vpop.f32.mrf.mxu2 }
  0xfd   :  { %v685_v43 = vpop.f32.mrf.mxu3  ;;  %v794_v48 = vadd.f32 %v793_v38, %v782_v45  ;;  %v643_v49 = vadd.f32 %v642_v47, %v600_v46 }
  0xfe   :  { %v602_v19 = vpop.f32.mrf.mxu1 }
  0xff   :  { %v686_v50 = vadd.f32 %v685_v43, %v643_v49  ;;  %v603_v56 = vadd.f32 %v602_v19, %v1509_v15 }
 0x100   :  { %v731_v51 = vpop.f32.mrf.mxu0 }
 0x101   :  { %v729_v52 = vadd.f32 %v728_v41, %v686_v50 }
 0x103   :  { %752 = vst [vmem:[%s1578_s2 + $0x38] sm:$0xff] %v729_v52  ;;  %v764_v54 = vadd.f32 %v763_v44, %v729_v52  ;;  %v783_v55 = vmul.f32 %v729_v52, %v729_v52 }
 0x104   :  { %v645_v57 = vpop.f32.mrf.mxu2 }
 0x105   :  { %v688_v53 = vpop.f32.mrf.mxu3  ;;  %v795_v58 = vadd.f32 %v794_v48, %v783_v55  ;;  %v646_v59 = vadd.f32 %v645_v57, %v603_v56 }
 0x106   :  { %v604_v23 = vpop.f32.mrf.mxu1 }
 0x107   :  { %v689_v60 = vadd.f32 %v688_v53, %v646_v59  ;;  %v605_v0 = vadd.f32 %v604_v23, %v1515_v18 }
 0x108   :  { %v733_v61 = vpop.f32.mrf.mxu0 }
 0x109   :  { %v732_v62 = vadd.f32 %v731_v51, %v689_v60 }
 0x10b   :  { %753 = vst [vmem:[%s1578_s2 + $0x40] sm:$0xff] %v732_v62  ;;  %v784_v28 = vmul.f32 %v732_v62, %v732_v62  ;;  %v765_v30 = vadd.f32 %v764_v54, %v732_v62 }
 0x10c   :  { %v647_v1 = vpop.f32.mrf.mxu2 }
 0x10d   :  { %v690_v63 = vpop.f32.mrf.mxu3  ;;  %v648_v2 = vadd.f32 %v647_v1, %v605_v0  ;;  %v796_v34 = vadd.f32 %v795_v58, %v784_v28 }
 0x10e   :  { %v607_v3 = vpop.f32.mrf.mxu1 }
 0x10f   :  { %v691_v4 = vadd.f32 %v690_v63, %v648_v2  ;;  %v608_v8 = vadd.f32 %v607_v3, %v1519_v22 }
 0x110   :  { %v736_v5 = vpop.f32.mrf.mxu0 }
 0x111   :  { %v734_v15 = vadd.f32 %v733_v61, %v691_v4 }
 0x113   :  { %754 = vst [vmem:[%s1578_s2 + $0x48] sm:$0xff] %v734_v15  ;;  %v785_v31 = vmul.f32 %v734_v15, %v734_v15  ;;  %v766_v35 = vadd.f32 %v765_v30, %v734_v15 }
 0x114   :  { %v650_v9 = vpop.f32.mrf.mxu2 }
 0x115   :  { %v693_v6 = vpop.f32.mrf.mxu3  ;;  %v651_v10 = vadd.f32 %v650_v9, %v608_v8  ;;  %v797_v38 = vadd.f32 %v796_v34, %v785_v31 }
 0x116   :  { %v609_v11 = vpop.f32.mrf.mxu1 }
 0x117   :  { %v694_v13 = vadd.f32 %v693_v6, %v651_v10  ;;  %v610_v20 = vadd.f32 %v609_v11, %v1523_v25 }
 0x118   :  { %v738_v14 = vpop.f32.mrf.mxu0 }
 0x119   :  { %v737_v7 = vadd.f32 %v736_v5, %v694_v13 }
 0x11b   :  { %755 = vst [vmem:[%s1578_s2 + $0x50] sm:$0xff] %v737_v7  ;;  %v786_v25 = vmul.f32 %v737_v7, %v737_v7  ;;  %v767_v39 = vadd.f32 %v766_v35, %v737_v7 }
 0x11c   :  { %v652_v21 = vpop.f32.mrf.mxu2 }
 0x11d   :  { %v695_v18 = vpop.f32.mrf.mxu3  ;;  %v653_v24 = vadd.f32 %v652_v21, %v610_v20  ;;  %v798_v42 = vadd.f32 %v797_v38, %v786_v25 }
 0x11e   :  { %v612_v12 = vpop.f32.mrf.mxu1 }
 0x11f   :  { %v696_v26 = vadd.f32 %v695_v18, %v653_v24  ;;  %v613_v32 = vadd.f32 %v612_v12, %v1513_v17 }
 0x120   :  { %v741_v27 = vpop.f32.mrf.mxu0 }
 0x121   :  { %v739_v22 = vadd.f32 %v738_v14, %v696_v26 }
 0x123   :  { %756 = vst [vmem:[%s1578_s2 + $0x58] sm:$0xff] %v739_v22  ;;  %v787_v16 = vmul.f32 %v739_v22, %v739_v22  ;;  %v768_v43 = vadd.f32 %v767_v39, %v739_v22 }
 0x124   :  { %v655_v33 = vpop.f32.mrf.mxu2 }
 0x125   :  { %v698_v29 = vpop.f32.mrf.mxu3  ;;  %v656_v36 = vadd.f32 %v655_v33, %v613_v32  ;;  %v799_v46 = vadd.f32 %v798_v42, %v787_v16 }
 0x126   :  { %v614_v37 = vpop.f32.mrf.mxu1 }
 0x127   :  { %v699_v40 = vadd.f32 %v698_v29, %v656_v36 }
 0x128   :  { %v743_v41 = vpop.f32.mrf.mxu0 }
 0x129   :  { %v742_v44 = vadd.f32 %v741_v27, %v699_v40 }
 0x12b   :  { %757 = vst [vmem:[%s1578_s2 + $0x60] sm:$0xff] %v742_v44  ;;  %v769_v17 = vadd.f32 %v768_v43, %v742_v44  ;;  %v788_v47 = vmul.f32 %v742_v44, %v742_v44 }
 0x12c   :  { %v657_v48 = vpop.f32.mrf.mxu2 }
 0x12d   :  { %v700_v45 = vpop.f32.mrf.mxu3  ;;  %v770_v49 = vrot.slane %v769_v17, 4  ;;  %v800_v19 = vadd.f32 %v799_v46, %v788_v47 }
 0x12f   :  { %v771_v50 = vadd.f32 %v770_v49, %v769_v17  ;;  %v801_v51 = vrot.slane %v800_v19, 4 }
 0x131   :  { %v772_v52 = vrot.slane %v771_v50, 2  ;;  %v802_v53 = vadd.f32 %v801_v51, %v800_v19 }
 0x133   :  { %v773_v54 = vadd.f32 %v772_v52, %v771_v50  ;;  %v803_v55 = vrot.slane %v802_v53, 2 }
 0x135   :  { %v774_v56 = vrot.slane %v773_v54, 1  ;;  %v804_v57 = vadd.f32 %v803_v55, %v802_v53 }
 0x137   :  { %v805_v58 = vrot.slane %v804_v57, 1  ;;  %v775_v59 = vadd.f32 %v774_v56, %v773_v54 }
 0x139   :  { %v806_v23 = vadd.f32 %v805_v58, %v804_v57 }
 0x13b   :  { %v808_v60 = vsel %vm807_vm1, %v775_v59, %v806_v23 }
 0x13c   :  { %809 = vst [vmem:[%s1579_s3] sm:$0x3] %v808_v60 }

// kernel: context_net_forward.11
= control target key start
LH: loop header
LB: loop body
LE: loop exit
PB: predicated region body
PF: predicated region fallthrough
CT: control target
= control target key end

     0   :  { %s122_s0 = inlined_call_operand.vmem [shape: f32[24,256], index: 0, kind: input, shape index: {}]   ;;  %s123_s1 = inlined_call_operand.vmem [shape: f32[1,256], index: 1, kind: input, shape index: {}]   ;;  %s124_s2 = inlined_call_operand.vmem [shape: f32[1,256], index: 2, kind: input, shape index: {}]   ;;  %s125_s3 = inlined_call_operand.vmem [shape: f32[24,256], index: 3, kind: output, shape index: {}]  }
   0x1   :  { %v14_v0 = vld [vmem:[%s122_s0] sm:$0xff]  ;;  %v15_v5 = vld [vmem:[%s122_s0 + $0x8] sm:$0xff]  ;;  %v16_v8 = vld [vmem:[%s122_s0 + $0x10] sm:$0xff] }
   0x2   :  { %v20_v1 = vld [vmem:[%s123_s1] sm:$0x3]  ;;  %v17_v9 = vld [vmem:[%s122_s0 + $0x18] sm:$0xff]  ;;  %v19_v11 = vld [vmem:[%s122_s0 + $0x28] sm:$0xff] }
   0x3   :  { %v32_v2 = vld [vmem:[%s124_s2] sm:$0x3]  ;;  %v22_v3 = vperm.slane %v20_v1, 0  ;;  %v23_v6 = vperm.slane %v20_v1, 1 }
   0x4   :  { %v34_v4 = vperm.slane %v32_v2, 0  ;;  %v35_v7 = vperm.slane %v32_v2, 1  ;;  %v18_v10 = vld [vmem:[%s122_s0 + $0x20] sm:$0xff] }
   0x5   :  { %v26_v12 = vmul.f32 %v22_v3, %v14_v0  ;;  %v27_v13 = vmul.f32 %v23_v6, %v15_v5  ;;  %v28_v14 = vmul.f32 %v22_v3, %v16_v8  ;;  %v29_v15 = vmul.f32 %v23_v6, %v17_v9 }
   0x6   :  { %v30_v16 = vmul.f32 %v22_v3, %v18_v10  ;;  %v31_v17 = vmul.f32 %v23_v6, %v19_v11 }
   0x7   :  { %v38_v18 = vadd.f32 %v34_v4, %v26_v12  ;;  %v39_v19 = vadd.f32 %v35_v7, %v27_v13  ;;  %v40_v20 = vadd.f32 %v34_v4, %v28_v14  ;;  %v41_v21 = vadd.f32 %v35_v7, %v29_v15 }
   0x8   :  { %v42_v22 = vadd.f32 %v34_v4, %v30_v16  ;;  %v43_v23 = vadd.f32 %v35_v7, %v31_v17 }
   0x9   :  { %v44_v24 = vmax.f32 %v38_v18, 0.0  ;;  %v45_v25 = vmax.f32 %v39_v19, 0.0  ;;  %v46_v26 = vmax.f32 %v40_v20, 0.0  ;;  %v47_v27 = vmax.f32 %v41_v21, 0.0 }
   0xa   :  { %v48_v28 = vmax.f32 %v42_v22, 0.0  ;;  %v49_v29 = vmax.f32 %v43_v23, 0.0 }
   0xb   :  { %50 = vst [vmem:[%s125_s3] sm:$0xff] %v44_v24 }
   0xc   :  { %51 = vst [vmem:[%s125_s3 + $0x8] sm:$0xff] %v45_v25 }
   0xd   :  { %52 = vst [vmem:[%s125_s3 + $0x10] sm:$0xff] %v46_v26 }
   0xe   :  { %53 = vst [vmem:[%s125_s3 + $0x18] sm:$0xff] %v47_v27 }
   0xf   :  { %54 = vst [vmem:[%s125_s3 + $0x20] sm:$0xff] %v48_v28 }
  0x10   :  { %55 = vst [vmem:[%s125_s3 + $0x28] sm:$0xff] %v49_v29 }

// kernel: context_net_forward.10
= control target key start
LH: loop header
LB: loop body
LE: loop exit
PB: predicated region body
PF: predicated region fallthrough
CT: control target
= control target key end

     0   :  { %vm1338_vm0 = vcmask 1040384   ;;  %vm1344_vm1 = vcmask 1041408   ;;  %s3188_s1 = inlined_call_operand.vmem [shape: bf16[1152,256], index: 1, kind: input, shape index: {}]   ;;  %s3189_s0 = inlined_call_operand.vmem [shape: bf16[24,1152], index: 0, kind: input, shape index: {}]   ;;  %s3190_s2 = inlined_call_operand.vmem [shape: f32[24,256], index: 2, kind: output, shape index: {0}]   ;;  %s3191_s3 = inlined_call_operand.vmem [shape: f32[1,2,256], index: 3, kind: output, shape index: {1}]  }
   0x1   :  { %v1450_v0 = vld [vmem:[%s3188_s1 + $0x70] sm:$0xf]  ;;  %v1992_v1 = vld [vmem:[%s3188_s1 + $0x74] sm:$0xf0]  ;;  %v1442_v11 = vld [vmem:[%s3188_s1 + $0x60] sm:$0xf] }
   0x2   :  { %v1514_v2 = vld [vmem:[%s3188_s1 + $0xf0] sm:$0xf]  ;;  %v1451_v3 = vor.u32 %v1992_v1, %v1450_v0  ;;  %v2008_v4 = vld [vmem:[%s3188_s1 + $0xf4] sm:$0xf0]  ;;  %v1990_v13 = vld [vmem:[%s3188_s1 + $0x64] sm:$0xf0] }
   0x3   :  { %v1578_v5 = vld [vmem:[%s3188_s1 + $0x170] sm:$0xf]  ;;  %v2024_v6 = vld [vmem:[%s3188_s1 + $0x174] sm:$0xf0]  ;;  %v1515_v7 = vor.u32 %v2008_v4, %v1514_v2  ;;  %v1506_v14 = vld [vmem:[%s3188_s1 + $0xe0] sm:$0xf]  ;;  %v1443_v16 = vor.u32 %v1990_v13, %v1442_v11 }
   0x4   :  { %v1579_v8 = vor.u32 %v2024_v6, %v1578_v5  ;;  %v1642_v9 = vld [vmem:[%s3188_s1 + $0x1f0] sm:$0xf]  ;;  %v2040_v10 = vld [vmem:[%s3188_s1 + $0x1f4] sm:$0xf0]  ;;  %970 = vmatpush.bf16.msra.mxu0 %v1451_v3  ;;  %v2006_v15 = vld [vmem:[%s3188_s1 + $0xe4] sm:$0xf0] }
   0x5   :  { %v1643_v12 = vor.u32 %v2040_v10, %v1642_v9  ;;  %988 = vmatpush.bf16.msra.mxu1 %v1515_v7  ;;  %v1507_v17 = vor.u32 %v2006_v15, %v1506_v14  ;;  %v1570_v18 = vld [vmem:[%s3188_s1 + $0x160] sm:$0xf]  ;;  %v2022_v19 = vld [vmem:[%s3188_s1 + $0x164] sm:$0xf0]  ;;  %v1434_v23 = vld [vmem:[%s3188_s1 + $0x50] sm:$0xf] }
   0x6   :  { %1006 = vmatpush.bf16.msra.mxu2 %v1579_v8  ;;  %v1634_v20 = vld [vmem:[%s3188_s1 + $0x1e0] sm:$0xf]  ;;  %v1571_v21 = vor.u32 %v2022_v19, %v1570_v18  ;;  %v2038_v22 = vld [vmem:[%s3188_s1 + $0x1e4] sm:$0xf0]  ;;  %v1988_v24 = vld [vmem:[%s3188_s1 + $0x54] sm:$0xf0] }
   0x7   :  { %1024 = vmatpush.bf16.msra.mxu3 %v1643_v12  ;;  %v1635_v25 = vor.u32 %v2038_v22, %v1634_v20  ;;  %v1498_v26 = vld [vmem:[%s3188_s1 + $0xd0] sm:$0xf]  ;;  %v2004_v27 = vld [vmem:[%s3188_s1 + $0xd4] sm:$0xf0]  ;;  %v1435_v29 = vor.u32 %v1988_v24, %v1434_v23  ;;  %v1426_v35 = vld [vmem:[%s3188_s1 + $0x40] sm:$0xf] }
   0x8   :  { %v1562_v28 = vld [vmem:[%s3188_s1 + $0x150] sm:$0xf]  ;;  %971 = vmatpush.bf16.msra.mxu0 %v1443_v16  ;;  %v2020_v30 = vld [vmem:[%s3188_s1 + $0x154] sm:$0xf0]  ;;  %v1499_v33 = vor.u32 %v2004_v27, %v1498_v26  ;;  %v1986_v36 = vld [vmem:[%s3188_s1 + $0x44] sm:$0xf0] }
   0x9   :  { %v1626_v31 = vld [vmem:[%s3188_s1 + $0x1d0] sm:$0xf]  ;;  %v2036_v32 = vld [vmem:[%s3188_s1 + $0x1d4] sm:$0xf0]  ;;  %989 = vmatpush.bf16.msra.mxu1 %v1507_v17  ;;  %v1563_v34 = vor.u32 %v2020_v30, %v1562_v28  ;;  %v1490_v37 = vld [vmem:[%s3188_s1 + $0xc0] sm:$0xf]  ;;  %v1427_v44 = vor.u32 %v1986_v36, %v1426_v35 }
   0xa   :  { %1007 = vmatpush.bf16.msra.mxu2 %v1571_v21  ;;  %v1627_v38 = vor.u32 %v2036_v32, %v1626_v31  ;;  %v2002_v39 = vld [vmem:[%s3188_s1 + $0xc4] sm:$0xf0]  ;;  %v1554_v40 = vld [vmem:[%s3188_s1 + $0x140] sm:$0xf]  ;;  %v1418_v47 = vld [vmem:[%s3188_s1 + $0x30] sm:$0xf] }
   0xb   :  { %1025 = vmatpush.bf16.msra.mxu3 %v1635_v25  ;;  %v2018_v41 = vld [vmem:[%s3188_s1 + $0x144] sm:$0xf0]  ;;  %v1618_v42 = vld [vmem:[%s3188_s1 + $0x1c0] sm:$0xf]  ;;  %v1491_v45 = vor.u32 %v2002_v39, %v1490_v37  ;;  %v1984_v48 = vld [vmem:[%s3188_s1 + $0x34] sm:$0xf0] }
   0xc   :  { %v2034_v43 = vld [vmem:[%s3188_s1 + $0x1c4] sm:$0xf0]  ;;  %972 = vmatpush.bf16.msra.mxu0 %v1435_v29  ;;  %v1555_v46 = vor.u32 %v2018_v41, %v1554_v40  ;;  %v1482_v49 = vld [vmem:[%s3188_s1 + $0xb0] sm:$0xf]  ;;  %v2000_v51 = vld [vmem:[%s3188_s1 + $0xb4] sm:$0xf0]  ;;  %v1419_v56 = vor.u32 %v1984_v48, %v1418_v47 }
   0xd   :  { %990 = vmatpush.bf16.msra.mxu1 %v1499_v33  ;;  %v1619_v50 = vor.u32 %v2034_v43, %v1618_v42  ;;  %v1546_v52 = vld [vmem:[%s3188_s1 + $0x130] sm:$0xf]  ;;  %v2016_v53 = vld [vmem:[%s3188_s1 + $0x134] sm:$0xf0]  ;;  %v1483_v57 = vor.u32 %v2000_v51, %v1482_v49  ;;  %v1410_v59 = vld [vmem:[%s3188_s1 + $0x20] sm:$0xf] }
   0xe   :  { %1008 = vmatpush.bf16.msra.mxu2 %v1563_v34  ;;  %v1610_v54 = vld [vmem:[%s3188_s1 + $0x1b0] sm:$0xf]  ;;  %v2032_v55 = vld [vmem:[%s3188_s1 + $0x1b4] sm:$0xf0]  ;;  %v1547_v58 = vor.u32 %v2016_v53, %v1546_v52  ;;  %v1982_v60 = vld [vmem:[%s3188_s1 + $0x24] sm:$0xf0] }
   0xf   :  { %1026 = vmatpush.bf16.msra.mxu3 %v1627_v38  ;;  %v1474_v61 = vld [vmem:[%s3188_s1 + $0xa0] sm:$0xf]  ;;  %v1611_v62 = vor.u32 %v2032_v55, %v1610_v54  ;;  %v1998_v63 = vld [vmem:[%s3188_s1 + $0xa4] sm:$0xf0]  ;;  %v1411_v4 = vor.u32 %v1982_v60, %v1410_v59  ;;  %v1402_v7 = vld [vmem:[%s3188_s1 + $0x10] sm:$0xf] }
  0x10   :  { %973 = vmatpush.bf16.msra.mxu0 %v1427_v44  ;;  %v1538_v0 = vld [vmem:[%s3188_s1 + $0x120] sm:$0xf]  ;;  %v2014_v1 = vld [vmem:[%s3188_s1 + $0x124] sm:$0xf0]  ;;  %v1475_v5 = vor.u32 %v1998_v63, %v1474_v61  ;;  %v1980_v8 = vld [vmem:[%s3188_s1 + $0x14] sm:$0xf0] }
  0x11   :  { %991 = vmatpush.bf16.msra.mxu1 %v1491_v45  ;;  %v1602_v2 = vld [vmem:[%s3188_s1 + $0x1a0] sm:$0xf]  ;;  %v2030_v3 = vld [vmem:[%s3188_s1 + $0x1a4] sm:$0xf0]  ;;  %v1539_v6 = vor.u32 %v2014_v1, %v1538_v0  ;;  %v1466_v9 = vld [vmem:[%s3188_s1 + $0x90] sm:$0xf]  ;;  %v1403_v17 = vor.u32 %v1980_v8, %v1402_v7 }
  0x12   :  { %1009 = vmatpush.bf16.msra.mxu2 %v1555_v46  ;;  %v1603_v10 = vor.u32 %v2030_v3, %v1602_v2  ;;  %v1996_v11 = vld [vmem:[%s3188_s1 + $0x94] sm:$0xf0]  ;;  %v1530_v12 = vld [vmem:[%s3188_s1 + $0x110] sm:$0xf]  ;;  %v1394_v16 = vld [vmem:[%s3188_s1] sm:$0xf] }
  0x13   :  { %1027 = vmatpush.bf16.msra.mxu3 %v1619_v50  ;;  %v2012_v13 = vld [vmem:[%s3188_s1 + $0x114] sm:$0xf0]  ;;  %v1594_v14 = vld [vmem:[%s3188_s1 + $0x190] sm:$0xf]  ;;  %v1978_v18 = vld [vmem:[%s3188_s1 + $0x4] sm:$0xf0]  ;;  %v1467_v21 = vor.u32 %v1996_v11, %v1466_v9 }
  0x14   :  { %974 = vmatpush.bf16.msra.mxu0 %v1419_v56  ;;  %v2028_v15 = vld [vmem:[%s3188_s1 + $0x194] sm:$0xf0]  ;;  %v1458_v19 = vld [vmem:[%s3188_s1 + $0x80] sm:$0xf]  ;;  %v1994_v20 = vld [vmem:[%s3188_s1 + $0x84] sm:$0xf0]  ;;  %v1531_v22 = vor.u32 %v2012_v13, %v1530_v12  ;;  %v1395_v34 = vor.u32 %v1978_v18, %v1394_v16 }
  0x15   :  { %992 = vmatpush.bf16.msra.mxu1 %v1483_v57  ;;  %v1522_v23 = vld [vmem:[%s3188_s1 + $0x100] sm:$0xf]  ;;  %v2010_v24 = vld [vmem:[%s3188_s1 + $0x104] sm:$0xf0]  ;;  %v1595_v26 = vor.u32 %v2028_v15, %v1594_v14  ;;  %v1972_v29 = vld [vmem:[%s3189_s0 + $0x20] sm:$0xf0]  ;;  %v1459_v38 = vor.u32 %v1994_v20, %v1458_v19 }
  0x16   :  { %1010 = vmatpush.bf16.msra.mxu2 %v1547_v58  ;;  %v1586_v25 = vld [vmem:[%s3188_s1 + $0x180] sm:$0xf]  ;;  %v2026_v27 = vld [vmem:[%s3188_s1 + $0x184] sm:$0xf0]  ;;  %v1968_v30 = vld [vmem:[%s3189_s0 + $0x4] sm:$0xf]  ;;  %v1523_v39 = vor.u32 %v2010_v24, %v1522_v23 }
  0x17   :  { %1028 = vmatpush.bf16.msra.mxu3 %v1611_v62  ;;  %v1358_v28 = vld [vmem:[%s3189_s0] sm:$0xf]  ;;  %v1360_v31 = vld [vmem:[%s3189_s0 + $0x24] sm:$0xf0]  ;;  %v1706_v32 = vld [vmem:[%s3188_s1 + $0x270] sm:$0xf]  ;;  %v1587_v43 = vor.u32 %v2026_v27, %v1586_v25 }
  0x18   :  { %975 = vmatpush.bf16.msra.mxu0 %v1411_v4  ;;  %v2056_v33 = vld [vmem:[%s3188_s1 + $0x274] sm:$0xf0]  ;;  %v1366_v35 = vld [vmem:[%s3189_s0 + $0x8] sm:$0xf]  ;;  %v1770_v36 = vld [vmem:[%s3188_s1 + $0x2f0] sm:$0xf]  ;;  %v2394_v48 = vor.u32 %v1972_v29, %v1358_v28  ;;  %v2405_v53 = vor.u32 %v1968_v30, %v1360_v31 }
  0x19   :  { %993 = vmatpush.bf16.msra.mxu1 %v1475_v5  ;;  %v2072_v37 = vld [vmem:[%s3188_s1 + $0x2f4] sm:$0xf0]  ;;  %v1973_v40 = vld [vmem:[%s3189_s0 + $0x28] sm:$0xf0]  ;;  %v1368_v42 = vld [vmem:[%s3189_s0 + $0x2c] sm:$0xf0]  ;;  %v1707_v44 = vor.u32 %v2056_v33, %v1706_v32 }
  0x1a   :  { %1011 = vmatpush.bf16.msra.mxu2 %v1539_v6  ;;  %v1969_v41 = vld [vmem:[%s3189_s0 + $0xc] sm:$0xf]  ;;  %v1834_v45 = vld [vmem:[%s3188_s1 + $0x370] sm:$0xf]  ;;  %v2088_v46 = vld [vmem:[%s3188_s1 + $0x374] sm:$0xf0]  ;;  %v1771_v49 = vor.u32 %v2072_v37, %v1770_v36  ;;  %v2407_v54 = vor.u32 %v1973_v40, %v1366_v35 }
  0x1b   :  { %1029 = vmatpush.bf16.msra.mxu3 %v1603_v10  ;;  %v1898_v47 = vld [vmem:[%s3188_s1 + $0x3f0] sm:$0xf]  ;;  %v2104_v50 = vld [vmem:[%s3188_s1 + $0x3f4] sm:$0xf0]  ;;  %v1698_v51 = vld [vmem:[%s3188_s1 + $0x260] sm:$0xf]  ;;  %v2415_v57 = vor.u32 %v1969_v41, %v1368_v42  ;;  %v1835_v58 = vor.u32 %v2088_v46, %v1834_v45 }
  0x1c   :  { %976 = vmatpush.bf16.msra.mxu0 %v1403_v17  ;;  %v2054_v52 = vld [vmem:[%s3188_s1 + $0x264] sm:$0xf0]  ;;  %v1762_v55 = vld [vmem:[%s3188_s1 + $0x2e0] sm:$0xf]  ;;  %v1899_v59 = vor.u32 %v2104_v50, %v1898_v47  ;;  %v1690_v2 = vld [vmem:[%s3188_s1 + $0x250] sm:$0xf] }
  0x1d   :  { %994 = vmatpush.bf16.msra.mxu1 %v1467_v21  ;;  %v2070_v56 = vld [vmem:[%s3188_s1 + $0x2e4] sm:$0xf0]  ;;  %v1699_v60 = vor.u32 %v2054_v52, %v1698_v51  ;;  %v1826_v61 = vld [vmem:[%s3188_s1 + $0x360] sm:$0xf]  ;;  %v2052_v3 = vld [vmem:[%s3188_s1 + $0x254] sm:$0xf0] }
  0x1e   :  { %1012 = vmatpush.bf16.msra.mxu2 %v1531_v22  ;;  %v2086_v62 = vld [vmem:[%s3188_s1 + $0x364] sm:$0xf0]  ;;  %v1890_v63 = vld [vmem:[%s3188_s1 + $0x3e0] sm:$0xf]  ;;  %v1763_v0 = vor.u32 %v2070_v56, %v1762_v55  ;;  %v1754_v4 = vld [vmem:[%s3188_s1 + $0x2d0] sm:$0xf]  ;;  %v1691_v8 = vor.u32 %v2052_v3, %v1690_v2 }
  0x1f   :  { %1030 = vmatpush.bf16.msra.mxu3 %v1595_v26  ;;  %v2102_v1 = vld [vmem:[%s3188_s1 + $0x3e4] sm:$0xf0]  ;;  %v2068_v5 = vld [vmem:[%s3188_s1 + $0x2d4] sm:$0xf0]  ;;  %v1827_v6 = vor.u32 %v2086_v62, %v1826_v61  ;;  %v1818_v9 = vld [vmem:[%s3188_s1 + $0x350] sm:$0xf] }
  0x20   :  { %977 = vmatpush.bf16.msra.mxu0 %v1395_v34  ;;  %v1891_v7 = vor.u32 %v2102_v1, %v1890_v63  ;;  %v2084_v10 = vld [vmem:[%s3188_s1 + $0x354] sm:$0xf0]  ;;  %v1882_v11 = vld [vmem:[%s3188_s1 + $0x3d0] sm:$0xf]  ;;  %v1755_v12 = vor.u32 %v2068_v5, %v1754_v4  ;;  %v1682_v14 = vld [vmem:[%s3188_s1 + $0x240] sm:$0xf] }
  0x21   :  { %995 = vmatpush.bf16.msra.mxu1 %v1459_v38  ;;  %v2100_v13 = vld [vmem:[%s3188_s1 + $0x3d4] sm:$0xf0]  ;;  %v2050_v15 = vld [vmem:[%s3188_s1 + $0x244] sm:$0xf0]  ;;  %v1746_v16 = vld [vmem:[%s3188_s1 + $0x2c0] sm:$0xf]  ;;  %v1819_v19 = vor.u32 %v2084_v10, %v1818_v9 }
  0x22   :  { %1013 = vmatpush.bf16.msra.mxu2 %v1523_v39  ;;  %v2066_v17 = vld [vmem:[%s3188_s1 + $0x2c4] sm:$0xf0]  ;;  %v24_v20 = vld [vmem:[%s3189_s0 + $0x50] sm:$0xff]  ;;  %v1883_v21 = vor.u32 %v2100_v13, %v1882_v11  ;;  %v1683_v22 = vor.u32 %v2050_v15, %v1682_v14  ;;  %v1810_v23 = vld [vmem:[%s3188_s1 + $0x340] sm:$0xf] }
  0x23   :  { %1031 = vmatpush.bf16.msra.mxu3 %v1587_v43  ;;  %978 = vmatmul.bf16.vlgmr.msra.gmra.mxu0 %v2394_v48  ;;  %v23_v18 = vld [vmem:[%s3189_s0 + $0x48] sm:$0xff]  ;;  %v1874_v25 = vld [vmem:[%s3188_s1 + $0x3c0] sm:$0xf]  ;;  %v1747_v26 = vor.u32 %v2066_v17, %v1746_v16  ;;  %v1674_v29 = vld [vmem:[%s3188_s1 + $0x230] sm:$0xf]  ;;  %v207_v32 = vunpack.c.l.b16 %v24_v20  ;;  %v208_v36 = vunpack.c.h.b16 %v24_v20 }
  0x24   :  { %1042 = vmatpush.bf16.msrb.mxu0 %v1707_v44  ;;  %996 = vmatmul.bf16.vlgmr.msra.gmra.mxu1 %v2405_v53  ;;  %v2082_v24 = vld [vmem:[%s3188_s1 + $0x344] sm:$0xf0]  ;;  %v205_v28 = vunpack.c.l.b16 %v23_v18  ;;  %v2048_v30 = vld [vmem:[%s3188_s1 + $0x234] sm:$0xf0]  ;;  %v206_v31 = vunpack.c.h.b16 %v23_v18  ;;  %v1738_v33 = vld [vmem:[%s3188_s1 + $0x2b0] sm:$0xf] }
  0x25   :  { %1060 = vmatpush.bf16.msrb.mxu1 %v1771_v49  ;;  %1014 = vmatmul.bf16.vlgmr.msra.gmra.mxu2 %v2407_v54  ;;  %v2098_v27 = vld [vmem:[%s3188_s1 + $0x3c4] sm:$0xf0]  ;;  %v2064_v34 = vld [vmem:[%s3188_s1 + $0x2b4] sm:$0xf0]  ;;  %v1811_v35 = vor.u32 %v2082_v24, %v1810_v23  ;;  %v1675_v38 = vor.u32 %v2048_v30, %v1674_v29  ;;  %v1802_v39 = vld [vmem:[%s3188_s1 + $0x330] sm:$0xf]  ;;  %v2521_v49 = vpack.c.b16 %v207_v32, %v207_v32 }
  0x26   :  { %1032 = vmatmul.bf16.vlgmr.msra.gmra.mxu3 %v2415_v57  ;;  %1078 = vmatpush.bf16.msrb.mxu2 %v1835_v58  ;;  %v1875_v37 = vor.u32 %v2098_v27, %v1874_v25  ;;  %v2080_v40 = vld [vmem:[%s3188_s1 + $0x334] sm:$0xf0]  ;;  %v1866_v41 = vld [vmem:[%s3188_s1 + $0x3b0] sm:$0xf]  ;;  %v2508_v42 = vpack.c.b16 %v205_v28, %v205_v28  ;;  %v1739_v43 = vor.u32 %v2064_v34, %v1738_v33  ;;  %v1666_v45 = vld [vmem:[%s3188_s1 + $0x220] sm:$0xf] }
  0x27   :  { %1096 = vmatpush.bf16.msrb.mxu3 %v1899_v59  ;;  %v2096_v44 = vld [vmem:[%s3188_s1 + $0x3b4] sm:$0xf0]  ;;  %v2046_v46 = vld [vmem:[%s3188_s1 + $0x224] sm:$0xf0]  ;;  %v2519_v47 = vpack.c.b16 %v206_v31, %v206_v31  ;;  %v1730_v50 = vld [vmem:[%s3188_s1 + $0x2a0] sm:$0xf]  ;;  %v2529_v52 = vpack.c.b16 %v208_v36, %v208_v36  ;;  %v1803_v55 = vor.u32 %v2080_v40, %v1802_v39 }
  0x28   :  { %1043 = vmatpush.bf16.msrb.mxu0 %v1699_v60  ;;  %v2062_v51 = vld [vmem:[%s3188_s1 + $0x2a4] sm:$0xf0]  ;;  %v1867_v56 = vor.u32 %v2096_v44, %v1866_v41  ;;  %v1667_v58 = vor.u32 %v2046_v46, %v1666_v45  ;;  %v1794_v59 = vld [vmem:[%s3188_s1 + $0x320] sm:$0xf]  ;;  %v2044_v1 = vld [vmem:[%s3188_s1 + $0x214] sm:$0xf0] }
  0x29   :  { %1061 = vmatpush.bf16.msrb.mxu1 %v1763_v0  ;;  %v2078_v60 = vld [vmem:[%s3188_s1 + $0x324] sm:$0xf0]  ;;  %v1858_v61 = vld [vmem:[%s3188_s1 + $0x3a0] sm:$0xf]  ;;  %v1731_v62 = vor.u32 %v2062_v51, %v1730_v50  ;;  %v1658_v0 = vld [vmem:[%s3188_s1 + $0x210] sm:$0xf] }
  0x2a   :  { %1079 = vmatpush.bf16.msrb.mxu2 %v1827_v6  ;;  %v2094_v63 = vld [vmem:[%s3188_s1 + $0x3a4] sm:$0xf0]  ;;  %v1722_v2 = vld [vmem:[%s3188_s1 + $0x290] sm:$0xf]  ;;  %v2060_v3 = vld [vmem:[%s3188_s1 + $0x294] sm:$0xf0]  ;;  %v1795_v4 = vor.u32 %v2078_v60, %v1794_v59 }
  0x2b   :  { %1097 = vmatpush.bf16.msrb.mxu3 %v1891_v7  ;;  %v1786_v5 = vld [vmem:[%s3188_s1 + $0x310] sm:$0xf]  ;;  %v2076_v6 = vld [vmem:[%s3188_s1 + $0x314] sm:$0xf0]  ;;  %v1859_v7 = vor.u32 %v2094_v63, %v1858_v61  ;;  %v1650_v11 = vld [vmem:[%s3188_s1 + $0x200] sm:$0xf] }
  0x2c   :  { %1044 = vmatpush.bf16.msrb.mxu0 %v1691_v8  ;;  %v1659_v8 = vor.u32 %v2044_v1, %v1658_v0  ;;  %v1850_v9 = vld [vmem:[%s3188_s1 + $0x390] sm:$0xf]  ;;  %v2092_v10 = vld [vmem:[%s3188_s1 + $0x394] sm:$0xf0]  ;;  %v2042_v13 = vld [vmem:[%s3188_s1 + $0x204] sm:$0xf0]  ;;  %v1787_v20 = vor.u32 %v2076_v6, %v1786_v5 }
  0x2d   :  { %1062 = vmatpush.bf16.msrb.mxu1 %v1755_v12  ;;  %v1723_v12 = vor.u32 %v2060_v3, %v1722_v2  ;;  %v1714_v14 = vld [vmem:[%s3188_s1 + $0x280] sm:$0xf]  ;;  %v2058_v15 = vld [vmem:[%s3188_s1 + $0x284] sm:$0xf0]  ;;  %v1962_v18 = vld [vmem:[%s3188_s1 + $0x470] sm:$0xf]  ;;  %v1851_v24 = vor.u32 %v2092_v10, %v1850_v9  ;;  %v1651_v25 = vor.u32 %v2042_v13, %v1650_v11 }
  0x2e   :  { %1080 = vmatpush.bf16.msrb.mxu2 %v1819_v19  ;;  %v1778_v16 = vld [vmem:[%s3188_s1 + $0x300] sm:$0xf]  ;;  %v2074_v17 = vld [vmem:[%s3188_s1 + $0x304] sm:$0xf0]  ;;  %v2120_v19 = vld [vmem:[%s3188_s1 + $0x474] sm:$0xf0]  ;;  %v1715_v29 = vor.u32 %v2058_v15, %v1714_v14 }
  0x2f   :  { %1098 = vmatpush.bf16.msrb.mxu3 %v1883_v21  ;;  %v1842_v21 = vld [vmem:[%s3188_s1 + $0x380] sm:$0xf]  ;;  %v1452_v23 = vld [vmem:[%s3188_s1 + $0x78] sm:$0xf0]  ;;  %v1374_v27 = vld [vmem:[%s3189_s0 + $0x10] sm:$0xf]  ;;  %v1963_v32 = vor.u32 %v2120_v19, %v1962_v18  ;;  %v1779_v39 = vor.u32 %v2074_v17, %v1778_v16 }
  0x30   :  { %1045 = vmatpush.bf16.msrb.mxu0 %v1683_v22  ;;  %v1991_v22 = vld [vmem:[%s3188_s1 + $0x74] sm:$0xf]  ;;  %v1376_v31 = vld [vmem:[%s3189_s0 + $0x34] sm:$0xf0]  ;;  %v1516_v34 = vld [vmem:[%s3188_s1 + $0xf8] sm:$0xf0] }
  0x31   :  { %1063 = vmatpush.bf16.msrb.mxu1 %v1747_v26  ;;  %v2090_v26 = vld [vmem:[%s3188_s1 + $0x384] sm:$0xf0]  ;;  %v1974_v28 = vld [vmem:[%s3189_s0 + $0x30] sm:$0xf0]  ;;  %v1455_v36 = vor.u32 %v1991_v22, %v1452_v23  ;;  %v1975_v40 = vld [vmem:[%s3189_s0 + $0x38] sm:$0xf0] }
  0x32   :  { %1081 = vmatpush.bf16.msrb.mxu2 %v1811_v35  ;;  %v1970_v30 = vld [vmem:[%s3189_s0 + $0x14] sm:$0xf]  ;;  %v1382_v35 = vld [vmem:[%s3189_s0 + $0x18] sm:$0xf]  ;;  %v1971_v41 = vld [vmem:[%s3189_s0 + $0x1c] sm:$0xf]  ;;  %v1843_v44 = vor.u32 %v2090_v26, %v1842_v21 }
  0x33   :  { %1099 = vmatpush.bf16.msrb.mxu3 %v1875_v37  ;;  %983 = vmatmul.bf16.gmra.mxu0 %v2508_v42  ;;  %v2007_v33 = vld [vmem:[%s3188_s1 + $0xf4] sm:$0xf]  ;;  %v1954_v46 = vld [vmem:[%s3188_s1 + $0x460] sm:$0xf]  ;;  %v2118_v50 = vld [vmem:[%s3188_s1 + $0x464] sm:$0xf0]  ;;  %v2663_v61 = vor.u32 %v1970_v30, %v1376_v31 }
  0x34   :  { %1046 = vmatpush.bf16.msrb.mxu0 %v1675_v38  ;;  %1001 = vmatmul.bf16.gmra.mxu1 %v2519_v47  ;;  %v2023_v37 = vld [vmem:[%s3188_s1 + $0x174] sm:$0xf]  ;;  %v1580_v38 = vld [vmem:[%s3188_s1 + $0x178] sm:$0xf0]  ;;  %v1519_v45 = vor.u32 %v2007_v33, %v1516_v34  ;;  %v1989_v51 = vld [vmem:[%s3188_s1 + $0x64] sm:$0xf]  ;;  %v1955_v2 = vor.u32 %v2118_v50, %v1954_v46 }
  0x35   :  { %1064 = vmatpush.bf16.msrb.mxu1 %v1739_v43  ;;  %1019 = vmatmul.bf16.gmra.mxu2 %v2521_v49  ;;  %v1384_v43 = vld [vmem:[%s3189_s0 + $0x3c] sm:$0xf0]  ;;  %v2005_v59 = vld [vmem:[%s3188_s1 + $0xe4] sm:$0xf]  ;;  %v1508_v60 = vld [vmem:[%s3188_s1 + $0xe8] sm:$0xf0] }
  0x36   :  { %1037 = vmatmul.bf16.gmra.mxu3 %v2529_v52  ;;  %1082 = vmatpush.bf16.msrb.mxu2 %v1803_v55  ;;  %v2652_v55 = vor.u32 %v1974_v28, %v1374_v27  ;;  %v2021_v63 = vld [vmem:[%s3188_s1 + $0x164] sm:$0xf]  ;;  %v1572_v0 = vld [vmem:[%s3188_s1 + $0x168] sm:$0xf0]  ;;  %v2673_v1 = vor.u32 %v1971_v41, %v1384_v43  ;;  %v1946_v5 = vld [vmem:[%s3188_s1 + $0x450] sm:$0xf] }
  0x37   :  { %1100 = vmatpush.bf16.msrb.mxu3 %v1867_v56  ;;  %v1583_v56 = vor.u32 %v2023_v37, %v1580_v38  ;;  %v2116_v6 = vld [vmem:[%s3188_s1 + $0x454] sm:$0xf0]  ;;  %v1436_v9 = vld [vmem:[%s3188_s1 + $0x58] sm:$0xf0]  ;;  %v2003_v10 = vld [vmem:[%s3188_s1 + $0xd4] sm:$0xf] }
  0x38   :  { %1047 = vmatpush.bf16.msrb.mxu0 %v1667_v58  ;;  %v1444_v58 = vld [vmem:[%s3188_s1 + $0x68] sm:$0xf0]  ;;  %v1500_v11 = vld [vmem:[%s3188_s1 + $0xd8] sm:$0xf0]  ;;  %v1947_v14 = vor.u32 %v2116_v6, %v1946_v5  ;;  %v1938_v17 = vld [vmem:[%s3188_s1 + $0x440] sm:$0xf] }
  0x39   :  { %1065 = vmatpush.bf16.msrb.mxu1 %v1731_v62  ;;  %v2665_v62 = vor.u32 %v1975_v40, %v1382_v35  ;;  %v1447_v3 = vor.u32 %v1989_v51, %v1444_v58  ;;  %v1564_v13 = vld [vmem:[%s3188_s1 + $0x158] sm:$0xf0]  ;;  %v1503_v16 = vor.u32 %v2003_v10, %v1500_v11  ;;  %v2114_v18 = vld [vmem:[%s3188_s1 + $0x444] sm:$0xf0]  ;;  %v1985_v19 = vld [vmem:[%s3188_s1 + $0x44] sm:$0xf] }
  0x3a   :  { %1083 = vmatpush.bf16.msrb.mxu2 %v1795_v4  ;;  %v1511_v4 = vor.u32 %v2005_v59, %v1508_v60  ;;  %v1428_v21 = vld [vmem:[%s3188_s1 + $0x48] sm:$0xf0]  ;;  %v2001_v22 = vld [vmem:[%s3188_s1 + $0xc4] sm:$0xf]  ;;  %v25_v26 = vld [vmem:[%s3189_s0 + $0x58] sm:$0xff]  ;;  %v1939_v27 = vor.u32 %v2114_v18, %v1938_v17 }
  0x3b   :  { %1101 = vmatpush.bf16.msrb.mxu3 %v1859_v7  ;;  %v1987_v7 = vld [vmem:[%s3188_s1 + $0x54] sm:$0xf]  ;;  %v1492_v23 = vld [vmem:[%s3188_s1 + $0xc8] sm:$0xf0]  ;;  %v26_v28 = vld [vmem:[%s3189_s0 + $0x60] sm:$0xff]  ;;  %v209_v35 = vunpack.c.l.b16 %v25_v26 }
  0x3c   :  { %1048 = vmatpush.bf16.msrb.mxu0 %v1659_v8  ;;  %v1575_v8 = vor.u32 %v2021_v63, %v1572_v0  ;;  %v1439_v15 = vor.u32 %v1987_v7, %v1436_v9  ;;  %v1495_v30 = vor.u32 %v2001_v22, %v1492_v23  ;;  %v1930_v31 = vld [vmem:[%s3188_s1 + $0x430] sm:$0xf]  ;;  %v1983_v33 = vld [vmem:[%s3188_s1 + $0x34] sm:$0xf]  ;;  %v1484_v38 = vld [vmem:[%s3188_s1 + $0xb8] sm:$0xf0]  ;;  %v211_v40 = vunpack.c.l.b16 %v26_v28 }
  0x3d   :  { %1066 = vmatpush.bf16.msrb.mxu1 %v1723_v12  ;;  %v2019_v12 = vld [vmem:[%s3188_s1 + $0x154] sm:$0xf]  ;;  %v1548_v43 = vld [vmem:[%s3188_s1 + $0x138] sm:$0xf0]  ;;  %v1922_v51 = vld [vmem:[%s3188_s1 + $0x420] sm:$0xf]  ;;  %v2766_v59 = vpack.c.b16 %v209_v35, %v209_v35 }
  0x3e   :  { %1084 = vmatpush.bf16.msrb.mxu2 %v1787_v20  ;;  %v1567_v20 = vor.u32 %v2019_v12, %v1564_v13  ;;  %v1999_v37 = vld [vmem:[%s3188_s1 + $0xb4] sm:$0xf]  ;;  %v1981_v58 = vld [vmem:[%s3188_s1 + $0x24] sm:$0xf]  ;;  %v1412_v63 = vld [vmem:[%s3188_s1 + $0x28] sm:$0xf0] }
  0x3f   :  { %1102 = vmatpush.bf16.msrb.mxu3 %v1851_v24  ;;  %v2017_v24 = vld [vmem:[%s3188_s1 + $0x144] sm:$0xf]  ;;  %v2015_v41 = vld [vmem:[%s3188_s1 + $0x134] sm:$0xf]  ;;  %v1487_v50 = vor.u32 %v1999_v37, %v1484_v38  ;;  %v1540_v6 = vld [vmem:[%s3188_s1 + $0x128] sm:$0xf0]  ;;  %v1415_v9 = vor.u32 %v1981_v58, %v1412_v63 }
  0x40   :  { %1049 = vmatpush.bf16.msrb.mxu0 %v1651_v25  ;;  %v1556_v25 = vld [vmem:[%s3188_s1 + $0x148] sm:$0xf0]  ;;  %v1551_v60 = vor.u32 %v2015_v41, %v1548_v43  ;;  %v1997_v0 = vld [vmem:[%s3188_s1 + $0xa4] sm:$0xf]  ;;  %v1914_v11 = vld [vmem:[%s3188_s1 + $0x410] sm:$0xf] }
  0x41   :  { %1067 = vmatpush.bf16.msrb.mxu1 %v1715_v29  ;;  %v1431_v29 = vor.u32 %v1985_v19, %v1428_v21  ;;  %v1559_v34 = vor.u32 %v2017_v24, %v1556_v25  ;;  %v2013_v5 = vld [vmem:[%s3188_s1 + $0x124] sm:$0xf]  ;;  %v2108_v12 = vld [vmem:[%s3188_s1 + $0x414] sm:$0xf0]  ;;  %v1979_v13 = vld [vmem:[%s3188_s1 + $0x14] sm:$0xf] }
  0x42   :  { %1085 = vmatpush.bf16.msrb.mxu2 %v1779_v39  ;;  %v210_v39 = vunpack.c.h.b16 %v25_v26  ;;  %v1468_v17 = vld [vmem:[%s3188_s1 + $0x98] sm:$0xf0]  ;;  %v2011_v18 = vld [vmem:[%s3188_s1 + $0x114] sm:$0xf]  ;;  %v1906_v21 = vld [vmem:[%s3188_s1 + $0x400] sm:$0xf] }
  0x43   :  { %1103 = vmatpush.bf16.msrb.mxu3 %v1843_v44  ;;  %1050 = vmatmul.bf16.vlgmr.msrb.gmra.mxu0 %v2652_v55  ;;  %v212_v44 = vunpack.c.h.b16 %v26_v28  ;;  %v1532_v19 = vld [vmem:[%s3188_s1 + $0x118] sm:$0xf0]  ;;  %v2106_v22 = vld [vmem:[%s3188_s1 + $0x404] sm:$0xf0]  ;;  %v1977_v25 = vld [vmem:[%s3188_s1 + $0x4] sm:$0xf] }
  0x44   :  { %1114 = vmatpush.bf16.msra.mxu0 %v1963_v32  ;;  %1068 = vmatmul.bf16.vlgmr.msrb.gmra.mxu1 %v2663_v61  ;;  %v2112_v32 = vld [vmem:[%s3188_s1 + $0x434] sm:$0xf0]  ;;  %v1396_v26 = vld [vmem:[%s3188_s1 + $0x8] sm:$0xf0]  ;;  %v1535_v28 = vor.u32 %v2011_v18, %v1532_v19  ;;  %v1907_v35 = vor.u32 %v2106_v22, %v1906_v21  ;;  %v2071_v37 = vld [vmem:[%s3188_s1 + $0x2f4] sm:$0xf] }
  0x45   :  { %1132 = vmatpush.bf16.msra.mxu1 %v1455_v36  ;;  %1086 = vmatmul.bf16.vlgmr.msrb.gmra.mxu2 %v2665_v62  ;;  %v1420_v36 = vld [vmem:[%s3188_s1 + $0x38] sm:$0xf0]  ;;  %v2787_v7 = vpack.c.b16 %v212_v44, %v212_v44  ;;  %v2087_v41 = vld [vmem:[%s3188_s1 + $0x374] sm:$0xf]  ;;  %v1636_v63 = vld [vmem:[%s3188_s1 + $0x1e8] sm:$0xf0] }
  0x46   :  { %1150 = vmatpush.bf16.msra.mxu2 %v1519_v45  ;;  %1104 = vmatmul.bf16.vlgmr.msrb.gmra.mxu3 %v2673_v1  ;;  %v1931_v45 = vor.u32 %v2112_v32, %v1930_v31  ;;  %v1423_v46 = vor.u32 %v1983_v33, %v1420_v36  ;;  %v1524_v31 = vld [vmem:[%s3188_s1 + $0x108] sm:$0xf0]  ;;  %v2039_v32 = vld [vmem:[%s3188_s1 + $0x1f4] sm:$0xf]  ;;  %v1644_v33 = vld [vmem:[%s3188_s1 + $0x1f8] sm:$0xf0] }
  0x47   :  { %1168 = vmatpush.bf16.msra.mxu3 %v1583_v56  ;;  %v2110_v56 = vld [vmem:[%s3188_s1 + $0x424] sm:$0xf0]  ;;  %v1708_v36 = vld [vmem:[%s3188_s1 + $0x278] sm:$0xf0]  ;;  %v2067_v19 = vld [vmem:[%s3188_s1 + $0x2d4] sm:$0xf] }
  0x48   :  { %1115 = vmatpush.bf16.msra.mxu0 %v1955_v2  ;;  %v1476_v2 = vld [vmem:[%s3188_s1 + $0xa8] sm:$0xf0]  ;;  %v1772_v38 = vld [vmem:[%s3188_s1 + $0x2f8] sm:$0xf0]  ;;  %v2083_v21 = vld [vmem:[%s3188_s1 + $0x354] sm:$0xf] }
  0x49   :  { %1133 = vmatpush.bf16.msra.mxu1 %v1447_v3  ;;  %v2777_v3 = vpack.c.b16 %v210_v39, %v210_v39  ;;  %v1479_v10 = vor.u32 %v1997_v0, %v1476_v2  ;;  %v1399_v39 = vor.u32 %v1977_v25, %v1396_v26  ;;  %v1836_v43 = vld [vmem:[%s3188_s1 + $0x378] sm:$0xf0]  ;;  %v2053_v0 = vld [vmem:[%s3188_s1 + $0x264] sm:$0xf] }
  0x4a   :  { %1151 = vmatpush.bf16.msra.mxu2 %v1511_v4  ;;  %v2779_v4 = vpack.c.b16 %v211_v40, %v211_v40  ;;  %v1839_v58 = vor.u32 %v2087_v41, %v1836_v43  ;;  %v1692_v18 = vld [vmem:[%s3188_s1 + $0x258] sm:$0xf0]  ;;  %v2049_v26 = vld [vmem:[%s3188_s1 + $0x244] sm:$0xf]  ;;  %v2063_v43 = vld [vmem:[%s3188_s1 + $0x2b4] sm:$0xf] }
  0x4b   :  { %1169 = vmatpush.bf16.msra.mxu3 %v1575_v8  ;;  %v1923_v8 = vor.u32 %v2110_v56, %v1922_v51  ;;  %v1775_v56 = vor.u32 %v2071_v37, %v1772_v38  ;;  %v1820_v22 = vld [vmem:[%s3188_s1 + $0x358] sm:$0xf0]  ;;  %v2047_v38 = vld [vmem:[%s3188_s1 + $0x234] sm:$0xf] }
  0x4c   :  { %1116 = vmatpush.bf16.msra.mxu0 %v1947_v14  ;;  %v1543_v14 = vor.u32 %v2013_v5, %v1540_v6  ;;  %v1700_v5 = vld [vmem:[%s3188_s1 + $0x268] sm:$0xf0]  ;;  %v2069_v6 = vld [vmem:[%s3188_s1 + $0x2e4] sm:$0xf]  ;;  %v1612_v37 = vld [vmem:[%s3188_s1 + $0x1b8] sm:$0xf0] }
  0x4d   :  { %1134 = vmatpush.bf16.msra.mxu1 %v1439_v15  ;;  %v1404_v15 = vld [vmem:[%s3188_s1 + $0x18] sm:$0xf0] }
  0x4e   :  { %1152 = vmatpush.bf16.msra.mxu2 %v1503_v16  ;;  %v1995_v16 = vld [vmem:[%s3188_s1 + $0x94] sm:$0xf]  ;;  %v1407_v23 = vor.u32 %v1979_v13, %v1404_v15  ;;  %v1628_v15 = vld [vmem:[%s3188_s1 + $0x1d8] sm:$0xf0] }
  0x4f   :  { %1170 = vmatpush.bf16.msra.mxu3 %v1567_v20  ;;  %v1915_v20 = vor.u32 %v2108_v12, %v1914_v11  ;;  %v1471_v24 = vor.u32 %v1995_v16, %v1468_v17  ;;  %v1703_v12 = vor.u32 %v2053_v0, %v1700_v5  ;;  %v2051_v16 = vld [vmem:[%s3188_s1 + $0x254] sm:$0xf]  ;;  %v1676_v41 = vld [vmem:[%s3188_s1 + $0x238] sm:$0xf0] }
  0x50   :  { %1117 = vmatpush.bf16.msra.mxu0 %v1939_v27  ;;  %v1993_v27 = vld [vmem:[%s3188_s1 + $0x84] sm:$0xf] }
  0x51   :  { %1135 = vmatpush.bf16.msra.mxu1 %v1431_v29  ;;  %v1460_v29 = vld [vmem:[%s3188_s1 + $0x88] sm:$0xf0] }
  0x52   :  { %1153 = vmatpush.bf16.msra.mxu2 %v1495_v30  ;;  %v2009_v30 = vld [vmem:[%s3188_s1 + $0x104] sm:$0xf]  ;;  %v1463_v40 = vor.u32 %v1993_v27, %v1460_v29  ;;  %v1684_v27 = vld [vmem:[%s3188_s1 + $0x248] sm:$0xf0] }
  0x53   :  { %1171 = vmatpush.bf16.msra.mxu3 %v1559_v34  ;;  %1055 = vmatmul.bf16.gmra.mxu0 %v2766_v59  ;;  %v2055_v34 = vld [vmem:[%s3188_s1 + $0x274] sm:$0xf]  ;;  %v1527_v44 = vor.u32 %v2009_v30, %v1524_v31  ;;  %v1748_v29 = vld [vmem:[%s3188_s1 + $0x2c8] sm:$0xf0]  ;;  %v2081_v30 = vld [vmem:[%s3188_s1 + $0x344] sm:$0xf] }
  0x54   :  { %1118 = vmatpush.bf16.msra.mxu0 %v1931_v45  ;;  %1073 = vmatmul.bf16.gmra.mxu1 %v2777_v3  ;;  %v1647_v45 = vor.u32 %v2039_v32, %v1644_v33  ;;  %v1711_v51 = vor.u32 %v2055_v34, %v1708_v36  ;;  %v1812_v31 = vld [vmem:[%s3188_s1 + $0x348] sm:$0xf0]  ;;  %v27_v32 = vld [vmem:[%s3189_s0 + $0x68] sm:$0xf]  ;;  %v1687_v34 = vor.u32 %v2049_v26, %v1684_v27  ;;  %v2031_v36 = vld [vmem:[%s3188_s1 + $0x1b4] sm:$0xf] }
  0x55   :  { %1136 = vmatpush.bf16.msra.mxu1 %v1423_v46  ;;  %1091 = vmatmul.bf16.gmra.mxu2 %v2779_v4  ;;  %v1390_v46 = vld [vmem:[%s3189_s0 + $0x20] sm:$0xf]  ;;  %v1716_v27 = vld [vmem:[%s3188_s1 + $0x288] sm:$0xf0] }
  0x56   :  { %1154 = vmatpush.bf16.msra.mxu2 %v1487_v50  ;;  %1109 = vmatmul.bf16.gmra.mxu3 %v2787_v7  ;;  %v1976_v50 = vld [vmem:[%s3189_s0 + $0x40] sm:$0xf0] }
  0x57   :  { %1172 = vmatpush.bf16.msra.mxu3 %v1551_v60  ;;  %v2037_v60 = vld [vmem:[%s3188_s1 + $0x1e4] sm:$0xf]  ;;  %v2880_v2 = vor.u32 %v1976_v50, %v1390_v46  ;;  %v1804_v46 = vld [vmem:[%s3188_s1 + $0x338] sm:$0xf0]  ;;  %v1615_v50 = vor.u32 %v2031_v36, %v1612_v37 }
  0x58   :  { %1119 = vmatpush.bf16.msra.mxu0 %v1923_v8  ;;  %v1764_v8 = vld [vmem:[%s3188_s1 + $0x2e8] sm:$0xf0]  ;;  %v1639_v11 = vor.u32 %v2037_v60, %v1636_v63  ;;  %v2045_v63 = vld [vmem:[%s3188_s1 + $0x224] sm:$0xf] }
  0x59   :  { %1137 = vmatpush.bf16.msra.mxu1 %v1415_v9  ;;  %v2085_v9 = vld [vmem:[%s3188_s1 + $0x364] sm:$0xf]  ;;  %v1767_v13 = vor.u32 %v2069_v6, %v1764_v8  ;;  %v1604_v60 = vld [vmem:[%s3188_s1 + $0x1a8] sm:$0xf0] }
  0x5a   :  { %1155 = vmatpush.bf16.msra.mxu2 %v1479_v10  ;;  %v1828_v10 = vld [vmem:[%s3188_s1 + $0x368] sm:$0xf0]  ;;  %v2061_v8 = vld [vmem:[%s3188_s1 + $0x2a4] sm:$0xf] }
  0x5b   :  { %1173 = vmatpush.bf16.msra.mxu3 %v1543_v14  ;;  %v2035_v14 = vld [vmem:[%s3188_s1 + $0x1d4] sm:$0xf]  ;;  %v1831_v17 = vor.u32 %v2085_v9, %v1828_v10  ;;  %v1668_v6 = vld [vmem:[%s3188_s1 + $0x228] sm:$0xf0]  ;;  %v2077_v10 = vld [vmem:[%s3188_s1 + $0x324] sm:$0xf] }
  0x5c   :  { %1120 = vmatpush.bf16.msra.mxu0 %v1915_v20  ;;  %v1756_v20 = vld [vmem:[%s3188_s1 + $0x2d8] sm:$0xf0]  ;;  %v1732_v9 = vld [vmem:[%s3188_s1 + $0x2a8] sm:$0xf0] }
  0x5d   :  { %1138 = vmatpush.bf16.msra.mxu1 %v1407_v23  ;;  %v1631_v23 = vor.u32 %v2035_v14, %v1628_v15  ;;  %v1759_v25 = vor.u32 %v2067_v19, %v1756_v20  ;;  %v1735_v14 = vor.u32 %v2061_v8, %v1732_v9  ;;  %v2027_v15 = vld [vmem:[%s3188_s1 + $0x194] sm:$0xf]  ;;  %v1660_v19 = vld [vmem:[%s3188_s1 + $0x218] sm:$0xf0] }
  0x5e   :  { %1156 = vmatpush.bf16.msra.mxu2 %v1471_v24  ;;  %v1695_v24 = vor.u32 %v2051_v16, %v1692_v18  ;;  %v1596_v16 = vld [vmem:[%s3188_s1 + $0x198] sm:$0xf0]  ;;  %v2059_v20 = vld [vmem:[%s3188_s1 + $0x294] sm:$0xf] }
  0x5f   :  { %1174 = vmatpush.bf16.msra.mxu3 %v1535_v28  ;;  %v2065_v28 = vld [vmem:[%s3188_s1 + $0x2c4] sm:$0xf]  ;;  %v2095_v8 = vld [vmem:[%s3188_s1 + $0x3b4] sm:$0xf]  ;;  %v1868_v9 = vld [vmem:[%s3188_s1 + $0x3b8] sm:$0xf0] }
  0x60   :  { %1121 = vmatpush.bf16.msra.mxu0 %v1907_v35  ;;  %v1751_v35 = vor.u32 %v2065_v28, %v1748_v29  ;;  %v2073_v28 = vld [vmem:[%s3188_s1 + $0x304] sm:$0xf]  ;;  %v1780_v29 = vld [vmem:[%s3188_s1 + $0x308] sm:$0xf0] }
  0x61   :  { %1139 = vmatpush.bf16.msra.mxu1 %v1399_v39  ;;  %v1815_v39 = vor.u32 %v2081_v30, %v1812_v31  ;;  %v2103_v30 = vld [vmem:[%s3188_s1 + $0x3f4] sm:$0xf]  ;;  %v1900_v31 = vld [vmem:[%s3188_s1 + $0x3f8] sm:$0xf0]  ;;  %v1783_v37 = vor.u32 %v2073_v28, %v1780_v29 }
  0x62   :  { %1157 = vmatpush.bf16.msra.mxu2 %v1463_v40  ;;  %v213_v40 = vunpack.c.l.b16 %v27_v32 }
  0x63   :  { %1175 = vmatpush.bf16.msra.mxu3 %v1527_v44  ;;  %1122 = vmatmul.bf16.vlgmr.msra.gmra.mxu0 %v2880_v2  ;;  %v1740_v44 = vld [vmem:[%s3188_s1 + $0x2b8] sm:$0xf0] }
  0x64   :  { %1186 = vmatpush.bf16.msrb.mxu0 %v1647_v45  ;;  %1140 = vmatmul.bf16.vlgmr.msra.gmra.mxu1 %v2394_v48  ;;  %v2033_v48 = vld [vmem:[%s3188_s1 + $0x1c4] sm:$0xf]  ;;  %v2079_v45 = vld [vmem:[%s3188_s1 + $0x334] sm:$0xf]  ;;  %v2985_v0 = vpack.c.b16 %v213_v40, %v213_v40 }
  0x65   :  { %1204 = vmatpush.bf16.msrb.mxu1 %v1711_v51  ;;  %1158 = vmatmul.bf16.vlgmr.msra.gmra.mxu2 %v2405_v53  ;;  %v1620_v53 = vld [vmem:[%s3188_s1 + $0x1c8] sm:$0xf0]  ;;  %v1679_v51 = vor.u32 %v2047_v38, %v1676_v41  ;;  %v1807_v5 = vor.u32 %v2079_v45, %v1804_v46  ;;  %v1903_v38 = vor.u32 %v2103_v30, %v1900_v31  ;;  %v2101_v40 = vld [vmem:[%s3188_s1 + $0x3e4] sm:$0xf] }
  0x66   :  { %1222 = vmatpush.bf16.msrb.mxu2 %v1775_v56  ;;  %1176 = vmatmul.bf16.vlgmr.msra.gmra.mxu3 %v2407_v54  ;;  %v1823_v54 = vor.u32 %v2083_v21, %v1820_v22  ;;  %v1623_v33 = vor.u32 %v2033_v48, %v1620_v53  ;;  %v1743_v56 = vor.u32 %v2063_v43, %v1740_v44  ;;  %v1724_v21 = vld [vmem:[%s3188_s1 + $0x298] sm:$0xf0]  ;;  %v2075_v22 = vld [vmem:[%s3188_s1 + $0x314] sm:$0xf]  ;;  %v1588_v48 = vld [vmem:[%s3188_s1 + $0x188] sm:$0xf0] }
  0x67   :  { %1240 = vmatpush.bf16.msrb.mxu3 %v1839_v58  ;;  %v2029_v58 = vld [vmem:[%s3188_s1 + $0x1a4] sm:$0xf]  ;;  %v1892_v41 = vld [vmem:[%s3188_s1 + $0x3e8] sm:$0xf0] }
  0x68   :  { %1187 = vmatpush.bf16.msrb.mxu0 %v1639_v11  ;;  %v1796_v11 = vld [vmem:[%s3188_s1 + $0x328] sm:$0xf0]  ;;  %v2041_v53 = vld [vmem:[%s3188_s1 + $0x204] sm:$0xf]  ;;  %v1895_v45 = vor.u32 %v2101_v40, %v1892_v41 }
  0x69   :  { %1205 = vmatpush.bf16.msrb.mxu1 %v1703_v12  ;;  %v1607_v12 = vor.u32 %v2029_v58, %v1604_v60  ;;  %v1799_v18 = vor.u32 %v2077_v10, %v1796_v11  ;;  %v2117_v43 = vld [vmem:[%s3188_s1 + $0x464] sm:$0xf]  ;;  %v1956_v44 = vld [vmem:[%s3188_s1 + $0x468] sm:$0xf0]  ;;  %v1948_v58 = vld [vmem:[%s3188_s1 + $0x458] sm:$0xf0] }
  0x6a   :  { %1223 = vmatpush.bf16.msrb.mxu2 %v1767_v13  ;;  %v1671_v13 = vor.u32 %v2045_v63, %v1668_v6  ;;  %v1959_v46 = vor.u32 %v2117_v43, %v1956_v44  ;;  %v2111_v10 = vld [vmem:[%s3188_s1 + $0x434] sm:$0xf]  ;;  %v1932_v11 = vld [vmem:[%s3188_s1 + $0x438] sm:$0xf0] }
  0x6b   :  { %1241 = vmatpush.bf16.msrb.mxu3 %v1831_v17  ;;  %v2043_v17 = vld [vmem:[%s3188_s1 + $0x214] sm:$0xf] }
  0x6c   :  { %1188 = vmatpush.bf16.msrb.mxu0 %v1631_v23  ;;  %v1788_v23 = vld [vmem:[%s3188_s1 + $0x318] sm:$0xf0] }
  0x6d   :  { %1206 = vmatpush.bf16.msrb.mxu1 %v1695_v24  ;;  %v1599_v24 = vor.u32 %v2027_v15, %v1596_v16  ;;  %v1791_v26 = vor.u32 %v2075_v22, %v1788_v23  ;;  %v1860_v15 = vld [vmem:[%s3188_s1 + $0x3a8] sm:$0xf0]  ;;  %v2109_v16 = vld [vmem:[%s3188_s1 + $0x424] sm:$0xf]  ;;  %v2107_v22 = vld [vmem:[%s3188_s1 + $0x414] sm:$0xf] }
  0x6e   :  { %1224 = vmatpush.bf16.msrb.mxu2 %v1759_v25  ;;  %v2025_v25 = vld [vmem:[%s3188_s1 + $0x184] sm:$0xf]  ;;  %v1916_v23 = vld [vmem:[%s3188_s1 + $0x418] sm:$0xf0] }
  0x6f   :  { %1242 = vmatpush.bf16.msrb.mxu3 %v1823_v54  ;;  %v2057_v54 = vld [vmem:[%s3188_s1 + $0x284] sm:$0xf]  ;;  %v1591_v32 = vor.u32 %v2025_v25, %v1588_v48 }
  0x70   :  { %1189 = vmatpush.bf16.msrb.mxu0 %v1623_v33  ;;  %v2119_v33 = vld [vmem:[%s3188_s1 + $0x474] sm:$0xf]  ;;  %v1719_v36 = vor.u32 %v2057_v54, %v1716_v27  ;;  %v2089_v25 = vld [vmem:[%s3188_s1 + $0x384] sm:$0xf] }
  0x71   :  { %1207 = vmatpush.bf16.msrb.mxu1 %v1687_v34  ;;  %v1964_v34 = vld [vmem:[%s3188_s1 + $0x478] sm:$0xf0] }
  0x72   :  { %1225 = vmatpush.bf16.msrb.mxu2 %v1751_v35 }
  0x73   :  { %1243 = vmatpush.bf16.msrb.mxu3 %v1815_v39  ;;  %1127 = vmatmul.bf16.gmra.mxu0 %v2985_v0  ;;  %v1967_v39 = vor.u32 %v2119_v33, %v1964_v34 }
  0x74   :  { %1190 = vmatpush.bf16.msrb.mxu0 %v1615_v50  ;;  %1145 = vmatmul.bf16.gmra.mxu1 %v2508_v42  ;;  %v1663_v42 = vor.u32 %v2043_v17, %v1660_v19  ;;  %v2099_v50 = vld [vmem:[%s3188_s1 + $0x3d4] sm:$0xf]  ;;  %v1924_v17 = vld [vmem:[%s3188_s1 + $0x428] sm:$0xf0] }
  0x75   :  { %1208 = vmatpush.bf16.msrb.mxu1 %v1679_v51  ;;  %1163 = vmatmul.bf16.gmra.mxu2 %v2519_v47  ;;  %v1727_v47 = vor.u32 %v2059_v20, %v1724_v21  ;;  %v1884_v51 = vld [vmem:[%s3188_s1 + $0x3d8] sm:$0xf0]  ;;  %v1927_v19 = vor.u32 %v2109_v16, %v1924_v17  ;;  %v2091_v20 = vld [vmem:[%s3188_s1 + $0x394] sm:$0xf] }
  0x76   :  { %1226 = vmatpush.bf16.msrb.mxu2 %v1743_v56  ;;  %1181 = vmatmul.bf16.gmra.mxu3 %v2521_v49  ;;  %v1652_v49 = vld [vmem:[%s3188_s1 + $0x208] sm:$0xf0]  ;;  %v2115_v56 = vld [vmem:[%s3188_s1 + $0x454] sm:$0xf]  ;;  %v1887_v60 = vor.u32 %v2099_v50, %v1884_v51  ;;  %v1852_v21 = vld [vmem:[%s3188_s1 + $0x398] sm:$0xf0] }
  0x77   :  { %1244 = vmatpush.bf16.msrb.mxu3 %v1807_v5  ;;  %v1655_v35 = vor.u32 %v2041_v53, %v1652_v49  ;;  %v1951_v63 = vor.u32 %v2115_v56, %v1948_v58  ;;  %v1876_v5 = vld [vmem:[%s3188_s1 + $0x3c8] sm:$0xf0] }
  0x78   :  { %1191 = vmatpush.bf16.msrb.mxu0 %v1607_v12  ;;  %v1871_v12 = vor.u32 %v2095_v8, %v1868_v9 }
  0x79   :  { %1209 = vmatpush.bf16.msrb.mxu1 %v1671_v13  ;;  %v1935_v13 = vor.u32 %v2111_v10, %v1932_v11 }
  0x7a   :  { %1227 = vmatpush.bf16.msrb.mxu2 %v1735_v14  ;;  %v2093_v14 = vld [vmem:[%s3188_s1 + $0x3a4] sm:$0xf] }
  0x7b   :  { %1245 = vmatpush.bf16.msrb.mxu3 %v1799_v18  ;;  %v1863_v18 = vor.u32 %v2093_v14, %v1860_v15 }
  0x7c   :  { %1192 = vmatpush.bf16.msrb.mxu0 %v1599_v24  ;;  %v1855_v24 = vor.u32 %v2091_v20, %v1852_v21 }
  0x7d   :  { %1210 = vmatpush.bf16.msrb.mxu1 %v1663_v42  ;;  %v1844_v42 = vld [vmem:[%s3188_s1 + $0x388] sm:$0xf0] }
  0x7e   :  { %1228 = vmatpush.bf16.msrb.mxu2 %v1727_v47 }
  0x7f   :  { %1246 = vmatpush.bf16.msrb.mxu3 %v1791_v26 }
  0x80   :  { %1193 = vmatpush.bf16.msrb.mxu0 %v1591_v32 }
  0x81   :  { %1211 = vmatpush.bf16.msrb.mxu1 %v1655_v35 }
  0x82   :  { %1229 = vmatpush.bf16.msrb.mxu2 %v1719_v36 }
  0x83   :  { %1247 = vmatpush.bf16.msrb.mxu3 %v1783_v37  ;;  %1194 = vmatmul.bf16.vlgmr.msrb.gmra.mxu0 %v2415_v57  ;;  %v2097_v57 = vld [vmem:[%s3188_s1 + $0x3c4] sm:$0xf] }
  0x84   :  { %1258 = vmatpush.bf16.msra.mxu0 %v1903_v38  ;;  %1212 = vmatmul.bf16.vlgmr.msrb.gmra.mxu1 %v2652_v55  ;;  %v2113_v55 = vld [vmem:[%s3188_s1 + $0x444] sm:$0xf] }
  0x85   :  { %1276 = vmatpush.bf16.msra.mxu1 %v1967_v39  ;;  %1230 = vmatmul.bf16.vlgmr.msrb.gmra.mxu2 %v2663_v61  ;;  %v1940_v61 = vld [vmem:[%s3188_s1 + $0x448] sm:$0xf0] }
  0x86   :  { %2121 = vmatpush.bf16.msra.mxu2 %v1903_v38  ;;  %1248 = vmatmul.bf16.vlgmr.msrb.gmra.mxu3 %v2665_v62  ;;  %v1879_v62 = vor.u32 %v2097_v57, %v1876_v5  ;;  %v1943_v6 = vor.u32 %v2113_v55, %v1940_v61 }
  0x87   :  { %2129 = vmatpush.bf16.msra.mxu3 %v1967_v39 }
  0x88   :  { %1259 = vmatpush.bf16.msra.mxu0 %v1895_v45 }
  0x89   :  { %1277 = vmatpush.bf16.msra.mxu1 %v1959_v46 }
  0x8a   :  { %2122 = vmatpush.bf16.msra.mxu2 %v1895_v45 }
  0x8b   :  { %2130 = vmatpush.bf16.msra.mxu3 %v1959_v46 }
  0x8c   :  { %1260 = vmatpush.bf16.msra.mxu0 %v1887_v60 }
  0x8d   :  { %1278 = vmatpush.bf16.msra.mxu1 %v1951_v63 }
  0x8e   :  { %2123 = vmatpush.bf16.msra.mxu2 %v1887_v60 }
  0x8f   :  { %2131 = vmatpush.bf16.msra.mxu3 %v1951_v63 }
  0x90   :  { %1261 = vmatpush.bf16.msra.mxu0 %v1879_v62 }
  0x91   :  { %1279 = vmatpush.bf16.msra.mxu1 %v1943_v6 }
  0x92   :  { %2124 = vmatpush.bf16.msra.mxu2 %v1879_v62 }
  0x93   :  { %2132 = vmatpush.bf16.msra.mxu3 %v1943_v6  ;;  %1199 = vmatmul.bf16.gmra.mxu0 %v2529_v52  ;;  %v1919_v52 = vor.u32 %v2107_v22, %v1916_v23 }
  0x94   :  { %1262 = vmatpush.bf16.msra.mxu0 %v1871_v12  ;;  %1217 = vmatmul.bf16.gmra.mxu1 %v2766_v59  ;;  %v2105_v59 = vld [vmem:[%s3188_s1 + $0x404] sm:$0xf] }
  0x95   :  { %1280 = vmatpush.bf16.msra.mxu1 %v1935_v13  ;;  %1235 = vmatmul.bf16.gmra.mxu2 %v2777_v3  ;;  %v1908_v3 = vld [vmem:[%s3188_s1 + $0x408] sm:$0xf0] }
  0x96   :  { %2125 = vmatpush.bf16.msra.mxu2 %v1871_v12  ;;  %1253 = vmatmul.bf16.gmra.mxu3 %v2779_v4  ;;  %v1847_v4 = vor.u32 %v2089_v25, %v1844_v42  ;;  %v1911_v47 = vor.u32 %v2105_v59, %v1908_v3 }
  0x97   :  { %2133 = vmatpush.bf16.msra.mxu3 %v1935_v13 }
  0x98   :  { %1263 = vmatpush.bf16.msra.mxu0 %v1863_v18 }
  0x99   :  { %1281 = vmatpush.bf16.msra.mxu1 %v1927_v19 }
  0x9a   :  { %2126 = vmatpush.bf16.msra.mxu2 %v1863_v18 }
  0x9b   :  { %2134 = vmatpush.bf16.msra.mxu3 %v1927_v19 }
  0x9c   :  { %1264 = vmatpush.bf16.msra.mxu0 %v1855_v24 }
  0x9d   :  { %1282 = vmatpush.bf16.msra.mxu1 %v1919_v52 }
  0x9e   :  { %2127 = vmatpush.bf16.msra.mxu2 %v1855_v24 }
  0x9f   :  { %2135 = vmatpush.bf16.msra.mxu3 %v1919_v52 }
  0xa0   :  { %1265 = vmatpush.bf16.msra.mxu0 %v1847_v4  ;;  %v979_v48 = vpop.f32.mrf.mxu0 }
  0xa1   :  { %1283 = vmatpush.bf16.msra.mxu1 %v1911_v47  ;;  %v997_v53 = vpop.f32.mrf.mxu1 }
  0xa2   :  { %2128 = vmatpush.bf16.msra.mxu2 %v1847_v4  ;;  %v998_v40 = vadd.f32 %v997_v53, %v979_v48 }
  0xa3   :  { %2136 = vmatpush.bf16.msra.mxu3 %v1911_v47  ;;  %1266 = vmatmul.bf16.vlgmr.msra.gmra.mxu0 %v2673_v1 }
  0xa4   :  { %1284 = vmatmul.bf16.vlgmr.msra.gmra.mxu1 %v2880_v2 }
  0xa5   :  { %1271 = vmatmul.bf16.vlgmr.msra.gmra.mxu2 %v2787_v7 }
  0xa6   :  { %1289 = vmatmul.bf16.vlgmr.msra.gmra.mxu3 %v2985_v0 }
  0xa8   :  { %v1015_v49 = vpop.f32.mrf.mxu2  ;;  %v981_v54 = vpop.f32.mrf.mxu0 }
  0xa9   :  { %v1033_v26 = vpop.f32.mrf.mxu3  ;;  %v999_v27 = vpop.f32.mrf.mxu1  ;;  %v1016_v41 = vadd.f32 %v1015_v49, %v998_v40 }
  0xaa   :  { %v1000_v51 = vadd.f32 %v999_v27, %v981_v54 }
  0xab   :  { %v1034_v50 = vadd.f32 %v1033_v26, %v1016_v41 }
  0xb0   :  { %v1017_v28 = vpop.f32.mrf.mxu2  ;;  %v984_v30 = vpop.f32.mrf.mxu0 }
  0xb1   :  { %v1035_v29 = vpop.f32.mrf.mxu3  ;;  %v1002_v31 = vpop.f32.mrf.mxu1  ;;  %v1018_v58 = vadd.f32 %v1017_v28, %v1000_v51 }
  0xb2   :  { %v1003_v6 = vadd.f32 %v1002_v31, %v984_v30 }
  0xb3   :  { %v1036_v61 = vadd.f32 %v1035_v29, %v1018_v58 }
  0xb8   :  { %v1020_v32 = vpop.f32.mrf.mxu2  ;;  %v986_v34 = vpop.f32.mrf.mxu0 }
  0xb9   :  { %v1038_v33 = vpop.f32.mrf.mxu3  ;;  %v1004_v35 = vpop.f32.mrf.mxu1  ;;  %v1021_v9 = vadd.f32 %v1020_v32, %v1003_v6 }
  0xbb   :  { %v1039_v17 = vadd.f32 %v1038_v33, %v1021_v9 }
  0xc0   :  { %v1022_v36 = vpop.f32.mrf.mxu2  ;;  %v1051_v37 = vpop.f32.mrf.mxu0 }
  0xc1   :  { %v1040_v1 = vpop.f32.mrf.mxu3  ;;  %v1069_v7 = vpop.f32.mrf.mxu1  ;;  %v1052_v56 = vadd.f32 %v1051_v37, %v1034_v50 }
  0xc3   :  { %v1070_v5 = vadd.f32 %v1069_v7, %v1052_v56 }
  0xc8   :  { %v1087_v38 = vpop.f32.mrf.mxu2  ;;  %v1053_v39 = vpop.f32.mrf.mxu0 }
  0xc9   :  { %v1105_v2 = vpop.f32.mrf.mxu3  ;;  %v1071_v0 = vpop.f32.mrf.mxu1  ;;  %v1088_v62 = vadd.f32 %v1087_v38, %v1070_v5  ;;  %v1054_v8 = vadd.f32 %v1053_v39, %v1036_v61 }
  0xcb   :  { %v1106_v10 = vadd.f32 %v1105_v2, %v1088_v62  ;;  %v1072_v14 = vadd.f32 %v1071_v0, %v1054_v8 }
  0xd0   :  { %v1089_v43 = vpop.f32.mrf.mxu2  ;;  %v1056_v45 = vpop.f32.mrf.mxu0 }
  0xd1   :  { %v1107_v44 = vpop.f32.mrf.mxu3  ;;  %v1074_v46 = vpop.f32.mrf.mxu1  ;;  %v1090_v18 = vadd.f32 %v1089_v43, %v1072_v14  ;;  %v1057_v19 = vadd.f32 %v1056_v45, %v1039_v17 }
  0xd3   :  { %v1108_v20 = vadd.f32 %v1107_v44, %v1090_v18  ;;  %v1075_v24 = vadd.f32 %v1074_v46, %v1057_v19 }
  0xd8   :  { %v1092_v60 = vpop.f32.mrf.mxu2  ;;  %v1058_v57 = vpop.f32.mrf.mxu0 }
  0xd9   :  { %v1110_v63 = vpop.f32.mrf.mxu3  ;;  %v1076_v55 = vpop.f32.mrf.mxu1  ;;  %v1093_v42 = vadd.f32 %v1092_v60, %v1075_v24 }
  0xdb   :  { %v1111_v48 = vadd.f32 %v1110_v63, %v1093_v42 }
  0xe0   :  { %v1094_v11 = vpop.f32.mrf.mxu2  ;;  %v1123_v13 = vpop.f32.mrf.mxu0 }
  0xe1   :  { %v1112_v12 = vpop.f32.mrf.mxu3  ;;  %v1124_v15 = vadd.f32 %v1123_v13, %v1106_v10  ;;  %v1141_v16 = vpop.f32.mrf.mxu1 }
  0xe3   :  { %1294 = vst [vmem:[%s3190_s2] sm:$0xff] %v1124_v15  ;;  %v1316_v59 = vmul.f32 %v1124_v15, %v1124_v15 }
  0xe8   :  { %v1159_v21 = vpop.f32.mrf.mxu2  ;;  %v1125_v23 = vpop.f32.mrf.mxu0 }
  0xe9   :  { %v1177_v22 = vpop.f32.mrf.mxu3  ;;  %v1126_v52 = vadd.f32 %v1125_v23, %v1108_v20  ;;  %v1143_v25 = vpop.f32.mrf.mxu1  ;;  %v1160_v57 = vadd.f32 %v1159_v21, %v1141_v16 }
  0xeb   :  { %1296 = vst [vmem:[%s3190_s2 + $0x10] sm:$0xff] %v1126_v52  ;;  %v1300_v3 = vadd.f32 %v1126_v52, %v1124_v15  ;;  %v1318_v4 = vmul.f32 %v1126_v52, %v1126_v52  ;;  %v1178_v6 = vadd.f32 %v1177_v22, %v1160_v57 }
  0xed   :  { %v1322_v47 = vadd.f32 %v1318_v4, %v1316_v59 }
  0xf0   :  { %v1161_v53 = vpop.f32.mrf.mxu2  ;;  %v1128_v26 = vpop.f32.mrf.mxu0 }
  0xf1   :  { %v1179_v49 = vpop.f32.mrf.mxu3  ;;  %v1129_v54 = vadd.f32 %v1128_v26, %v1111_v48  ;;  %v1146_v27 = vpop.f32.mrf.mxu1  ;;  %v1162_v10 = vadd.f32 %v1161_v53, %v1143_v25 }
  0xf3   :  { %1298 = vst [vmem:[%s3190_s2 + $0x20] sm:$0xff] %v1129_v54  ;;  %v1301_v28 = vadd.f32 %v1300_v3, %v1129_v54  ;;  %v1320_v29 = vmul.f32 %v1129_v54, %v1129_v54  ;;  %v1180_v18 = vadd.f32 %v1179_v49, %v1162_v10 }
  0xf5   :  { %v1302_v30 = vrot.slane %v1301_v28, 4  ;;  %v1323_v31 = vadd.f32 %v1322_v47, %v1320_v29 }
  0xf7   :  { %v1303_v32 = vadd.f32 %v1302_v30, %v1301_v28  ;;  %v1324_v33 = vrot.slane %v1323_v31, 4 }
  0xf8   :  { %v1164_v34 = vpop.f32.mrf.mxu2  ;;  %v1130_v36 = vpop.f32.mrf.mxu0 }
  0xf9   :  { %v1182_v35 = vpop.f32.mrf.mxu3  ;;  %v1304_v1 = vrot.slane %v1303_v32, 2  ;;  %v1325_v37 = vadd.f32 %v1324_v33, %v1323_v31  ;;  %v1148_v7 = vpop.f32.mrf.mxu1  ;;  %v1165_v9 = vadd.f32 %v1164_v34, %v1146_v27 }
  0xfb   :  { %v1305_v38 = vadd.f32 %v1304_v1, %v1303_v32  ;;  %v1326_v2 = vrot.slane %v1325_v37, 2  ;;  %v1183_v17 = vadd.f32 %v1182_v35, %v1165_v9 }
  0xfd   :  { %v1306_v39 = vrot.slane %v1305_v38, 1  ;;  %v1327_v0 = vadd.f32 %v1326_v2, %v1325_v37 }
  0xff   :  { %v1328_v40 = vrot.slane %v1327_v0, 1  ;;  %v1307_v45 = vadd.f32 %v1306_v39, %v1305_v38 }
 0x100   :  { %v1166_v41 = vpop.f32.mrf.mxu2  ;;  %v1195_v44 = vpop.f32.mrf.mxu0 }
 0x101   :  { %v1184_v43 = vpop.f32.mrf.mxu3  ;;  %v1329_v46 = vadd.f32 %v1328_v40, %v1327_v0  ;;  %v1213_v50 = vpop.f32.mrf.mxu1  ;;  %v1196_v8 = vadd.f32 %v1195_v44, %v1178_v6 }
 0x103   :  { %v3172_v51 = vsel %vm1338_vm0, %v1307_v45, %v1329_v46  ;;  %v1214_v14 = vadd.f32 %v1213_v50, %v1196_v8 }
 0x108   :  { %v1231_v56 = vpop.f32.mrf.mxu2  ;;  %v1197_v60 = vpop.f32.mrf.mxu0 }
 0x109   :  { %v1249_v58 = vpop.f32.mrf.mxu3  ;;  %v1215_v63 = vpop.f32.mrf.mxu1  ;;  %v1232_v19 = vadd.f32 %v1231_v56, %v1214_v14  ;;  %v1198_v23 = vadd.f32 %v1197_v60, %v1180_v18 }
 0x10b   :  { %v1250_v24 = vadd.f32 %v1249_v58, %v1232_v19  ;;  %v1216_v59 = vadd.f32 %v1215_v63, %v1198_v23 }
 0x110   :  { %v1233_v5 = vpop.f32.mrf.mxu2  ;;  %v1200_v61 = vpop.f32.mrf.mxu0 }
 0x111   :  { %v1251_v55 = vpop.f32.mrf.mxu3  ;;  %v1218_v62 = vpop.f32.mrf.mxu1  ;;  %v1201_v20 = vadd.f32 %v1200_v61, %v1183_v17  ;;  %v1234_v25 = vadd.f32 %v1233_v5, %v1216_v59 }
 0x113   :  { %v1219_v21 = vadd.f32 %v1218_v62, %v1201_v20  ;;  %v1252_v53 = vadd.f32 %v1251_v55, %v1234_v25 }
 0x118   :  { %v1236_v11 = vpop.f32.mrf.mxu2  ;;  %v1202_v13 = vpop.f32.mrf.mxu0 }
 0x119   :  { %v1254_v12 = vpop.f32.mrf.mxu3  ;;  %v1220_v15 = vpop.f32.mrf.mxu1  ;;  %v1237_v4 = vadd.f32 %v1236_v11, %v1219_v21 }
 0x11b   :  { %v1255_v48 = vadd.f32 %v1254_v12, %v1237_v4 }
 0x120   :  { %v1238_v16 = vpop.f32.mrf.mxu2  ;;  %v1267_v42 = vpop.f32.mrf.mxu0 }
 0x121   :  { %v1256_v52 = vpop.f32.mrf.mxu3  ;;  %v1268_v22 = vadd.f32 %v1267_v42, %v1250_v24  ;;  %v1285_v3 = vpop.f32.mrf.mxu1 }
 0x123   :  { %v1286_v47 = vadd.f32 %v1285_v3, %v1268_v22 }
 0x125   :  { %1295 = vst [vmem:[%s3190_s2 + $0x8] sm:$0xff] %v1286_v47  ;;  %v1317_v32 = vmul.f32 %v1286_v47, %v1286_v47 }
 0x128   :  { %v1272_v49 = vpop.f32.mrf.mxu2  ;;  %v1269_v27 = vpop.f32.mrf.mxu0 }
 0x129   :  { %v1273_v26 = vadd.f32 %v1272_v49, %v1255_v48  ;;  %v1290_v54 = vpop.f32.mrf.mxu3  ;;  %v1270_v28 = vadd.f32 %v1269_v27, %v1252_v53  ;;  %v1287_v30 = vpop.f32.mrf.mxu1 }
 0x12b   :  { %v1291_v29 = vadd.f32 %v1290_v54, %v1273_v26  ;;  %v1288_v31 = vadd.f32 %v1287_v30, %v1270_v28 }
 0x12d   :  { %1299 = vst [vmem:[%s3190_s2 + $0x28] sm:$0xff] %v1291_v29  ;;  %v1308_v33 = vadd.f32 %v1288_v31, %v1286_v47  ;;  %v1319_v34 = vmul.f32 %v1288_v31, %v1288_v31  ;;  %v1321_v35 = vmul.f32 %v1291_v29, %v1291_v29 }
 0x12e   :  { %1297 = vst [vmem:[%s3190_s2 + $0x18] sm:$0xff] %v1288_v31 }
 0x12f   :  { %v1309_v36 = vadd.f32 %v1308_v33, %v1291_v29  ;;  %v1330_v1 = vadd.f32 %v1319_v34, %v1317_v32 }
 0x130   :  { %v1274_v37 = vpop.f32.mrf.mxu2 }
 0x131   :  { %v1292_v7 = vpop.f32.mrf.mxu3  ;;  %v1310_v38 = vrot.slane %v1309_v36, 4  ;;  %v1331_v2 = vadd.f32 %v1330_v1, %v1321_v35 }
 0x133   :  { %v1311_v39 = vadd.f32 %v1310_v38, %v1309_v36  ;;  %v1332_v0 = vrot.slane %v1331_v2, 4 }
 0x135   :  { %v1312_v40 = vrot.slane %v1311_v39, 2  ;;  %v1333_v41 = vadd.f32 %v1332_v0, %v1331_v2 }
 0x137   :  { %v1313_v43 = vadd.f32 %v1312_v40, %v1311_v39  ;;  %v1334_v44 = vrot.slane %v1333_v41, 2 }
 0x139   :  { %v1314_v45 = vrot.slane %v1313_v43, 1  ;;  %v1335_v46 = vadd.f32 %v1334_v44, %v1333_v41 }
 0x13b   :  { %v1336_v50 = vrot.slane %v1335_v46, 1  ;;  %v1315_v56 = vadd.f32 %v1314_v45, %v1313_v43 }
 0x13d   :  { %v1337_v58 = vadd.f32 %v1336_v50, %v1335_v46 }
 0x13f   :  { %v1340_v60 = vsel %vm1338_vm0, %v1315_v56, %v1337_v58 }
 0x140   :  { %v1343_v63 = vrot.slane %v1340_v60, 6 }
 0x142   :  { %v1345_v57 = vsel %vm1344_vm1, %v3172_v51, %v1343_v63 }
 0x143   :  { %1347 = vst [vmem:[%s3191_s3] sm:$0xf] %v1345_v57 }

</bundles_post_ra>
